<compile_context>
chip_gen: v5e
topology: v5e:2x2
jax: 0.10.0
libtpu: 0.0.40
codegen_flags: <defaults>
</compile_context>

<pallas_src>
import functools

import jax
import jax.numpy as jnp
from jax import lax
from jax.experimental import pallas as pl
from jax.experimental.pallas import tpu as pltpu

NEG_SLOPE = 0.01
LANE = 128


def _lrelu(v):
    return jnp.where(v >= 0.0, v, NEG_SLOPE * v)


def _rup(v, m):
    return -(-v // m) * m


def _pad_axis(a, axis, target):
    pad = target - a.shape[axis]
    if pad == 0:
        return a
    cfg = [(0, 0)] * a.ndim
    cfg[axis] = (0, pad)
    return jnp.pad(a, cfg)


def _vmem_limit_bytes():
    """Generation-aware scoped-VMEM budget (v7x has 64 MiB/TC vs 128 MiB on v5e/v6e)."""
    cap = 128 * 1024 * 1024
    try:
        cap = int(getattr(pltpu.get_tpu_info(), "vmem_capacity_bytes", cap))
    except Exception:
        pass
    return (40 if cap <= 64 * 1024 * 1024 else 64) * 1024 * 1024


# ---------------------------------------------------------------------------
# Stage 1 kernel: LeakyReLU(bn1(x)) -> conv1 (1x1x1) -> LeakyReLU(bn2(.))
# Writes each (H, W) slab into the interior of a halo-padded output block so the
# 3x3x3 conv never needs a separate jnp.pad pass.  Grid is (N, D+2): the two
# boundary depth steps only write zeros (the depth halo).
# ---------------------------------------------------------------------------
def stage1_kernel(x_ref, s1_ref, b1_ref, w1_ref, s2_ref, b2_ref, o_ref, *, h, w):
    d = pl.program_id(1)
    interior = jnp.logical_and(d > 0, d < pl.num_programs(1) - 1)

    # Halo rows/cols (and the two boundary depth slabs) are exact zeros.
    o_ref[...] = jnp.zeros_like(o_ref)

    @pl.when(interior)
    def _():
        cin = x_ref.shape[-1]
        xs = x_ref[...].reshape(h * w, cin).astype(jnp.float32)
        a = _lrelu(xs * s1_ref[...] + b1_ref[...]).astype(jnp.bfloat16)
        y = jnp.dot(a, w1_ref[...], preferred_element_type=jnp.float32)
        z = _lrelu(y * s2_ref[...] + b2_ref[...]).astype(jnp.bfloat16)
        o_ref[1:h + 1, 1:w + 1, :] = z.reshape(h, w, -1)


def _stage1(xv, s1, b1, w1, s2, b2, *, vmem_limit):
    N, D, H, W, Cinp = xv.shape
    C4p = w1.shape[1]

    def x_map(n, d):
        # Boundary grid steps (d == 0, d == D+1) just re-read a valid slab; unused.
        return (n, jnp.maximum(jnp.minimum(d - 1, D - 1), 0), 0, 0, 0)

    in_specs = [
        pl.BlockSpec((None, None, H, W, Cinp), x_map),
        pl.BlockSpec((1, Cinp), lambda n, d: (0, 0)),
        pl.BlockSpec((1, Cinp), lambda n, d: (0, 0)),
        pl.BlockSpec((Cinp, C4p), lambda n, d: (0, 0)),
        pl.BlockSpec((1, C4p), lambda n, d: (0, 0)),
        pl.BlockSpec((1, C4p), lambda n, d: (0, 0)),
    ]
    out_spec = pl.BlockSpec((None, None, H + 2, W + 2, C4p),
                            lambda n, d: (n, d, 0, 0, 0))
    return pl.pallas_call(
        functools.partial(stage1_kernel, h=H, w=W),
        out_shape=jax.ShapeDtypeStruct((N, D + 2, H + 2, W + 2, C4p), jnp.bfloat16),
        grid=(N, D + 2),
        in_specs=in_specs,
        out_specs=out_spec,
        compiler_params=pltpu.CompilerParams(
            dimension_semantics=("parallel", "parallel"),
            vmem_limit_bytes=vmem_limit),
    )(xv, s1, b1, w1, s2, b2)


# ---------------------------------------------------------------------------
# Stage 2 kernel: 3x3x3 conv (+bn3 +LeakyReLU +conv3 +residual) per (n, d_out)
#   z*_ref : three halo-padded depth slabs of z2, each (H+2, W+2, C4p) bf16
#   w2_ref : (27, C4p, C4p)  -- one (ci, co) matrix per (kd, kh, kw) tap
#   x_ref  : original-input slab (H, W, Cinp) bf16 (residual source)
#   downsample: residual = conv4(lrelu(bn1(x)))  (recomputed here, never stored)
#   identity  : residual = x
# ---------------------------------------------------------------------------
def conv_stage_kernel(zm_ref, z0_ref, zp_ref, w2_ref, s3_ref, b3_ref, w3_ref,
                      x_ref, *rest, stride, hout, wout, c4p, downsample):
    if downsample:
        s1_ref, b1_ref, w4_ref, o_ref = rest
    else:
        (o_ref,) = rest

    hw = hout * wout

    def tap(z_ref, kh, kw):
        if stride == 1:
            p = z_ref[kh:kh + hout, kw:kw + wout, :]
        else:
            p = z_ref[pl.ds(kh, hout, stride), pl.ds(kw, wout, stride), :]
        return p.reshape(hw, c4p)

    # 27 K=C4p MXU passes accumulated in registers; output stored once per tile.
    acc = None
    for kd, z_ref in enumerate((zm_ref, z0_ref, zp_ref)):
        for kh in range(3):
            for kw in range(3):
                t = (kd * 3 + kh) * 3 + kw
                contrib = jnp.dot(tap(z_ref, kh, kw), w2_ref[t],
                                  preferred_element_type=jnp.float32)
                acc = contrib if acc is None else acc + contrib

    z3 = _lrelu(acc * s3_ref[...] + b3_ref[...]).astype(jnp.bfloat16)
    out = jnp.dot(z3, w3_ref[...], preferred_element_type=jnp.float32)

    # Residual path (no out1 slab in HBM: recompute lrelu(bn1(x)) when needed).
    if stride == 1:
        res = x_ref[...]
    else:
        res = x_ref[pl.ds(0, hout, stride), pl.ds(0, wout, stride), :]
    res = res.reshape(hw, res.shape[-1])
    if downsample:
        r = _lrelu(res.astype(jnp.float32) * s1_ref[...] + b1_ref[...])
        out = out + jnp.dot(r.astype(jnp.bfloat16), w4_ref[...],
                            preferred_element_type=jnp.float32)
    else:
        out = out + res.astype(jnp.float32)
    o_ref[...] = out.astype(o_ref.dtype)


def _conv_stage(zpad, w2f, s3, b3, w3, xv, s1, b1, w4, *, stride, dout, hout, wout,
                vmem_limit):
    N, _, Hp2, Wp2, C4p = zpad.shape
    H, W, Cinp = xv.shape[2], xv.shape[3], xv.shape[4]
    Coutp = w3.shape[1]
    hw = hout * wout
    downsample = w4 is not None

    def zspec(kd):
        return pl.BlockSpec(
            (None, None, Hp2, Wp2, C4p),
            lambda n, d, _kd=kd: (n, d * stride + _kd, 0, 0, 0))

    in_specs = [
        zspec(0), zspec(1), zspec(2),
        pl.BlockSpec((27, C4p, C4p), lambda n, d: (0, 0, 0)),
        pl.BlockSpec((1, C4p), lambda n, d: (0, 0)),
        pl.BlockSpec((1, C4p), lambda n, d: (0, 0)),
        pl.BlockSpec((C4p, Coutp), lambda n, d: (0, 0)),
        pl.BlockSpec((None, None, H, W, Cinp), lambda n, d: (n, d * stride, 0, 0, 0)),
    ]
    args = [zpad, zpad, zpad, w2f, s3, b3, w3, xv]
    if downsample:
        in_specs += [pl.BlockSpec((1, Cinp), lambda n, d: (0, 0)),
                     pl.BlockSpec((1, Cinp), lambda n, d: (0, 0)),
                     pl.BlockSpec((Cinp, Coutp), lambda n, d: (0, 0))]
        args += [s1, b1, w4]

    kernel = functools.partial(conv_stage_kernel, stride=stride, hout=hout,
                               wout=wout, c4p=C4p, downsample=downsample)
    return pl.pallas_call(
        kernel,
        out_shape=jax.ShapeDtypeStruct((N, dout, hw, Coutp), jnp.bfloat16),
        grid=(N, dout),
        in_specs=in_specs,
        out_specs=pl.BlockSpec((None, None, hw, Coutp), lambda n, d: (n, d, 0, 0)),
        compiler_params=pltpu.CompilerParams(
            dimension_semantics=("parallel", "parallel"),
            vmem_limit_bytes=vmem_limit),
    )(*args)


# ---------------------------------------------------------------------------
# Full module forward (NCDHW in / NCDHW out)
# ---------------------------------------------------------------------------
def residual_module_3d(x_ncdhw, params, stride=1):
    f32, bf16 = jnp.float32, jnp.bfloat16
    # Single fused relayout + downcast: NCDHW f32 -> NDHWC bf16 (no f32 intermediate).
    x = jnp.transpose(x_ncdhw, (0, 2, 3, 4, 1)).astype(bf16)
    N, D, H, W, Cin = x.shape
    C4 = params["w1"].shape[-1]
    Cout = params["w3"].shape[-1]
    downsample = (Cin != Cout) or (stride != 1)

    Cinp, C4p, Coutp = _rup(Cin, LANE), _rup(C4, LANE), _rup(Cout, LANE)
    vmem_limit = _vmem_limit_bytes()

    # fold/pad params (padded channels carry exact zeros end-to-end)
    s1 = _pad_axis(params["s1"], 1, Cinp).astype(f32)
    b1 = _pad_axis(params["b1"], 1, Cinp).astype(f32)
    s2 = _pad_axis(params["s2"], 1, C4p).astype(f32)
    b2 = _pad_axis(params["b2"], 1, C4p).astype(f32)
    s3 = _pad_axis(params["s3"], 1, C4p).astype(f32)
    b3 = _pad_axis(params["b3"], 1, C4p).astype(f32)
    w1 = _pad_axis(_pad_axis(params["w1"], 0, Cinp), 1, C4p).astype(bf16)
    w3 = _pad_axis(_pad_axis(params["w3"], 0, C4p), 1, Coutp).astype(bf16)
    w2 = _pad_axis(_pad_axis(params["w2"], 3, C4p), 4, C4p).astype(bf16)
    w2f = w2.reshape(27, C4p, C4p)                 # one (ci, co) matrix per tap
    w4 = None
    if downsample:
        w4 = _pad_axis(_pad_axis(params["w4"], 0, Cinp), 1, Coutp).astype(bf16)

    xv = _pad_axis(x, 4, Cinp)                     # (N, D, H, W, Cinp) bf16

    # ---- stage 1: bn1+lrelu -> conv1 -> bn2+lrelu, halo-padded bf16 output
    zpad = _stage1(xv, s1, b1, w1, s2, b2, vmem_limit=vmem_limit)

    Dout = (D - 1) // stride + 1
    Hout = (H - 1) // stride + 1
    Wout = (W - 1) // stride + 1

    # ---- stage 2: conv2(3x3x3)+bn3+lrelu+conv3 + residual (conv4 or identity)
    out4 = _conv_stage(zpad, w2f, s3, b3, w3, xv, s1, b1, w4, stride=stride,
                       dout=Dout, hout=Hout, wout=Wout, vmem_limit=vmem_limit)
    out = out4.reshape(N, Dout, Hout, Wout, Coutp)[..., :Cout]
    return jnp.transpose(out, (0, 4, 1, 2, 3)).astype(f32)     # back to NCDHW f32


# ---------------------------------------------------------------------------
# Deterministic parameter init (shapes from the PyTorch __init__)
# ---------------------------------------------------------------------------
def init_params(key, inplanes, planes):
    planes_4 = planes // 4
    ks = jax.random.split(key, 7)

    def bn_params(k, c):
        k1, k2, k3, k4 = jax.random.split(k, 4)
        gamma = jax.random.uniform(k1, (c,), minval=0.5, maxval=1.5)
        beta = 0.1 * jax.random.normal(k2, (c,))
        mean = 0.1 * jax.random.normal(k3, (c,))
        var = jax.random.uniform(k4, (c,), minval=0.5, maxval=1.5)
        scale = gamma / jnp.sqrt(var + 1e-5)
        shift = beta - mean * scale
        return (scale.reshape(1, c).astype(jnp.float32),
                shift.reshape(1, c).astype(jnp.float32))

    s1, b1 = bn_params(ks[0], inplanes)
    s2, b2 = bn_params(ks[1], planes_4)
    s3, b3 = bn_params(ks[2], planes_4)
    w1 = (0.1 * jax.random.normal(ks[3], (inplanes, planes_4))).astype(jnp.float32)
    w2 = (0.1 * jax.random.normal(ks[4], (3, 3, 3, planes_4, planes_4))).astype(jnp.float32)
    w3 = (0.1 * jax.random.normal(ks[5], (planes_4, planes))).astype(jnp.float32)
    w4 = (0.1 * jax.random.normal(ks[6], (inplanes, planes))).astype(jnp.float32)
    return dict(s1=s1, b1=b1, s2=s2, b2=b2, s3=s3, b3=b3,
                w1=w1, w2=w2, w3=w3, w4=w4)


# ---------------------------------------------------------------------------
# Pure-JAX reference (mirrors the kernel's bf16 rounding points; final sum in f32)
# ---------------------------------------------------------------------------
def reference(x_ncdhw, params, stride):
    b16 = lambda a: a.astype(jnp.bfloat16).astype(jnp.float32)
    x = b16(jnp.transpose(x_ncdhw, (0, 2, 3, 4, 1)).astype(jnp.float32))
    inplanes = x.shape[-1]
    planes = params["w3"].shape[-1]
    out1 = b16(_lrelu(x * params["s1"][0] + params["b1"][0]))
    y = jnp.einsum("ndhwc,co->ndhwo", out1, b16(params["w1"]))
    y = b16(_lrelu(y * params["s2"][0] + params["b2"][0]))
    y = lax.conv_general_dilated(
        y, b16(params["w2"]), window_strides=(stride,) * 3, padding=((1, 1),) * 3,
        dimension_numbers=("NDHWC", "DHWIO", "NDHWC"))
    y = b16(_lrelu(y * params["s3"][0] + params["b3"][0]))
    y = jnp.einsum("ndhwc,co->ndhwo", y, b16(params["w3"]))
    if inplanes != planes or stride != 1:
        res = jnp.einsum("ndhwc,co->ndhwo",
                         out1[:, ::stride, ::stride, ::stride, :],
                         b16(params["w4"]))
    else:
        res = x
    out = y + res
    return jnp.transpose(out, (0, 4, 1, 2, 3))


if __name__ == "__main__":
    key = jax.random.PRNGKey(0)
    N = 2
    D = H = W = 8

    configs = [
        (8, 16, 1),    # downsample path (channel expansion), fused conv4 epilogue
        (16, 16, 1),   # identity residual path
    ]
    for idx, (inplanes, planes, stride) in enumerate(configs):
        kx, kp = jax.random.split(jax.random.fold_in(key, idx))
        x = jax.random.normal(kx, (N, inplanes, D, H, W), dtype=jnp.float32)
        params = init_params(kp, inplanes, planes)

        fwd = jax.jit(functools.partial(residual_module_3d, stride=stride))
        out = jax.block_until_ready(fwd(x, params))

        Do = (D - 1) // stride + 1
        assert out.shape == (N, planes, Do, Do, Do), out.shape

        ref = reference(x, params, stride)
        err = float(jnp.max(jnp.abs(out - ref)))
        # Base tolerance + one bf16 ulp at the output magnitude (stage-2 stores bf16).
        tol = 2e-2 + float(jnp.max(jnp.abs(ref))) * 2.0 ** -7
        assert err < tol, f"config {idx}: max abs error too large: {err} (tol {tol})"

    print("KERNEL_OK")
</pallas_src>

<mosaic_0001>
module attributes {stable_mosaic.version = 11 : i64} {
  func.func @stage1_kernel(%arg0: i32, %arg1: i32, %arg2: memref<1x1x8x8x128xbf16, #tpu.memory_space<vmem>>, %arg3: memref<1x128xf32, #tpu.memory_space<vmem>>, %arg4: memref<1x128xf32, #tpu.memory_space<vmem>>, %arg5: memref<128x128xbf16, #tpu.memory_space<vmem>>, %arg6: memref<1x128xf32, #tpu.memory_space<vmem>>, %arg7: memref<1x128xf32, #tpu.memory_space<vmem>>, %arg8: memref<1x1x10x10x128xbf16, #tpu.memory_space<vmem>>) attributes {dimension_semantics = [#tpu.dimension_semantics<parallel>, #tpu.dimension_semantics<parallel>], iteration_bounds = array<i64: 2, 10>, scalar_prefetch = 0 : i64, scratch_operands = 0 : i64, tpu.core_type = #tpu.core_type<tc>, window_params = [{transform_indices = @transform_0, window_bounds = array<i64: 1, 1, 8, 8, 128>}, {pipeline_mode = #tpu.pipeline_mode<synchronous>, transform_indices = @transform_1, window_bounds = array<i64: 1, 128>}, {pipeline_mode = #tpu.pipeline_mode<synchronous>, transform_indices = @transform_2, window_bounds = array<i64: 1, 128>}, {pipeline_mode = #tpu.pipeline_mode<synchronous>, transform_indices = @transform_3, window_bounds = array<i64: 128, 128>}, {pipeline_mode = #tpu.pipeline_mode<synchronous>, transform_indices = @transform_4, window_bounds = array<i64: 1, 128>}, {pipeline_mode = #tpu.pipeline_mode<synchronous>, transform_indices = @transform_5, window_bounds = array<i64: 1, 128>}, {transform_indices = @transform_6, window_bounds = array<i64: 1, 1, 10, 10, 128>}]} {
    %c0_i32 = arith.constant 0 : i32
    %0 = arith.cmpi sgt, %arg1, %c0_i32 : i32
    %c9_i32 = arith.constant 9 : i32
    %1 = arith.cmpi slt, %arg1, %c9_i32 : i32
    %2 = arith.andi %0, %1 : i1
    %cst = arith.constant 0.000000e+00 : bf16
    %3 = vector.broadcast %cst : bf16 to vector<10x10x128xbf16>
    %c0 = arith.constant 0 : index
    %c0_0 = arith.constant 0 : index
    %c0_1 = arith.constant 0 : index
    %c0_2 = arith.constant 0 : index
    %c0_3 = arith.constant 0 : index
    %4 = vector.load %arg8[%c0, %c0_0, %c0_1, %c0_2, %c0_3] : memref<1x1x10x10x128xbf16, #tpu.memory_space<vmem>>, vector<1x1x10x10x128xbf16>
    %5 = vector.shape_cast %4 : vector<1x1x10x10x128xbf16> to vector<10x10x128xbf16>
    %6 = vector.shape_cast %3 : vector<10x10x128xbf16> to vector<1x1x10x10x128xbf16>
    tpu.vector_store %arg8[%c0, %c0_0, %c0_1, %c0_2, %c0_3], %6 {strides = array<i32>} : memref<1x1x10x10x128xbf16, #tpu.memory_space<vmem>>, vector<1x1x10x10x128xbf16>,
    %7 = arith.extui %2 : i1 to i32
    %c0_i32_4 = arith.constant 0 : i32
    %8 = arith.cmpi ne, %7, %c0_i32_4 : i32
    scf.if %8 {
      %c0_5 = arith.constant 0 : index
      %c0_6 = arith.constant 0 : index
      %c0_7 = arith.constant 0 : index
      %c0_8 = arith.constant 0 : index
      %c0_9 = arith.constant 0 : index
      %9 = vector.load %arg2[%c0_5, %c0_6, %c0_7, %c0_8, %c0_9] : memref<1x1x8x8x128xbf16, #tpu.memory_space<vmem>>, vector<1x1x8x8x128xbf16>
      %10 = vector.shape_cast %9 : vector<1x1x8x8x128xbf16> to vector<8x8x128xbf16>
      %11 = vector.shape_cast %10 : vector<8x8x128xbf16> to vector<64x128xbf16>
      %12 = arith.extf %11 : vector<64x128xbf16> to vector<64x128xf32>
      %c0_10 = arith.constant 0 : index
      %c0_11 = arith.constant 0 : index
      %13 = vector.load %arg3[%c0_10, %c0_11] : memref<1x128xf32, #tpu.memory_space<vmem>>, vector<1x128xf32>
      %14 = vector.broadcast %13 : vector<1x128xf32> to vector<64x128xf32>
      %15 = arith.mulf %12, %14 : vector<64x128xf32>
      %c0_12 = arith.constant 0 : index
      %c0_13 = arith.constant 0 : index
      %16 = vector.load %arg4[%c0_12, %c0_13] : memref<1x128xf32, #tpu.memory_space<vmem>>, vector<1x128xf32>
      %17 = vector.broadcast %16 : vector<1x128xf32> to vector<64x128xf32>
      %18 = arith.addf %15, %17 : vector<64x128xf32>
      %cst_14 = arith.constant 0.000000e+00 : f32
      %19 = vector.broadcast %cst_14 : f32 to vector<64x128xf32>
      %20 = arith.cmpf oge, %18, %19 : vector<64x128xf32>
      %cst_15 = arith.constant 0.00999999977 : f32
      %21 = vector.broadcast %cst_15 : f32 to vector<64x128xf32>
      %22 = arith.mulf %21, %18 : vector<64x128xf32>
      %23 = arith.select %20, %18, %22 : vector<64x128xi1>, vector<64x128xf32>
      %24 = arith.truncf %23 : vector<64x128xf32> to vector<64x128xbf16>
      %c0_16 = arith.constant 0 : index
      %c0_17 = arith.constant 0 : index
      %25 = vector.load %arg5[%c0_16, %c0_17] : memref<128x128xbf16, #tpu.memory_space<vmem>>, vector<128x128xbf16>
      %cst_18 = arith.constant dense<0.000000e+00> : vector<64x128xf32>
      %26 = tpu.matmul %24, %25, %cst_18 {dimension_numbers = #tpu.dot_dimension_numbers<[1], [0], [0], [1], [0, 0, 1, 1], [], []>} : vector<64x128xbf16>, vector<128x128xbf16>, vector<64x128xf32> -> vector<64x128xf32>
      %c0_19 = arith.constant 0 : index
      %c0_20 = arith.constant 0 : index
      %27 = vector.load %arg6[%c0_19, %c0_20] : memref<1x128xf32, #tpu.memory_space<vmem>>, vector<1x128xf32>
      %28 = vector.broadcast %27 : vector<1x128xf32> to vector<64x128xf32>
      %29 = arith.mulf %26, %28 : vector<64x128xf32>
      %c0_21 = arith.constant 0 : index
      %c0_22 = arith.constant 0 : index
      %30 = vector.load %arg7[%c0_21, %c0_22] : memref<1x128xf32, #tpu.memory_space<vmem>>, vector<1x128xf32>
      %31 = vector.broadcast %30 : vector<1x128xf32> to vector<64x128xf32>
      %32 = arith.addf %29, %31 : vector<64x128xf32>
      %cst_23 = arith.constant 0.000000e+00 : f32
      %33 = vector.broadcast %cst_23 : f32 to vector<64x128xf32>
      %34 = arith.cmpf oge, %32, %33 : vector<64x128xf32>
      %cst_24 = arith.constant 0.00999999977 : f32
      %35 = vector.broadcast %cst_24 : f32 to vector<64x128xf32>
      %36 = arith.mulf %35, %32 : vector<64x128xf32>
      %37 = arith.select %34, %32, %36 : vector<64x128xi1>, vector<64x128xf32>
      %38 = arith.truncf %37 : vector<64x128xf32> to vector<64x128xbf16>
      %39 = vector.shape_cast %38 : vector<64x128xbf16> to vector<8x8x128xbf16>
      %c0_25 = arith.constant 0 : index
      %c0_26 = arith.constant 0 : index
      %c1 = arith.constant 1 : index
      %c1_27 = arith.constant 1 : index
      %c0_28 = arith.constant 0 : index
      %40 = vector.load %arg8[%c0_25, %c0_26, %c1, %c1_27, %c0_28] : memref<1x1x10x10x128xbf16, #tpu.memory_space<vmem>>, vector<1x1x8x8x128xbf16>
      %41 = vector.shape_cast %40 : vector<1x1x8x8x128xbf16> to vector<8x8x128xbf16>
      %42 = vector.shape_cast %39 : vector<8x8x128xbf16> to vector<1x1x8x8x128xbf16>
      tpu.vector_store %arg8[%c0_25, %c0_26, %c1, %c1_27, %c0_28], %42 {strides = array<i32>} : memref<1x1x10x10x128xbf16, #tpu.memory_space<vmem>>, vector<1x1x8x8x128xbf16>,
    } else {
    }
    return
  }
  func.func @transform_0(%arg0: i32, %arg1: i32) -> (i32, i32, i32, i32, i32) {
    %c1_i32 = arith.constant 1 : i32
    %0 = arith.subi %arg1, %c1_i32 : i32
    %c7_i32 = arith.constant 7 : i32
    %1 = arith.minsi %0, %c7_i32 : i32
    %c0_i32 = arith.constant 0 : i32
    %2 = arith.maxsi %1, %c0_i32 : i32
    %c0_i32_0 = arith.constant 0 : i32
    %c0_i32_1 = arith.constant 0 : i32
    %c0_i32_2 = arith.constant 0 : i32
    %c0_i32_3 = arith.constant 0 : i32
    return %arg0, %2, %c0_i32_0, %c0_i32_1, %c0_i32_2 : i32, i32, i32, i32, i32
  }
  func.func @transform_1(%arg0: i32, %arg1: i32) -> (i32, i32) {
    %c0_i32 = arith.constant 0 : i32
    %c0_i32_0 = arith.constant 0 : i32
    %c0_i32_1 = arith.constant 0 : i32
    return %c0_i32, %c0_i32_0 : i32, i32
  }
  func.func @transform_2(%arg0: i32, %arg1: i32) -> (i32, i32) {
    %c0_i32 = arith.constant 0 : i32
    %c0_i32_0 = arith.constant 0 : i32
    %c0_i32_1 = arith.constant 0 : i32
    return %c0_i32, %c0_i32_0 : i32, i32
  }
  func.func @transform_3(%arg0: i32, %arg1: i32) -> (i32, i32) {
    %c0_i32 = arith.constant 0 : i32
    %c0_i32_0 = arith.constant 0 : i32
    %c0_i32_1 = arith.constant 0 : i32
    return %c0_i32, %c0_i32_0 : i32, i32
  }
  func.func @transform_4(%arg0: i32, %arg1: i32) -> (i32, i32) {
    %c0_i32 = arith.constant 0 : i32
    %c0_i32_0 = arith.constant 0 : i32
    %c0_i32_1 = arith.constant 0 : i32
    return %c0_i32, %c0_i32_0 : i32, i32
  }
  func.func @transform_5(%arg0: i32, %arg1: i32) -> (i32, i32) {
    %c0_i32 = arith.constant 0 : i32
    %c0_i32_0 = arith.constant 0 : i32
    %c0_i32_1 = arith.constant 0 : i32
    return %c0_i32, %c0_i32_0 : i32, i32
  }
  func.func @transform_6(%arg0: i32, %arg1: i32) -> (i32, i32, i32, i32, i32) {
    %c0_i32 = arith.constant 0 : i32
    %c0_i32_0 = arith.constant 0 : i32
    %c0_i32_1 = arith.constant 0 : i32
    %c0_i32_2 = arith.constant 0 : i32
    return %arg0, %arg1, %c0_i32, %c0_i32_0, %c0_i32_1 : i32, i32, i32, i32, i32
  }
}

module attributes {stable_mosaic.version = 11 : i64} {
  func.func @conv_stage_kernel(%arg0: i32, %arg1: i32, %arg2: memref<1x1x10x10x128xbf16, #tpu.memory_space<vmem>>, %arg3: memref<1x1x10x10x128xbf16, #tpu.memory_space<vmem>>, %arg4: memref<1x1x10x10x128xbf16, #tpu.memory_space<vmem>>, %arg5: memref<27x128x128xbf16, #tpu.memory_space<vmem>>, %arg6: memref<1x128xf32, #tpu.memory_space<vmem>>, %arg7: memref<1x128xf32, #tpu.memory_space<vmem>>, %arg8: memref<128x128xbf16, #tpu.memory_space<vmem>>, %arg9: memref<1x1x8x8x128xbf16, #tpu.memory_space<vmem>>, %arg10: memref<1x128xf32, #tpu.memory_space<vmem>>, %arg11: memref<1x128xf32, #tpu.memory_space<vmem>>, %arg12: memref<128x128xbf16, #tpu.memory_space<vmem>>, %arg13: memref<1x1x64x128xbf16, #tpu.memory_space<vmem>>) attributes {dimension_semantics = [#tpu.dimension_semantics<parallel>, #tpu.dimension_semantics<parallel>], iteration_bounds = array<i64: 2, 8>, scalar_prefetch = 0 : i64, scratch_operands = 0 : i64, tpu.core_type = #tpu.core_type<tc>, window_params = [{transform_indices = @transform_0, window_bounds = array<i64: 1, 1, 10, 10, 128>}, {transform_indices = @transform_1, window_bounds = array<i64: 1, 1, 10, 10, 128>}, {transform_indices = @transform_2, window_bounds = array<i64: 1, 1, 10, 10, 128>}, {pipeline_mode = #tpu.pipeline_mode<synchronous>, transform_indices = @transform_3, window_bounds = array<i64: 27, 128, 128>}, {pipeline_mode = #tpu.pipeline_mode<synchronous>, transform_indices = @transform_4, window_bounds = array<i64: 1, 128>}, {pipeline_mode = #tpu.pipeline_mode<synchronous>, transform_indices = @transform_5, window_bounds = array<i64: 1, 128>}, {pipeline_mode = #tpu.pipeline_mode<synchronous>, transform_indices = @transform_6, window_bounds = array<i64: 128, 128>}, {transform_indices = @transform_7, window_bounds = array<i64: 1, 1, 8, 8, 128>}, {pipeline_mode = #tpu.pipeline_mode<synchronous>, transform_indices = @transform_8, window_bounds = array<i64: 1, 128>}, {pipeline_mode = #tpu.pipeline_mode<synchronous>, transform_indices = @transform_9, window_bounds = array<i64: 1, 128>}, {pipeline_mode = #tpu.pipeline_mode<synchronous>, transform_indices = @transform_10, window_bounds = array<i64: 128, 128>}, {transform_indices = @transform_11, window_bounds = array<i64: 1, 1, 64, 128>}]} {
    %c0 = arith.constant 0 : index
    %c0_0 = arith.constant 0 : index
    %c0_1 = arith.constant 0 : index
    %c0_2 = arith.constant 0 : index
    %c0_3 = arith.constant 0 : index
    %0 = vector.load %arg2[%c0, %c0_0, %c0_1, %c0_2, %c0_3] : memref<1x1x10x10x128xbf16, #tpu.memory_space<vmem>>, vector<1x1x8x8x128xbf16>
    %1 = vector.shape_cast %0 : vector<1x1x8x8x128xbf16> to vector<8x8x128xbf16>
    %2 = vector.shape_cast %1 : vector<8x8x128xbf16> to vector<64x128xbf16>
    %c0_4 = arith.constant 0 : index
    %c0_5 = arith.constant 0 : index
    %c0_6 = arith.constant 0 : index
    %3 = vector.load %arg5[%c0_4, %c0_5, %c0_6] : memref<27x128x128xbf16, #tpu.memory_space<vmem>>, vector<1x128x128xbf16>
    %4 = vector.shape_cast %3 : vector<1x128x128xbf16> to vector<128x128xbf16>
    %cst = arith.constant dense<0.000000e+00> : vector<64x128xf32>
    %5 = tpu.matmul %2, %4, %cst {dimension_numbers = #tpu.dot_dimension_numbers<[1], [0], [0], [1], [0, 0, 1, 1], [], []>} : vector<64x128xbf16>, vector<128x128xbf16>, vector<64x128xf32> -> vector<64x128xf32>
    %c0_7 = arith.constant 0 : index
    %c0_8 = arith.constant 0 : index
    %c0_9 = arith.constant 0 : index
    %c1 = arith.constant 1 : index
    %c0_10 = arith.constant 0 : index
    %6 = vector.load %arg2[%c0_7, %c0_8, %c0_9, %c1, %c0_10] : memref<1x1x10x10x128xbf16, #tpu.memory_space<vmem>>, vector<1x1x8x8x128xbf16>
    %7 = vector.shape_cast %6 : vector<1x1x8x8x128xbf16> to vector<8x8x128xbf16>
    %8 = vector.shape_cast %7 : vector<8x8x128xbf16> to vector<64x128xbf16>
    %c1_11 = arith.constant 1 : index
    %c0_12 = arith.constant 0 : index
    %c0_13 = arith.constant 0 : index
    %9 = vector.load %arg5[%c1_11, %c0_12, %c0_13] : memref<27x128x128xbf16, #tpu.memory_space<vmem>>, vector<1x128x128xbf16>
    %10 = vector.shape_cast %9 : vector<1x128x128xbf16> to vector<128x128xbf16>
    %cst_14 = arith.constant dense<0.000000e+00> : vector<64x128xf32>
    %11 = tpu.matmul %8, %10, %cst_14 {dimension_numbers = #tpu.dot_dimension_numbers<[1], [0], [0], [1], [0, 0, 1, 1], [], []>} : vector<64x128xbf16>, vector<128x128xbf16>, vector<64x128xf32> -> vector<64x128xf32>
    %12 = arith.addf %5, %11 : vector<64x128xf32>
    %c0_15 = arith.constant 0 : index
    %c0_16 = arith.constant 0 : index
    %c0_17 = arith.constant 0 : index
    %c2 = arith.constant 2 : index
    %c0_18 = arith.constant 0 : index
    %13 = vector.load %arg2[%c0_15, %c0_16, %c0_17, %c2, %c0_18] : memref<1x1x10x10x128xbf16, #tpu.memory_space<vmem>>, vector<1x1x8x8x128xbf16>
    %14 = vector.shape_cast %13 : vector<1x1x8x8x128xbf16> to vector<8x8x128xbf16>
    %15 = vector.shape_cast %14 : vector<8x8x128xbf16> to vector<64x128xbf16>
    %c2_19 = arith.constant 2 : index
    %c0_20 = arith.constant 0 : index
    %c0_21 = arith.constant 0 : index
    %16 = vector.load %arg5[%c2_19, %c0_20, %c0_21] : memref<27x128x128xbf16, #tpu.memory_space<vmem>>, vector<1x128x128xbf16>
    %17 = vector.shape_cast %16 : vector<1x128x128xbf16> to vector<128x128xbf16>
    %cst_22 = arith.constant dense<0.000000e+00> : vector<64x128xf32>
    %18 = tpu.matmul %15, %17, %cst_22 {dimension_numbers = #tpu.dot_dimension_numbers<[1], [0], [0], [1], [0, 0, 1, 1], [], []>} : vector<64x128xbf16>, vector<128x128xbf16>, vector<64x128xf32> -> vector<64x128xf32>
    %19 = arith.addf %12, %18 : vector<64x128xf32>
    %c0_23 = arith.constant 0 : index
    %c0_24 = arith.constant 0 : index
    %c1_25 = arith.constant 1 : index
    %c0_26 = arith.constant 0 : index
    %c0_27 = arith.constant 0 : index
    %20 = vector.load %arg2[%c0_23, %c0_24, %c1_25, %c0_26, %c0_27] : memref<1x1x10x10x128xbf16, #tpu.memory_space<vmem>>, vector<1x1x8x8x128xbf16>
    %21 = vector.shape_cast %20 : vector<1x1x8x8x128xbf16> to vector<8x8x128xbf16>
    %22 = vector.shape_cast %21 : vector<8x8x128xbf16> to vector<64x128xbf16>
    %c3 = arith.constant 3 : index
    %c0_28 = arith.constant 0 : index
    %c0_29 = arith.constant 0 : index
    %23 = vector.load %arg5[%c3, %c0_28, %c0_29] : memref<27x128x128xbf16, #tpu.memory_space<vmem>>, vector<1x128x128xbf16>
    %24 = vector.shape_cast %23 : vector<1x128x128xbf16> to vector<128x128xbf16>
    %cst_30 = arith.constant dense<0.000000e+00> : vector<64x128xf32>
    %25 = tpu.matmul %22, %24, %cst_30 {dimension_numbers = #tpu.dot_dimension_numbers<[1], [0], [0], [1], [0, 0, 1, 1], [], []>} : vector<64x128xbf16>, vector<128x128xbf16>, vector<64x128xf32> -> vector<64x128xf32>
    %26 = arith.addf %19, %25 : vector<64x128xf32>
    %c0_31 = arith.constant 0 : index
    %c0_32 = arith.constant 0 : index
    %c1_33 = arith.constant 1 : index
    %c1_34 = arith.constant 1 : index
    %c0_35 = arith.constant 0 : index
    %27 = vector.load %arg2[%c0_31, %c0_32, %c1_33, %c1_34, %c0_35] : memref<1x1x10x10x128xbf16, #tpu.memory_space<vmem>>, vector<1x1x8x8x128xbf16>
    %28 = vector.shape_cast %27 : vector<1x1x8x8x128xbf16> to vector<8x8x128xbf16>
    %29 = vector.shape_cast %28 : vector<8x8x128xbf16> to vector<64x128xbf16>
    %c4 = arith.constant 4 : index
    %c0_36 = arith.constant 0 : index
    %c0_37 = arith.constant 0 : index
    %30 = vector.load %arg5[%c4, %c0_36, %c0_37] : memref<27x128x128xbf16, #tpu.memory_space<vmem>>, vector<1x128x128xbf16>
    %31 = vector.shape_cast %30 : vector<1x128x128xbf16> to vector<128x128xbf16>
    %cst_38 = arith.constant dense<0.000000e+00> : vector<64x128xf32>
    %32 = tpu.matmul %29, %31, %cst_38 {dimension_numbers = #tpu.dot_dimension_numbers<[1], [0], [0], [1], [0, 0, 1, 1], [], []>} : vector<64x128xbf16>, vector<128x128xbf16>, vector<64x128xf32> -> vector<64x128xf32>
    %33 = arith.addf %26, %32 : vector<64x128xf32>
    %c0_39 = arith.constant 0 : index
    %c0_40 = arith.constant 0 : index
    %c1_41 = arith.constant 1 : index
    %c2_42 = arith.constant 2 : index
    %c0_43 = arith.constant 0 : index
    %34 = vector.load %arg2[%c0_39, %c0_40, %c1_41, %c2_42, %c0_43] : memref<1x1x10x10x128xbf16, #tpu.memory_space<vmem>>, vector<1x1x8x8x128xbf16>
    %35 = vector.shape_cast %34 : vector<1x1x8x8x128xbf16> to vector<8x8x128xbf16>
    %36 = vector.shape_cast %35 : vector<8x8x128xbf16> to vector<64x128xbf16>
    %c5 = arith.constant 5 : index
    %c0_44 = arith.constant 0 : index
    %c0_45 = arith.constant 0 : index
    %37 = vector.load %arg5[%c5, %c0_44, %c0_45] : memref<27x128x128xbf16, #tpu.memory_space<vmem>>, vector<1x128x128xbf16>
    %38 = vector.shape_cast %37 : vector<1x128x128xbf16> to vector<128x128xbf16>
    %cst_46 = arith.constant dense<0.000000e+00> : vector<64x128xf32>
    %39 = tpu.matmul %36, %38, %cst_46 {dimension_numbers = #tpu.dot_dimension_numbers<[1], [0], [0], [1], [0, 0, 1, 1], [], []>} : vector<64x128xbf16>, vector<128x128xbf16>, vector<64x128xf32> -> vector<64x128xf32>
    %40 = arith.addf %33, %39 : vector<64x128xf32>
    %c0_47 = arith.constant 0 : index
    %c0_48 = arith.constant 0 : index
    %c2_49 = arith.constant 2 : index
    %c0_50 = arith.constant 0 : index
    %c0_51 = arith.constant 0 : index
    %41 = vector.load %arg2[%c0_47, %c0_48, %c2_49, %c0_50, %c0_51] : memref<1x1x10x10x128xbf16, #tpu.memory_space<vmem>>, vector<1x1x8x8x128xbf16>
    %42 = vector.shape_cast %41 : vector<1x1x8x8x128xbf16> to vector<8x8x128xbf16>
    %43 = vector.shape_cast %42 : vector<8x8x128xbf16> to vector<64x128xbf16>
    %c6 = arith.constant 6 : index
    %c0_52 = arith.constant 0 : index
    %c0_53 = arith.constant 0 : index
    %44 = vector.load %arg5[%c6, %c0_52, %c0_53] : memref<27x128x128xbf16, #tpu.memory_space<vmem>>, vector<1x128x128xbf16>
    %45 = vector.shape_cast %44 : vector<1x128x128xbf16> to vector<128x128xbf16>
    %cst_54 = arith.constant dense<0.000000e+00> : vector<64x128xf32>
    %46 = tpu.matmul %43, %45, %cst_54 {dimension_numbers = #tpu.dot_dimension_numbers<[1], [0], [0], [1], [0, 0, 1, 1], [], []>} : vector<64x128xbf16>, vector<128x128xbf16>, vector<64x128xf32> -> vector<64x128xf32>
    %47 = arith.addf %40, %46 : vector<64x128xf32>
    %c0_55 = arith.constant 0 : index
    %c0_56 = arith.constant 0 : index
    %c2_57 = arith.constant 2 : index
    %c1_58 = arith.constant 1 : index
    %c0_59 = arith.constant 0 : index
    %48 = vector.load %arg2[%c0_55, %c0_56, %c2_57, %c1_58, %c0_59] : memref<1x1x10x10x128xbf16, #tpu.memory_space<vmem>>, vector<1x1x8x8x128xbf16>
    %49 = vector.shape_cast %48 : vector<1x1x8x8x128xbf16> to vector<8x8x128xbf16>
    %50 = vector.shape_cast %49 : vector<8x8x128xbf16> to vector<64x128xbf16>
    %c7 = arith.constant 7 : index
    %c0_60 = arith.constant 0 : index
    %c0_61 = arith.constant 0 : index
    %51 = vector.load %arg5[%c7, %c0_60, %c0_61] : memref<27x128x128xbf16, #tpu.memory_space<vmem>>, vector<1x128x128xbf16>
    %52 = vector.shape_cast %51 : vector<1x128x128xbf16> to vector<128x128xbf16>
    %cst_62 = arith.constant dense<0.000000e+00> : vector<64x128xf32>
    %53 = tpu.matmul %50, %52, %cst_62 {dimension_numbers = #tpu.dot_dimension_numbers<[1], [0], [0], [1], [0, 0, 1, 1], [], []>} : vector<64x128xbf16>, vector<128x128xbf16>, vector<64x128xf32> -> vector<64x128xf32>
    %54 = arith.addf %47, %53 : vector<64x128xf32>
    %c0_63 = arith.constant 0 : index
    %c0_64 = arith.constant 0 : index
    %c2_65 = arith.constant 2 : index
    %c2_66 = arith.constant 2 : index
    %c0_67 = arith.constant 0 : index
    %55 = vector.load %arg2[%c0_63, %c0_64, %c2_65, %c2_66, %c0_67] : memref<1x1x10x10x128xbf16, #tpu.memory_space<vmem>>, vector<1x1x8x8x128xbf16>
    %56 = vector.shape_cast %55 : vector<1x1x8x8x128xbf16> to vector<8x8x128xbf16>
    %57 = vector.shape_cast %56 : vector<8x8x128xbf16> to vector<64x128xbf16>
    %c8 = arith.constant 8 : index
    %c0_68 = arith.constant 0 : index
    %c0_69 = arith.constant 0 : index
    %58 = vector.load %arg5[%c8, %c0_68, %c0_69] : memref<27x128x128xbf16, #tpu.memory_space<vmem>>, vector<1x128x128xbf16>
    %59 = vector.shape_cast %58 : vector<1x128x128xbf16> to vector<128x128xbf16>
    %cst_70 = arith.constant dense<0.000000e+00> : vector<64x128xf32>
    %60 = tpu.matmul %57, %59, %cst_70 {dimension_numbers = #tpu.dot_dimension_numbers<[1], [0], [0], [1], [0, 0, 1, 1], [], []>} : vector<64x128xbf16>, vector<128x128xbf16>, vector<64x128xf32> -> vector<64x128xf32>
    %61 = arith.addf %54, %60 : vector<64x128xf32>
    %c0_71 = arith.constant 0 : index
    %c0_72 = arith.constant 0 : index
    %c0_73 = arith.constant 0 : index
    %c0_74 = arith.constant 0 : index
    %c0_75 = arith.constant 0 : index
    %62 = vector.load %arg3[%c0_71, %c0_72, %c0_73, %c0_74, %c0_75] : memref<1x1x10x10x128xbf16, #tpu.memory_space<vmem>>, vector<1x1x8x8x128xbf16>
    %63 = vector.shape_cast %62 : vector<1x1x8x8x128xbf16> to vector<8x8x128xbf16>
    %64 = vector.shape_cast %63 : vector<8x8x128xbf16> to vector<64x128xbf16>
    %c9 = arith.constant 9 : index
    %c0_76 = arith.constant 0 : index
    %c0_77 = arith.constant 0 : index
    %65 = vector.load %arg5[%c9, %c0_76, %c0_77] : memref<27x128x128xbf16, #tpu.memory_space<vmem>>, vector<1x128x128xbf16>
    %66 = vector.shape_cast %65 : vector<1x128x128xbf16> to vector<128x128xbf16>
    %cst_78 = arith.constant dense<0.000000e+00> : vector<64x128xf32>
    %67 = tpu.matmul %64, %66, %cst_78 {dimension_numbers = #tpu.dot_dimension_numbers<[1], [0], [0], [1], [0, 0, 1, 1], [], []>} : vector<64x128xbf16>, vector<128x128xbf16>, vector<64x128xf32> -> vector<64x128xf32>
    %68 = arith.addf %61, %67 : vector<64x128xf32>
    %c0_79 = arith.constant 0 : index
    %c0_80 = arith.constant 0 : index
    %c0_81 = arith.constant 0 : index
    %c1_82 = arith.constant 1 : index
    %c0_83 = arith.constant 0 : index
    %69 = vector.load %arg3[%c0_79, %c0_80, %c0_81, %c1_82, %c0_83] : memref<1x1x10x10x128xbf16, #tpu.memory_space<vmem>>, vector<1x1x8x8x128xbf16>
    %70 = vector.shape_cast %69 : vector<1x1x8x8x128xbf16> to vector<8x8x128xbf16>
    %71 = vector.shape_cast %70 : vector<8x8x128xbf16> to vector<64x128xbf16>
    %c10 = arith.constant 10 : index
    %c0_84 = arith.constant 0 : index
    %c0_85 = arith.constant 0 : index
    %72 = vector.load %arg5[%c10, %c0_84, %c0_85] : memref<27x128x128xbf16, #tpu.memory_space<vmem>>, vector<1x128x128xbf16>
    %73 = vector.shape_cast %72 : vector<1x128x128xbf16> to vector<128x128xbf16>
    %cst_86 = arith.constant dense<0.000000e+00> : vector<64x128xf32>
    %74 = tpu.matmul %71, %73, %cst_86 {dimension_numbers = #tpu.dot_dimension_numbers<[1], [0], [0], [1], [0, 0, 1, 1], [], []>} : vector<64x128xbf16>, vector<128x128xbf16>, vector<64x128xf32> -> vector<64x128xf32>
    %75 = arith.addf %68, %74 : vector<64x128xf32>
    %c0_87 = arith.constant 0 : index
    %c0_88 = arith.constant 0 : index
    %c0_89 = arith.constant 0 : index
    %c2_90 = arith.constant 2 : index
    %c0_91 = arith.constant 0 : index
    %76 = vector.load %arg3[%c0_87, %c0_88, %c0_89, %c2_90, %c0_91] : memref<1x1x10x10x128xbf16, #tpu.memory_space<vmem>>, vector<1x1x8x8x128xbf16>
    %77 = vector.shape_cast %76 : vector<1x1x8x8x128xbf16> to vector<8x8x128xbf16>
    %78 = vector.shape_cast %77 : vector<8x8x128xbf16> to vector<64x128xbf16>
    %c11 = arith.constant 11 : index
    %c0_92 = arith.constant 0 : index
    %c0_93 = arith.constant 0 : index
    %79 = vector.load %arg5[%c11, %c0_92, %c0_93] : memref<27x128x128xbf16, #tpu.memory_space<vmem>>, vector<1x128x128xbf16>
    %80 = vector.shape_cast %79 : vector<1x128x128xbf16> to vector<128x128xbf16>
    %cst_94 = arith.constant dense<0.000000e+00> : vector<64x128xf32>
    %81 = tpu.matmul %78, %80, %cst_94 {dimension_numbers = #tpu.dot_dimension_numbers<[1], [0], [0], [1], [0, 0, 1, 1], [], []>} : vector<64x128xbf16>, vector<128x128xbf16>, vector<64x128xf32> -> vector<64x128xf32>
    %82 = arith.addf %75, %81 : vector<64x128xf32>
    %c0_95 = arith.constant 0 : index
    %c0_96 = arith.constant 0 : index
    %c1_97 = arith.constant 1 : index
    %c0_98 = arith.constant 0 : index
    %c0_99 = arith.constant 0 : index
    %83 = vector.load %arg3[%c0_95, %c0_96, %c1_97, %c0_98, %c0_99] : memref<1x1x10x10x128xbf16, #tpu.memory_space<vmem>>, vector<1x1x8x8x128xbf16>
    %84 = vector.shape_cast %83 : vector<1x1x8x8x128xbf16> to vector<8x8x128xbf16>
    %85 = vector.shape_cast %84 : vector<8x8x128xbf16> to vector<64x128xbf16>
    %c12 = arith.constant 12 : index
    %c0_100 = arith.constant 0 : index
    %c0_101 = arith.constant 0 : index
    %86 = vector.load %arg5[%c12, %c0_100, %c0_101] : memref<27x128x128xbf16, #tpu.memory_space<vmem>>, vector<1x128x128xbf16>
    %87 = vector.shape_cast %86 : vector<1x128x128xbf16> to vector<128x128xbf16>
    %cst_102 = arith.constant dense<0.000000e+00> : vector<64x128xf32>
    %88 = tpu.matmul %85, %87, %cst_102 {dimension_numbers = #tpu.dot_dimension_numbers<[1], [0], [0], [1], [0, 0, 1, 1], [], []>} : vector<64x128xbf16>, vector<128x128xbf16>, vector<64x128xf32> -> vector<64x128xf32>
    %89 = arith.addf %82, %88 : vector<64x128xf32>
    %c0_103 = arith.constant 0 : index
    %c0_104 = arith.constant 0 : index
    %c1_105 = arith.constant 1 : index
    %c1_106 = arith.constant 1 : index
    %c0_107 = arith.constant 0 : index
    %90 = vector.load %arg3[%c0_103, %c0_104, %c1_105, %c1_106, %c0_107] : memref<1x1x10x10x128xbf16, #tpu.memory_space<vmem>>, vector<1x1x8x8x128xbf16>
    %91 = vector.shape_cast %90 : vector<1x1x8x8x128xbf16> to vector<8x8x128xbf16>
    %92 = vector.shape_cast %91 : vector<8x8x128xbf16> to vector<64x128xbf16>
    %c13 = arith.constant 13 : index
    %c0_108 = arith.constant 0 : index
    %c0_109 = arith.constant 0 : index
    %93 = vector.load %arg5[%c13, %c0_108, %c0_109] : memref<27x128x128xbf16, #tpu.memory_space<vmem>>, vector<1x128x128xbf16>
    %94 = vector.shape_cast %93 : vector<1x128x128xbf16> to vector<128x128xbf16>
    %cst_110 = arith.constant dense<0.000000e+00> : vector<64x128xf32>
    %95 = tpu.matmul %92, %94, %cst_110 {dimension_numbers = #tpu.dot_dimension_numbers<[1], [0], [0], [1], [0, 0, 1, 1], [], []>} : vector<64x128xbf16>, vector<128x128xbf16>, vector<64x128xf32> -> vector<64x128xf32>
    %96 = arith.addf %89, %95 : vector<64x128xf32>
    %c0_111 = arith.constant 0 : index
    %c0_112 = arith.constant 0 : index
    %c1_113 = arith.constant 1 : index
    %c2_114 = arith.constant 2 : index
    %c0_115 = arith.constant 0 : index
    %97 = vector.load %arg3[%c0_111, %c0_112, %c1_113, %c2_114, %c0_115] : memref<1x1x10x10x128xbf16, #tpu.memory_space<vmem>>, vector<1x1x8x8x128xbf16>
    %98 = vector.shape_cast %97 : vector<1x1x8x8x128xbf16> to vector<8x8x128xbf16>
    %99 = vector.shape_cast %98 : vector<8x8x128xbf16> to vector<64x128xbf16>
    %c14 = arith.constant 14 : index
    %c0_116 = arith.constant 0 : index
    %c0_117 = arith.constant 0 : index
    %100 = vector.load %arg5[%c14, %c0_116, %c0_117] : memref<27x128x128xbf16, #tpu.memory_space<vmem>>, vector<1x128x128xbf16>
    %101 = vector.shape_cast %100 : vector<1x128x128xbf16> to vector<128x128xbf16>
    %cst_118 = arith.constant dense<0.000000e+00> : vector<64x128xf32>
    %102 = tpu.matmul %99, %101, %cst_118 {dimension_numbers = #tpu.dot_dimension_numbers<[1], [0], [0], [1], [0, 0, 1, 1], [], []>} : vector<64x128xbf16>, vector<128x128xbf16>, vector<64x128xf32> -> vector<64x128xf32>
    %103 = arith.addf %96, %102 : vector<64x128xf32>
    %c0_119 = arith.constant 0 : index
    %c0_120 = arith.constant 0 : index
    %c2_121 = arith.constant 2 : index
    %c0_122 = arith.constant 0 : index
    %c0_123 = arith.constant 0 : index
    %104 = vector.load %arg3[%c0_119, %c0_120, %c2_121, %c0_122, %c0_123] : memref<1x1x10x10x128xbf16, #tpu.memory_space<vmem>>, vector<1x1x8x8x128xbf16>
    %105 = vector.shape_cast %104 : vector<1x1x8x8x128xbf16> to vector<8x8x128xbf16>
    %106 = vector.shape_cast %105 : vector<8x8x128xbf16> to vector<64x128xbf16>
    %c15 = arith.constant 15 : index
    %c0_124 = arith.constant 0 : index
    %c0_125 = arith.constant 0 : index
    %107 = vector.load %arg5[%c15, %c0_124, %c0_125] : memref<27x128x128xbf16, #tpu.memory_space<vmem>>, vector<1x128x128xbf16>
    %108 = vector.shape_cast %107 : vector<1x128x128xbf16> to vector<128x128xbf16>
    %cst_126 = arith.constant dense<0.000000e+00> : vector<64x128xf32>
    %109 = tpu.matmul %106, %108, %cst_126 {dimension_numbers = #tpu.dot_dimension_numbers<[1], [0], [0], [1], [0, 0, 1, 1], [], []>} : vector<64x128xbf16>, vector<128x128xbf16>, vector<64x128xf32> -> vector<64x128xf32>
    %110 = arith.addf %103, %109 : vector<64x128xf32>
    %c0_127 = arith.constant 0 : index
    %c0_128 = arith.constant 0 : index
    %c2_129 = arith.constant 2 : index
    %c1_130 = arith.constant 1 : index
    %c0_131 = arith.constant 0 : index
    %111 = vector.load %arg3[%c0_127, %c0_128, %c2_129, %c1_130, %c0_131] : memref<1x1x10x10x128xbf16, #tpu.memory_space<vmem>>, vector<1x1x8x8x128xbf16>
    %112 = vector.shape_cast %111 : vector<1x1x8x8x128xbf16> to vector<8x8x128xbf16>
    %113 = vector.shape_cast %112 : vector<8x8x128xbf16> to vector<64x128xbf16>
    %c16 = arith.constant 16 : index
    %c0_132 = arith.constant 0 : index
    %c0_133 = arith.constant 0 : index
    %114 = vector.load %arg5[%c16, %c0_132, %c0_133] : memref<27x128x128xbf16, #tpu.memory_space<vmem>>, vector<1x128x128xbf16>
    %115 = vector.shape_cast %114 : vector<1x128x128xbf16> to vector<128x128xbf16>
    %cst_134 = arith.constant dense<0.000000e+00> : vector<64x128xf32>
    %116 = tpu.matmul %113, %115, %cst_134 {dimension_numbers = #tpu.dot_dimension_numbers<[1], [0], [0], [1], [0, 0, 1, 1], [], []>} : vector<64x128xbf16>, vector<128x128xbf16>, vector<64x128xf32> -> vector<64x128xf32>
    %117 = arith.addf %110, %116 : vector<64x128xf32>
    %c0_135 = arith.constant 0 : index
    %c0_136 = arith.constant 0 : index
    %c2_137 = arith.constant 2 : index
    %c2_138 = arith.constant 2 : index
    %c0_139 = arith.constant 0 : index
    %118 = vector.load %arg3[%c0_135, %c0_136, %c2_137, %c2_138, %c0_139] : memref<1x1x10x10x128xbf16, #tpu.memory_space<vmem>>, vector<1x1x8x8x128xbf16>
    %119 = vector.shape_cast %118 : vector<1x1x8x8x128xbf16> to vector<8x8x128xbf16>
    %120 = vector.shape_cast %119 : vector<8x8x128xbf16> to vector<64x128xbf16>
    %c17 = arith.constant 17 : index
    %c0_140 = arith.constant 0 : index
    %c0_141 = arith.constant 0 : index
    %121 = vector.load %arg5[%c17, %c0_140, %c0_141] : memref<27x128x128xbf16, #tpu.memory_space<vmem>>, vector<1x128x128xbf16>
    %122 = vector.shape_cast %121 : vector<1x128x128xbf16> to vector<128x128xbf16>
    %cst_142 = arith.constant dense<0.000000e+00> : vector<64x128xf32>
    %123 = tpu.matmul %120, %122, %cst_142 {dimension_numbers = #tpu.dot_dimension_numbers<[1], [0], [0], [1], [0, 0, 1, 1], [], []>} : vector<64x128xbf16>, vector<128x128xbf16>, vector<64x128xf32> -> vector<64x128xf32>
    %124 = arith.addf %117, %123 : vector<64x128xf32>
    %c0_143 = arith.constant 0 : index
    %c0_144 = arith.constant 0 : index
    %c0_145 = arith.constant 0 : index
    %c0_146 = arith.constant 0 : index
    %c0_147 = arith.constant 0 : index
    %125 = vector.load %arg4[%c0_143, %c0_144, %c0_145, %c0_146, %c0_147] : memref<1x1x10x10x128xbf16, #tpu.memory_space<vmem>>, vector<1x1x8x8x128xbf16>
    %126 = vector.shape_cast %125 : vector<1x1x8x8x128xbf16> to vector<8x8x128xbf16>
    %127 = vector.shape_cast %126 : vector<8x8x128xbf16> to vector<64x128xbf16>
    %c18 = arith.constant 18 : index
    %c0_148 = arith.constant 0 : index
    %c0_149 = arith.constant 0 : index
    %128 = vector.load %arg5[%c18, %c0_148, %c0_149] : memref<27x128x128xbf16, #tpu.memory_space<vmem>>, vector<1x128x128xbf16>
    %129 = vector.shape_cast %128 : vector<1x128x128xbf16> to vector<128x128xbf16>
    %cst_150 = arith.constant dense<0.000000e+00> : vector<64x128xf32>
    %130 = tpu.matmul %127, %129, %cst_150 {dimension_numbers = #tpu.dot_dimension_numbers<[1], [0], [0], [1], [0, 0, 1, 1], [], []>} : vector<64x128xbf16>, vector<128x128xbf16>, vector<64x128xf32> -> vector<64x128xf32>
    %131 = arith.addf %124, %130 : vector<64x128xf32>
    %c0_151 = arith.constant 0 : index
    %c0_152 = arith.constant 0 : index
    %c0_153 = arith.constant 0 : index
    %c1_154 = arith.constant 1 : index
    %c0_155 = arith.constant 0 : index
    %132 = vector.load %arg4[%c0_151, %c0_152, %c0_153, %c1_154, %c0_155] : memref<1x1x10x10x128xbf16, #tpu.memory_space<vmem>>, vector<1x1x8x8x128xbf16>
    %133 = vector.shape_cast %132 : vector<1x1x8x8x128xbf16> to vector<8x8x128xbf16>
    %134 = vector.shape_cast %133 : vector<8x8x128xbf16> to vector<64x128xbf16>
    %c19 = arith.constant 19 : index
    %c0_156 = arith.constant 0 : index
    %c0_157 = arith.constant 0 : index
    %135 = vector.load %arg5[%c19, %c0_156, %c0_157] : memref<27x128x128xbf16, #tpu.memory_space<vmem>>, vector<1x128x128xbf16>
    %136 = vector.shape_cast %135 : vector<1x128x128xbf16> to vector<128x128xbf16>
    %cst_158 = arith.constant dense<0.000000e+00> : vector<64x128xf32>
    %137 = tpu.matmul %134, %136, %cst_158 {dimension_numbers = #tpu.dot_dimension_numbers<[1], [0], [0], [1], [0, 0, 1, 1], [], []>} : vector<64x128xbf16>, vector<128x128xbf16>, vector<64x128xf32> -> vector<64x128xf32>
    %138 = arith.addf %131, %137 : vector<64x128xf32>
    %c0_159 = arith.constant 0 : index
    %c0_160 = arith.constant 0 : index
    %c0_161 = arith.constant 0 : index
    %c2_162 = arith.constant 2 : index
    %c0_163 = arith.constant 0 : index
    %139 = vector.load %arg4[%c0_159, %c0_160, %c0_161, %c2_162, %c0_163] : memref<1x1x10x10x128xbf16, #tpu.memory_space<vmem>>, vector<1x1x8x8x128xbf16>
    %140 = vector.shape_cast %139 : vector<1x1x8x8x128xbf16> to vector<8x8x128xbf16>
    %141 = vector.shape_cast %140 : vector<8x8x128xbf16> to vector<64x128xbf16>
    %c20 = arith.constant 20 : index
    %c0_164 = arith.constant 0 : index
    %c0_165 = arith.constant 0 : index
    %142 = vector.load %arg5[%c20, %c0_164, %c0_165] : memref<27x128x128xbf16, #tpu.memory_space<vmem>>, vector<1x128x128xbf16>
    %143 = vector.shape_cast %142 : vector<1x128x128xbf16> to vector<128x128xbf16>
    %cst_166 = arith.constant dense<0.000000e+00> : vector<64x128xf32>
    %144 = tpu.matmul %141, %143, %cst_166 {dimension_numbers = #tpu.dot_dimension_numbers<[1], [0], [0], [1], [0, 0, 1, 1], [], []>} : vector<64x128xbf16>, vector<128x128xbf16>, vector<64x128xf32> -> vector<64x128xf32>
    %145 = arith.addf %138, %144 : vector<64x128xf32>
    %c0_167 = arith.constant 0 : index
    %c0_168 = arith.constant 0 : index
    %c1_169 = arith.constant 1 : index
    %c0_170 = arith.constant 0 : index
    %c0_171 = arith.constant 0 : index
    %146 = vector.load %arg4[%c0_167, %c0_168, %c1_169, %c0_170, %c0_171] : memref<1x1x10x10x128xbf16, #tpu.memory_space<vmem>>, vector<1x1x8x8x128xbf16>
    %147 = vector.shape_cast %146 : vector<1x1x8x8x128xbf16> to vector<8x8x128xbf16>
    %148 = vector.shape_cast %147 : vector<8x8x128xbf16> to vector<64x128xbf16>
    %c21 = arith.constant 21 : index
    %c0_172 = arith.constant 0 : index
    %c0_173 = arith.constant 0 : index
    %149 = vector.load %arg5[%c21, %c0_172, %c0_173] : memref<27x128x128xbf16, #tpu.memory_space<vmem>>, vector<1x128x128xbf16>
    %150 = vector.shape_cast %149 : vector<1x128x128xbf16> to vector<128x128xbf16>
    %cst_174 = arith.constant dense<0.000000e+00> : vector<64x128xf32>
    %151 = tpu.matmul %148, %150, %cst_174 {dimension_numbers = #tpu.dot_dimension_numbers<[1], [0], [0], [1], [0, 0, 1, 1], [], []>} : vector<64x128xbf16>, vector<128x128xbf16>, vector<64x128xf32> -> vector<64x128xf32>
    %152 = arith.addf %145, %151 : vector<64x128xf32>
    %c0_175 = arith.constant 0 : index
    %c0_176 = arith.constant 0 : index
    %c1_177 = arith.constant 1 : index
    %c1_178 = arith.constant 1 : index
    %c0_179 = arith.constant 0 : index
    %153 = vector.load %arg4[%c0_175, %c0_176, %c1_177, %c1_178, %c0_179] : memref<1x1x10x10x128xbf16, #tpu.memory_space<vmem>>, vector<1x1x8x8x128xbf16>
    %154 = vector.shape_cast %153 : vector<1x1x8x8x128xbf16> to vector<8x8x128xbf16>
    %155 = vector.shape_cast %154 : vector<8x8x128xbf16> to vector<64x128xbf16>
    %c22 = arith.constant 22 : index
    %c0_180 = arith.constant 0 : index
    %c0_181 = arith.constant 0 : index
    %156 = vector.load %arg5[%c22, %c0_180, %c0_181] : memref<27x128x128xbf16, #tpu.memory_space<vmem>>, vector<1x128x128xbf16>
    %157 = vector.shape_cast %156 : vector<1x128x128xbf16> to vector<128x128xbf16>
    %cst_182 = arith.constant dense<0.000000e+00> : vector<64x128xf32>
    %158 = tpu.matmul %155, %157, %cst_182 {dimension_numbers = #tpu.dot_dimension_numbers<[1], [0], [0], [1], [0, 0, 1, 1], [], []>} : vector<64x128xbf16>, vector<128x128xbf16>, vector<64x128xf32> -> vector<64x128xf32>
    %159 = arith.addf %152, %158 : vector<64x128xf32>
    %c0_183 = arith.constant 0 : index
    %c0_184 = arith.constant 0 : index
    %c1_185 = arith.constant 1 : index
    %c2_186 = arith.constant 2 : index
    %c0_187 = arith.constant 0 : index
    %160 = vector.load %arg4[%c0_183, %c0_184, %c1_185, %c2_186, %c0_187] : memref<1x1x10x10x128xbf16, #tpu.memory_space<vmem>>, vector<1x1x8x8x128xbf16>
    %161 = vector.shape_cast %160 : vector<1x1x8x8x128xbf16> to vector<8x8x128xbf16>
    %162 = vector.shape_cast %161 : vector<8x8x128xbf16> to vector<64x128xbf16>
    %c23 = arith.constant 23 : index
    %c0_188 = arith.constant 0 : index
    %c0_189 = arith.constant 0 : index
    %163 = vector.load %arg5[%c23, %c0_188, %c0_189] : memref<27x128x128xbf16, #tpu.memory_space<vmem>>, vector<1x128x128xbf16>
    %164 = vector.shape_cast %163 : vector<1x128x128xbf16> to vector<128x128xbf16>
    %cst_190 = arith.constant dense<0.000000e+00> : vector<64x128xf32>
    %165 = tpu.matmul %162, %164, %cst_190 {dimension_numbers = #tpu.dot_dimension_numbers<[1], [0], [0], [1], [0, 0, 1, 1], [], []>} : vector<64x128xbf16>, vector<128x128xbf16>, vector<64x128xf32> -> vector<64x128xf32>
    %166 = arith.addf %159, %165 : vector<64x128xf32>
    %c0_191 = arith.constant 0 : index
    %c0_192 = arith.constant 0 : index
    %c2_193 = arith.constant 2 : index
    %c0_194 = arith.constant 0 : index
    %c0_195 = arith.constant 0 : index
    %167 = vector.load %arg4[%c0_191, %c0_192, %c2_193, %c0_194, %c0_195] : memref<1x1x10x10x128xbf16, #tpu.memory_space<vmem>>, vector<1x1x8x8x128xbf16>
    %168 = vector.shape_cast %167 : vector<1x1x8x8x128xbf16> to vector<8x8x128xbf16>
    %169 = vector.shape_cast %168 : vector<8x8x128xbf16> to vector<64x128xbf16>
    %c24 = arith.constant 24 : index
    %c0_196 = arith.constant 0 : index
    %c0_197 = arith.constant 0 : index
    %170 = vector.load %arg5[%c24, %c0_196, %c0_197] : memref<27x128x128xbf16, #tpu.memory_space<vmem>>, vector<1x128x128xbf16>
    %171 = vector.shape_cast %170 : vector<1x128x128xbf16> to vector<128x128xbf16>
    %cst_198 = arith.constant dense<0.000000e+00> : vector<64x128xf32>
    %172 = tpu.matmul %169, %171, %cst_198 {dimension_numbers = #tpu.dot_dimension_numbers<[1], [0], [0], [1], [0, 0, 1, 1], [], []>} : vector<64x128xbf16>, vector<128x128xbf16>, vector<64x128xf32> -> vector<64x128xf32>
    %173 = arith.addf %166, %172 : vector<64x128xf32>
    %c0_199 = arith.constant 0 : index
    %c0_200 = arith.constant 0 : index
    %c2_201 = arith.constant 2 : index
    %c1_202 = arith.constant 1 : index
    %c0_203 = arith.constant 0 : index
    %174 = vector.load %arg4[%c0_199, %c0_200, %c2_201, %c1_202, %c0_203] : memref<1x1x10x10x128xbf16, #tpu.memory_space<vmem>>, vector<1x1x8x8x128xbf16>
    %175 = vector.shape_cast %174 : vector<1x1x8x8x128xbf16> to vector<8x8x128xbf16>
    %176 = vector.shape_cast %175 : vector<8x8x128xbf16> to vector<64x128xbf16>
    %c25 = arith.constant 25 : index
    %c0_204 = arith.constant 0 : index
    %c0_205 = arith.constant 0 : index
    %177 = vector.load %arg5[%c25, %c0_204, %c0_205] : memref<27x128x128xbf16, #tpu.memory_space<vmem>>, vector<1x128x128xbf16>
    %178 = vector.shape_cast %177 : vector<1x128x128xbf16> to vector<128x128xbf16>
    %cst_206 = arith.constant dense<0.000000e+00> : vector<64x128xf32>
    %179 = tpu.matmul %176, %178, %cst_206 {dimension_numbers = #tpu.dot_dimension_numbers<[1], [0], [0], [1], [0, 0, 1, 1], [], []>} : vector<64x128xbf16>, vector<128x128xbf16>, vector<64x128xf32> -> vector<64x128xf32>
    %180 = arith.addf %173, %179 : vector<64x128xf32>
    %c0_207 = arith.constant 0 : index
    %c0_208 = arith.constant 0 : index
    %c2_209 = arith.constant 2 : index
    %c2_210 = arith.constant 2 : index
    %c0_211 = arith.constant 0 : index
    %181 = vector.load %arg4[%c0_207, %c0_208, %c2_209, %c2_210, %c0_211] : memref<1x1x10x10x128xbf16, #tpu.memory_space<vmem>>, vector<1x1x8x8x128xbf16>
    %182 = vector.shape_cast %181 : vector<1x1x8x8x128xbf16> to vector<8x8x128xbf16>
    %183 = vector.shape_cast %182 : vector<8x8x128xbf16> to vector<64x128xbf16>
    %c26 = arith.constant 26 : index
    %c0_212 = arith.constant 0 : index
    %c0_213 = arith.constant 0 : index
    %184 = vector.load %arg5[%c26, %c0_212, %c0_213] : memref<27x128x128xbf16, #tpu.memory_space<vmem>>, vector<1x128x128xbf16>
    %185 = vector.shape_cast %184 : vector<1x128x128xbf16> to vector<128x128xbf16>
    %cst_214 = arith.constant dense<0.000000e+00> : vector<64x128xf32>
    %186 = tpu.matmul %183, %185, %cst_214 {dimension_numbers = #tpu.dot_dimension_numbers<[1], [0], [0], [1], [0, 0, 1, 1], [], []>} : vector<64x128xbf16>, vector<128x128xbf16>, vector<64x128xf32> -> vector<64x128xf32>
    %187 = arith.addf %180, %186 : vector<64x128xf32>
    %c0_215 = arith.constant 0 : index
    %c0_216 = arith.constant 0 : index
    %188 = vector.load %arg6[%c0_215, %c0_216] : memref<1x128xf32, #tpu.memory_space<vmem>>, vector<1x128xf32>
    %189 = vector.broadcast %188 : vector<1x128xf32> to vector<64x128xf32>
    %190 = arith.mulf %187, %189 : vector<64x128xf32>
    %c0_217 = arith.constant 0 : index
    %c0_218 = arith.constant 0 : index
    %191 = vector.load %arg7[%c0_217, %c0_218] : memref<1x128xf32, #tpu.memory_space<vmem>>, vector<1x128xf32>
    %192 = vector.broadcast %191 : vector<1x128xf32> to vector<64x128xf32>
    %193 = arith.addf %190, %192 : vector<64x128xf32>
    %cst_219 = arith.constant 0.000000e+00 : f32
    %194 = vector.broadcast %cst_219 : f32 to vector<64x128xf32>
    %195 = arith.cmpf oge, %193, %194 : vector<64x128xf32>
    %cst_220 = arith.constant 0.00999999977 : f32
    %196 = vector.broadcast %cst_220 : f32 to vector<64x128xf32>
    %197 = arith.mulf %196, %193 : vector<64x128xf32>
    %198 = arith.select %195, %193, %197 : vector<64x128xi1>, vector<64x128xf32>
    %199 = arith.truncf %198 : vector<64x128xf32> to vector<64x128xbf16>
    %c0_221 = arith.constant 0 : index
    %c0_222 = arith.constant 0 : index
    %200 = vector.load %arg8[%c0_221, %c0_222] : memref<128x128xbf16, #tpu.memory_space<vmem>>, vector<128x128xbf16>
    %cst_223 = arith.constant dense<0.000000e+00> : vector<64x128xf32>
    %201 = tpu.matmul %199, %200, %cst_223 {dimension_numbers = #tpu.dot_dimension_numbers<[1], [0], [0], [1], [0, 0, 1, 1], [], []>} : vector<64x128xbf16>, vector<128x128xbf16>, vector<64x128xf32> -> vector<64x128xf32>
    %c0_224 = arith.constant 0 : index
    %c0_225 = arith.constant 0 : index
    %c0_226 = arith.constant 0 : index
    %c0_227 = arith.constant 0 : index
    %c0_228 = arith.constant 0 : index
    %202 = vector.load %arg9[%c0_224, %c0_225, %c0_226, %c0_227, %c0_228] : memref<1x1x8x8x128xbf16, #tpu.memory_space<vmem>>, vector<1x1x8x8x128xbf16>
    %203 = vector.shape_cast %202 : vector<1x1x8x8x128xbf16> to vector<8x8x128xbf16>
    %204 = vector.shape_cast %203 : vector<8x8x128xbf16> to vector<64x128xbf16>
    %205 = arith.extf %204 : vector<64x128xbf16> to vector<64x128xf32>
    %c0_229 = arith.constant 0 : index
    %c0_230 = arith.constant 0 : index
    %206 = vector.load %arg10[%c0_229, %c0_230] : memref<1x128xf32, #tpu.memory_space<vmem>>, vector<1x128xf32>
    %207 = vector.broadcast %206 : vector<1x128xf32> to vector<64x128xf32>
    %208 = arith.mulf %205, %207 : vector<64x128xf32>
    %c0_231 = arith.constant 0 : index
    %c0_232 = arith.constant 0 : index
    %209 = vector.load %arg11[%c0_231, %c0_232] : memref<1x128xf32, #tpu.memory_space<vmem>>, vector<1x128xf32>
    %210 = vector.broadcast %209 : vector<1x128xf32> to vector<64x128xf32>
    %211 = arith.addf %208, %210 : vector<64x128xf32>
    %cst_233 = arith.constant 0.000000e+00 : f32
    %212 = vector.broadcast %cst_233 : f32 to vector<64x128xf32>
    %213 = arith.cmpf oge, %211, %212 : vector<64x128xf32>
    %cst_234 = arith.constant 0.00999999977 : f32
    %214 = vector.broadcast %cst_234 : f32 to vector<64x128xf32>
    %215 = arith.mulf %214, %211 : vector<64x128xf32>
    %216 = arith.select %213, %211, %215 : vector<64x128xi1>, vector<64x128xf32>
    %217 = arith.truncf %216 : vector<64x128xf32> to vector<64x128xbf16>
    %c0_235 = arith.constant 0 : index
    %c0_236 = arith.constant 0 : index
    %218 = vector.load %arg12[%c0_235, %c0_236] : memref<128x128xbf16, #tpu.memory_space<vmem>>, vector<128x128xbf16>
    %cst_237 = arith.constant dense<0.000000e+00> : vector<64x128xf32>
    %219 = tpu.matmul %217, %218, %cst_237 {dimension_numbers = #tpu.dot_dimension_numbers<[1], [0], [0], [1], [0, 0, 1, 1], [], []>} : vector<64x128xbf16>, vector<128x128xbf16>, vector<64x128xf32> -> vector<64x128xf32>
    %220 = arith.addf %201, %219 : vector<64x128xf32>
    %221 = arith.truncf %220 : vector<64x128xf32> to vector<64x128xbf16>
    %c0_238 = arith.constant 0 : index
    %c0_239 = arith.constant 0 : index
    %c0_240 = arith.constant 0 : index
    %c0_241 = arith.constant 0 : index
    %222 = vector.load %arg13[%c0_238, %c0_239, %c0_240, %c0_241] : memref<1x1x64x128xbf16, #tpu.memory_space<vmem>>, vector<1x1x64x128xbf16>
    %223 = vector.shape_cast %222 : vector<1x1x64x128xbf16> to vector<64x128xbf16>
    %224 = vector.shape_cast %221 : vector<64x128xbf16> to vector<1x1x64x128xbf16>
    tpu.vector_store %arg13[%c0_238, %c0_239, %c0_240, %c0_241], %224 {strides = array<i32>} : memref<1x1x64x128xbf16, #tpu.memory_space<vmem>>, vector<1x1x64x128xbf16>,
    return
  }
  func.func @transform_0(%arg0: i32, %arg1: i32) -> (i32, i32, i32, i32, i32) {
    %c1_i32 = arith.constant 1 : i32
    %0 = arith.muli %arg1, %c1_i32 : i32
    %c0_i32 = arith.constant 0 : i32
    %1 = arith.addi %0, %c0_i32 : i32
    %c0_i32_0 = arith.constant 0 : i32
    %c0_i32_1 = arith.constant 0 : i32
    %c0_i32_2 = arith.constant 0 : i32
    %c0_i32_3 = arith.constant 0 : i32
    return %arg0, %1, %c0_i32_0, %c0_i32_1, %c0_i32_2 : i32, i32, i32, i32, i32
  }
  func.func @transform_1(%arg0: i32, %arg1: i32) -> (i32, i32, i32, i32, i32) {
    %c1_i32 = arith.constant 1 : i32
    %0 = arith.muli %arg1, %c1_i32 : i32
    %c1_i32_0 = arith.constant 1 : i32
    %1 = arith.addi %0, %c1_i32_0 : i32
    %c0_i32 = arith.constant 0 : i32
    %c0_i32_1 = arith.constant 0 : i32
    %c0_i32_2 = arith.constant 0 : i32
    %c0_i32_3 = arith.constant 0 : i32
    return %arg0, %1, %c0_i32, %c0_i32_1, %c0_i32_2 : i32, i32, i32, i32, i32
  }
  func.func @transform_2(%arg0: i32, %arg1: i32) -> (i32, i32, i32, i32, i32) {
    %c1_i32 = arith.constant 1 : i32
    %0 = arith.muli %arg1, %c1_i32 : i32
    %c2_i32 = arith.constant 2 : i32
    %1 = arith.addi %0, %c2_i32 : i32
    %c0_i32 = arith.constant 0 : i32
    %c0_i32_0 = arith.constant 0 : i32
    %c0_i32_1 = arith.constant 0 : i32
    %c0_i32_2 = arith.constant 0 : i32
    return %arg0, %1, %c0_i32, %c0_i32_0, %c0_i32_1 : i32, i32, i32, i32, i32
  }
  func.func @transform_3(%arg0: i32, %arg1: i32) -> (i32, i32, i32) {
    %c0_i32 = arith.constant 0 : i32
    %c0_i32_0 = arith.constant 0 : i32
    %c0_i32_1 = arith.constant 0 : i32
    %c0_i32_2 = arith.constant 0 : i32
    return %c0_i32, %c0_i32_0, %c0_i32_1 : i32, i32, i32
  }
  func.func @transform_4(%arg0: i32, %arg1: i32) -> (i32, i32) {
    %c0_i32 = arith.constant 0 : i32
    %c0_i32_0 = arith.constant 0 : i32
    %c0_i32_1 = arith.constant 0 : i32
    return %c0_i32, %c0_i32_0 : i32, i32
  }
  func.func @transform_5(%arg0: i32, %arg1: i32) -> (i32, i32) {
    %c0_i32 = arith.constant 0 : i32
    %c0_i32_0 = arith.constant 0 : i32
    %c0_i32_1 = arith.constant 0 : i32
    return %c0_i32, %c0_i32_0 : i32, i32
  }
  func.func @transform_6(%arg0: i32, %arg1: i32) -> (i32, i32) {
    %c0_i32 = arith.constant 0 : i32
    %c0_i32_0 = arith.constant 0 : i32
    %c0_i32_1 = arith.constant 0 : i32
    return %c0_i32, %c0_i32_0 : i32, i32
  }
  func.func @transform_7(%arg0: i32, %arg1: i32) -> (i32, i32, i32, i32, i32) {
    %c1_i32 = arith.constant 1 : i32
    %0 = arith.muli %arg1, %c1_i32 : i32
    %c0_i32 = arith.constant 0 : i32
    %c0_i32_0 = arith.constant 0 : i32
    %c0_i32_1 = arith.constant 0 : i32
    %c0_i32_2 = arith.constant 0 : i32
    return %arg0, %0, %c0_i32, %c0_i32_0, %c0_i32_1 : i32, i32, i32, i32, i32
  }
  func.func @transform_8(%arg0: i32, %arg1: i32) -> (i32, i32) {
    %c0_i32 = arith.constant 0 : i32
    %c0_i32_0 = arith.constant 0 : i32
    %c0_i32_1 = arith.constant 0 : i32
    return %c0_i32, %c0_i32_0 : i32, i32
  }
  func.func @transform_9(%arg0: i32, %arg1: i32) -> (i32, i32) {
    %c0_i32 = arith.constant 0 : i32
    %c0_i32_0 = arith.constant 0 : i32
    %c0_i32_1 = arith.constant 0 : i32
    return %c0_i32, %c0_i32_0 : i32, i32
  }
  func.func @transform_10(%arg0: i32, %arg1: i32) -> (i32, i32) {
    %c0_i32 = arith.constant 0 : i32
    %c0_i32_0 = arith.constant 0 : i32
    %c0_i32_1 = arith.constant 0 : i32
    return %c0_i32, %c0_i32_0 : i32, i32
  }
  func.func @transform_11(%arg0: i32, %arg1: i32) -> (i32, i32, i32, i32) {
    %c0_i32 = arith.constant 0 : i32
    %c0_i32_0 = arith.constant 0 : i32
    %c0_i32_1 = arith.constant 0 : i32
    return %arg0, %arg1, %c0_i32, %c0_i32_0 : i32, i32, i32, i32
  }
}

</mosaic_0001>

<bundles_post_ra>
// kernel: residual_module_3d.2
= control target key start
LH: loop header
LB: loop body
LE: loop exit
PB: predicated region body
PF: predicated region fallthrough
CT: control target
= control target key end

     0   :  { %s1070_s21 = smov 0   ;;  %s1072_s22 = smov 0   ;;  %s1299_s0 = inlined_call_operand.vmem [shape: bf16[2,8,8,8,128], index: 0, kind: input, shape index: {}]   ;;  %s1300_s1 = inlined_call_operand.vmem [shape: f32[1,128], index: 1, kind: input, shape index: {}]   ;;  %s1301_s2 = inlined_call_operand.vmem [shape: f32[1,128], index: 2, kind: input, shape index: {}]   ;;  %s1302_s3 = inlined_call_operand.vmem [shape: bf16[128,128], index: 3, kind: input, shape index: {}]   ;;  %s1303_s4 = inlined_call_operand.vmem [shape: f32[1,128], index: 4, kind: input, shape index: {}]   ;;  %s1304_s5 = inlined_call_operand.vmem [shape: f32[1,128], index: 5, kind: input, shape index: {}]   ;;  %s1305_s6 = inlined_call_operand.vmem [shape: bf16[2,10,10,10,128], index: 6, kind: output, shape index: {}]  }
   0x1   :  { %s1074_s23 = smov 0   ;;  %s1076_s24 = smov 0  }
   0x2   :  { %s1078_s25 = smov 0  }
   0x3 LB: > { %s25_s26 = sadd.s32 1, %s1024_s23  ;;  %s28_s27 = sadd.s32 1, %s1028_s24  ;;  %s1032_s25 = sphi %s1078_s25, %s16_s25   ;;  %s1028_s24 = sphi %s1076_s24, %s1314_s24   ;;  %s1024_s23 = sphi %s1074_s23, %s1313_s23   ;;  %s1020_s22 = sphi %s1072_s22, %s1312_s22   ;;  %s1016_s21 = sphi %s1070_s21, %s1311_s21  }
   0x4   : > { %p26_p0 = scmp.ge.s32.totalorder %s25_s26, 10  ;;  %p813_p1 = scmp.ge.s32.totalorder %s1032_s25, 1 }
   0x5   : > { %p252_p2 = scmp.lt.s32.totalorder %s1032_s25, 21 }
   0x6   : > { %s1316_s26 = smov (%p26_p0, %s25_s26), 0  ;;  %s1318_s27 = smov (!%p26_p0, %s28_s27), %s1028_s24 }
   0x7   : > { %p253_p3 = pnand %p813_p1, %p252_p2  ;;  %p30_p4 = scmp.ge.s32.totalorder %s1318_s27, 2 }
   0x8   : > { %s814_s28 = sadd.s32 (!%p253_p3), 4294967295, %s1016_s21  ;;  %p300_p5 = scmp.lt.s32.totalorder (!%p253_p3), %s1020_s22, 1 }
   0x9   : > { %s1320_s27 = smov (%p30_p4, %s1318_s27), 0  ;;  %256 = sbr.rel (%p253_p3) target bundleno = 241 (0xf1), region = 44 }
   0xa   : > { %p296_p6 = scmp.lt.s32.totalorder (!%p253_p3), %s814_s28, 7  ;;  %p815_p7 = scmp.gt.s32.totalorder (!%p253_p3), %s814_s28, 0 }
   0xb   : > { %p316_p8 = scmp.lt.s32.totalorder (!%p253_p3), %s1016_s21, 9  ;;  %p324_p10 = scmp.gt.s32.totalorder (!%p253_p3), %s1016_s21, 0 }
   0xd   : > { %p1106_p11 = pnand (!%p253_p3), %p324_p10, %p316_p8 }
   0xe   : > { %s1322_s22 = smov (!%p300_p5, %s1020_s22), 1  ;;  %s1324_s28 = smov (!%p296_p6, %s814_s28), 7  ;;  %v1034_v0 = vmov 0  }
   0xf   : > { %s821_s29 = sshll.u32 %s1322_s22, 6  ;;  %s1326_s28 = smov (!%p815_p7, %s1324_s28), 0 }
  0x10   : > { %s317_s30 = scalar_select %p316_p8, %s1016_s21, 9 }
  0x11   : > { %p302_p9 = scmp.lt.s32.totalorder %s1326_s28, 7  ;;  %s948_s7 = smul.u32 200, %s1322_s22 }
  0x12   : > { %s947_s8 = smul.u32 20, %s317_s30 }
  0x13   : > { %s1328_s28 = smov (!%p302_p9, %s1326_s28), 7 }
  0x14   : > { %s320_s9 = sadd.s32 %s948_s7, %s947_s8  ;;  %s820_s11 = sshll.u32 %s1328_s28, 3 }
  0x15   : > { %s823_s12 = sshll.u32 %s320_s9, 2  ;;  %s306_s13 = sadd.s32 %s821_s29, %s820_s11 }
  0x16   : > { %s1113_s16 = scalar_lea.vmem %s1305_s6, %s823_s12  ;;  %s822_s17 = sshll.u32 %s306_s13, 2 }
  0x17   : > { %328 = vst [vmem:[%s1113_s16] sm:$0xf] %v1034_v0  ;;  %s1119_s20 = scalar_lea.vmem %s1299_s0, %s822_s17 }
  0x18   : > { %329 = vst [vmem:[%s1113_s16 + $0x4] sm:$0x1] %v1034_v0 }
  0x19   : > { %330 = vst [vmem:[%s1113_s16 + $0x8] sm:$0xf] %v1034_v0 }
  0x1a   : > { %331 = vst [vmem:[%s1113_s16 + $0xc] sm:$0x1] %v1034_v0 }
  0x1b   : > { %332 = vst [vmem:[%s1113_s16 + $0x10] sm:$0xf] %v1034_v0 }
  0x1c   : > { %333 = vst [vmem:[%s1113_s16 + $0x14] sm:$0x1] %v1034_v0 }
  0x1d   : > { %334 = vst [vmem:[%s1113_s16 + $0x18] sm:$0xf] %v1034_v0 }
  0x1e   : > { %335 = vst [vmem:[%s1113_s16 + $0x1c] sm:$0x1] %v1034_v0 }
  0x1f   : > { %336 = vst [vmem:[%s1113_s16 + $0x20] sm:$0xf] %v1034_v0 }
  0x20   : > { %337 = vst [vmem:[%s1113_s16 + $0x24] sm:$0x1] %v1034_v0 }
  0x21   : > { %338 = vst [vmem:[%s1113_s16 + $0x28] sm:$0xf] %v1034_v0 }
  0x22   : > { %339 = vst [vmem:[%s1113_s16 + $0x2c] sm:$0x1] %v1034_v0 }
  0x23   : > { %340 = vst [vmem:[%s1113_s16 + $0x30] sm:$0xf] %v1034_v0 }
  0x24   : > { %341 = vst [vmem:[%s1113_s16 + $0x34] sm:$0x1] %v1034_v0 }
  0x25   : > { %342 = vst [vmem:[%s1113_s16 + $0x38] sm:$0xf] %v1034_v0 }
  0x26   : > { %343 = vst [vmem:[%s1113_s16 + $0x3c] sm:$0x1] %v1034_v0  ;;  %349 = sbr.rel (%p1106_p11) target bundleno = 241 (0xf1), region = 48 }
  0x27   : > { %344 = vst [vmem:[%s1113_s16 + $0x40] sm:$0xf] %v1034_v0 }
  0x28   : > { %345 = vst [vmem:[%s1113_s16 + $0x44] sm:$0x1] %v1034_v0 }
  0x29   : > { %346 = vst [vmem:[%s1113_s16 + $0x48] sm:$0xf] %v1034_v0 }
  0x2a   : > { %347 = vst [vmem:[%s1113_s16 + $0x4c] sm:$0x1] %v1034_v0 }
  0x2b   : > { %v903_v1 = vld [vmem:[%s1302_s3 + $0x38] sm:$0xff]  ;;  %v902_v2 = vld [vmem:[%s1302_s3 + $0x30] sm:$0xff]  ;;  %v905_v3 = vld [vmem:[%s1119_s20] sm:$0xff]   ;;  %vm648_vm10 = vcmask 1043456   ;;  %vm649_vm11 = vsmask.f32 7938 }
  0x2c   : > { %482 = vmatpush.bf16.msra.mxu0 %v903_v1  ;;  %923 = vmatpush.bf16.msra.mxu1 %v903_v1  ;;  %v901_v4 = vld [vmem:[%s1302_s3 + $0x28] sm:$0xff]  ;;  %v921_v6 = vld [vmem:[%s1119_s20 + $0x10] sm:$0xff]   ;;  %v906_v7 = vunpack.c.l.bf16 %v905_v3  ;;  %v990_v8 = vld [vmem:[%s1300_s1] ss:$0 sm:$0xff]  ;;  %v907_v10 = vunpack.c.h.bf16 %v905_v3  ;;  %vm654_vm12 = vcmask 1040384  }
  0x2d   : > { %924 = vmatpush.bf16.msra.mxu2 %v903_v1  ;;  %925 = vmatpush.bf16.msra.mxu3 %v903_v1  ;;  %v920_v5 = vld [vmem:[%s1119_s20 + $0x8] sm:$0xff]   ;;  %v922_v9 = vld [vmem:[%s1119_s20 + $0x18] sm:$0xff]   ;;  %v900_v12 = vld [vmem:[%s1302_s3 + $0x20] sm:$0xff]  ;;  %v914_v14 = vunpack.c.l.bf16 %v921_v6  ;;  %v915_v15 = vunpack.c.h.bf16 %v921_v6  ;;  %vm655_vm13 = vsmask.f32 256 }
  0x2e   : > { %v910_v11 = vunpack.c.l.bf16 %v920_v5  ;;  %v911_v13 = vunpack.c.h.bf16 %v920_v5  ;;  %v918_v16 = vunpack.c.l.bf16 %v922_v9  ;;  %v919_v17 = vunpack.c.h.bf16 %v922_v9  ;;  %v991_v19 = vld [vmem:[%s1301_s2] ss:$0 sm:$0xff]  ;;  %v899_v22 = vld [vmem:[%s1302_s3 + $0x18] sm:$0xff]  ;;  %v898_v31 = vld [vmem:[%s1302_s3 + $0x10] sm:$0xff] }
  0x2f   : > { %v370_v18 = vmul.f32 %v990_v8, %v906_v7  ;;  %v371_v20 = vmul.f32 %v990_v8, %v907_v10  ;;  %v374_v24 = vmul.f32 %v990_v8, %v914_v14  ;;  %v375_v25 = vmul.f32 %v990_v8, %v915_v15  ;;  %v897_v37 = vld [vmem:[%s1302_s3 + $0x8] sm:$0xff]  ;;  %v896_v48 = vld [vmem:[%s1302_s3] sm:$0xff]  ;;  %vm1206_vm14 = vmand %vm648_vm10, %vm649_vm11 }
  0x30   : > { %483 = vmatpush.bf16.msra.mxu0 %v902_v2  ;;  %926 = vmatpush.bf16.msra.mxu1 %v902_v2  ;;  %v372_v21 = vmul.f32 %v990_v8, %v910_v11  ;;  %v373_v23 = vmul.f32 %v990_v8, %v911_v13  ;;  %v376_v26 = vmul.f32 %v990_v8, %v918_v16  ;;  %v1184_v59 = vld [vmem:[%s1303_s4] ss:$0 sm:$0xff]  ;;  %vm1215_vm15 = vmand %vm654_vm12, %vm655_vm13 }
  0x31   : > { %927 = vmatpush.bf16.msra.mxu2 %v902_v2  ;;  %928 = vmatpush.bf16.msra.mxu3 %v902_v2  ;;  %v377_v27 = vmul.f32 %v990_v8, %v919_v17  ;;  %v382_v28 = vadd.f32 %v991_v19, %v370_v18  ;;  %v383_v29 = vadd.f32 %v991_v19, %v371_v20  ;;  %v1189_v60 = vld [vmem:[%s1304_s5] ss:$0 sm:$0xff] }
  0x32   : > { %v384_v30 = vadd.f32 %v991_v19, %v372_v21  ;;  %v385_v32 = vadd.f32 %v991_v19, %v373_v23  ;;  %v386_v33 = vadd.f32 %v991_v19, %v374_v24  ;;  %v387_v34 = vadd.f32 %v991_v19, %v375_v25  ;;  %v856_v21 = vld [vmem:[%s1113_s16 + $0x8] sm:$0xf] }
  0x33   : > { %v388_v35 = vadd.f32 %v991_v19, %v376_v26  ;;  %v389_v36 = vadd.f32 %v991_v19, %v377_v27  ;;  %vm390_vm0 = vcmp.ge.f32.partialorder %v382_v28, 0.0  ;;  %v398_v38 = vmul.f32 0.01, %v382_v28 }
  0x34   : > { %484 = vmatpush.bf16.msra.mxu0 %v901_v4  ;;  %929 = vmatpush.bf16.msra.mxu1 %v901_v4  ;;  %vm391_vm1 = vcmp.ge.f32.partialorder %v383_v29, 0.0  ;;  %v399_v39 = vmul.f32 0.01, %v383_v29  ;;  %vm392_vm2 = vcmp.ge.f32.partialorder %v384_v30, 0.0  ;;  %v400_v40 = vmul.f32 0.01, %v384_v30 }
  0x35   : > { %930 = vmatpush.bf16.msra.mxu2 %v901_v4  ;;  %931 = vmatpush.bf16.msra.mxu3 %v901_v4  ;;  %vm393_vm3 = vcmp.ge.f32.partialorder %v385_v32, 0.0  ;;  %v401_v41 = vmul.f32 0.01, %v385_v32  ;;  %vm394_vm4 = vcmp.ge.f32.partialorder %v386_v33, 0.0  ;;  %v402_v42 = vmul.f32 0.01, %v386_v33 }
  0x36   : > { %v403_v43 = vmul.f32 0.01, %v387_v34  ;;  %v404_v44 = vmul.f32 0.01, %v388_v35  ;;  %v405_v45 = vmul.f32 0.01, %v389_v36  ;;  %v406_v46 = vsel %vm390_vm0, %v382_v28, %v398_v38 }
  0x37   : > { %vm395_vm5 = vcmp.ge.f32.partialorder %v387_v34, 0.0  ;;  %vm396_vm6 = vcmp.ge.f32.partialorder %v388_v35, 0.0  ;;  %vm397_vm7 = vcmp.ge.f32.partialorder %v389_v36, 0.0  ;;  %v407_v47 = vsel %vm391_vm1, %v383_v29, %v399_v39  ;;  %v864_v29 = vld [vmem:[%s1113_s16 + $0x18] sm:$0xf] }
  0x38   : > { %485 = vmatpush.bf16.msra.mxu0 %v900_v12  ;;  %932 = vmatpush.bf16.msra.mxu1 %v900_v12  ;;  %v408_v49 = vsel %vm392_vm2, %v384_v30, %v400_v40  ;;  %v409_v50 = vsel %vm393_vm3, %v385_v32, %v401_v41  ;;  %v410_v51 = vsel %vm394_vm4, %v386_v33, %v402_v42  ;;  %v866_v30 = vld [vmem:[%s1113_s16 + $0x1c] sm:$0x1] }
  0x39   : > { %933 = vmatpush.bf16.msra.mxu2 %v900_v12  ;;  %934 = vmatpush.bf16.msra.mxu3 %v900_v12  ;;  %v411_v52 = vsel %vm395_vm5, %v387_v34, %v403_v43  ;;  %v412_v53 = vsel %vm396_vm6, %v388_v35, %v404_v44  ;;  %v413_v54 = vsel %vm397_vm7, %v389_v36, %v405_v45 }
  0x3a   : > { %v414_v55 = vpack.c.bf16 %v407_v47, %v406_v46  ;;  %v415_v56 = vpack.c.bf16 %v409_v50, %v408_v49  ;;  %v416_v57 = vpack.c.bf16 %v411_v52, %v410_v51  ;;  %v417_v58 = vpack.c.bf16 %v413_v54, %v412_v53 }
  0x3c   : > { %486 = vmatpush.bf16.msra.mxu0 %v899_v22  ;;  %935 = vmatpush.bf16.msra.mxu1 %v899_v22 }
  0x3d   : > { %936 = vmatpush.bf16.msra.mxu2 %v899_v22  ;;  %937 = vmatpush.bf16.msra.mxu3 %v899_v22  ;;  %v858_v22 = vld [vmem:[%s1113_s16 + $0xc] sm:$0x1] }
  0x40   : > { %487 = vmatpush.bf16.msra.mxu0 %v898_v31  ;;  %938 = vmatpush.bf16.msra.mxu1 %v898_v31 }
  0x41   : > { %939 = vmatpush.bf16.msra.mxu2 %v898_v31  ;;  %940 = vmatpush.bf16.msra.mxu3 %v898_v31 }
  0x44   : > { %488 = vmatpush.bf16.msra.mxu0 %v897_v37  ;;  %941 = vmatpush.bf16.msra.mxu1 %v897_v37 }
  0x45   : > { %942 = vmatpush.bf16.msra.mxu2 %v897_v37  ;;  %943 = vmatpush.bf16.msra.mxu3 %v897_v37 }
  0x48   : > { %489 = vmatpush.bf16.msra.mxu0 %v896_v48  ;;  %944 = vmatpush.bf16.msra.mxu1 %v896_v48 }
  0x49   : > { %945 = vmatpush.bf16.msra.mxu2 %v896_v48  ;;  %946 = vmatpush.bf16.msra.mxu3 %v896_v48 }
  0x4b   : > { %490 = vmatmul.bf16.vlgmr.msra.gmra.mxu0 %v414_v55  ;;  %495 = vmatmul.bf16.vlgmr.msra.gmra.mxu1 %v415_v56 }
  0x4c   : > { %500 = vmatmul.bf16.vlgmr.msra.gmra.mxu2 %v416_v57  ;;  %505 = vmatmul.bf16.vlgmr.msra.gmra.mxu3 %v417_v58  ;;  %v872_v58 = vld [vmem:[%s1113_s16 + $0x28] sm:$0xf] }
  0xc8   : > { %v491_v61 = vpop.f32.mrf.mxu0  ;;  %v496_v62 = vpop.f32.mrf.mxu1 }
  0xc9   : > { %v515_v63 = vmul.f32 %v1184_v59, %v491_v61  ;;  %v517_v0 = vmul.f32 %v1184_v59, %v496_v62 }
  0xcb   : > { %v527_v1 = vadd.f32 %v1189_v60, %v515_v63  ;;  %v529_v2 = vadd.f32 %v1189_v60, %v517_v0 }
  0xcd   : > { %vm535_vm8 = vcmp.ge.f32.partialorder %v527_v1, 0.0  ;;  %v543_v3 = vmul.f32 0.01, %v527_v1  ;;  %vm537_vm9 = vcmp.ge.f32.partialorder %v529_v2, 0.0  ;;  %v545_v4 = vmul.f32 0.01, %v529_v2 }
  0xcf   : > { %v551_v5 = vsel %vm535_vm8, %v527_v1, %v543_v3  ;;  %v553_v6 = vsel %vm537_vm9, %v529_v2, %v545_v4  ;;  %v501_v7 = vpop.f32.mrf.mxu2  ;;  %v506_v8 = vpop.f32.mrf.mxu3  ;;  %v874_v2 = vld [vmem:[%s1113_s16 + $0x2c] sm:$0x1] }
  0xd0   : > { %v559_v9 = vpack.c.bf16 %v551_v5, %v551_v5  ;;  %v561_v10 = vpack.c.bf16 %v553_v6, %v553_v6  ;;  %v519_v11 = vmul.f32 %v1184_v59, %v501_v7  ;;  %v521_v12 = vmul.f32 %v1184_v59, %v506_v8  ;;  %v493_v13 = vpop.f32.mrf.mxu0  ;;  %v498_v14 = vpop.f32.mrf.mxu1 }
  0xd1   : > { %v516_v15 = vmul.f32 %v1184_v59, %v493_v13  ;;  %v518_v16 = vmul.f32 %v1184_v59, %v498_v14  ;;  %v882_v13 = vld [vmem:[%s1113_s16 + $0x3c] sm:$0x1] }
  0xd2   : > { %v568_v17 = vshrl.u32 %v559_v9, 16  ;;  %v571_v18 = vshll.u32 %v559_v9, 16  ;;  %v584_v19 = vshrl.u32 %v561_v10, 16  ;;  %v587_v20 = vshll.u32 %v561_v10, 16 }
  0xd3   : > { %v531_v23 = vadd.f32 %v1189_v60, %v519_v11  ;;  %v533_v24 = vadd.f32 %v1189_v60, %v521_v12  ;;  %v528_v25 = vadd.f32 %v1189_v60, %v516_v15  ;;  %v530_v31 = vadd.f32 %v1189_v60, %v518_v16  ;;  %v860_v16 = vld [vmem:[%s1113_s16 + $0x10] sm:$0xf] }
  0xd4   : > { %v570_v26 = vrot.slane %v568_v17, 7  ;;  %v586_v28 = vrot.slane %v584_v19, 7 }
  0xd5   : > { %vm539_vm0 = vcmp.ge.f32.partialorder %v531_v23, 0.0  ;;  %v547_v33 = vmul.f32 0.01, %v531_v23  ;;  %vm541_vm1 = vcmp.ge.f32.partialorder %v533_v24, 0.0  ;;  %v549_v34 = vmul.f32 0.01, %v533_v24 }
  0xd6   : > { %v573_v35 = vor.u32 %v571_v18, %v570_v26  ;;  %v574_v36 = vrot.slane %v570_v26, 4  ;;  %v589_v37 = vor.u32 %v587_v20, %v586_v28  ;;  %v590_v38 = vrot.slane %v586_v28, 4  ;;  %v862_v20 = vld [vmem:[%s1113_s16 + $0x14] sm:$0x1] }
  0xd7   : > { %v555_v39 = vsel %vm539_vm0, %v531_v23, %v547_v33  ;;  %v557_v40 = vsel %vm541_vm1, %v533_v24, %v549_v34  ;;  %vm536_vm2 = vcmp.ge.f32.partialorder %v528_v25, 0.0  ;;  %v544_v41 = vmul.f32 0.01, %v528_v25  ;;  %v503_v42 = vpop.f32.mrf.mxu2  ;;  %v508_v43 = vpop.f32.mrf.mxu3 }
  0xd8   : > { %v652_v44 = vsel %vm1206_vm14, %v573_v35, %v856_v21  ;;  %v658_v45 = vsel %vm1215_vm15, %v574_v36, %v858_v22  ;;  %v667_v46 = vsel %vm1206_vm14, %v589_v37, %v864_v29  ;;  %v670_v47 = vsel %vm1215_vm15, %v590_v38, %v866_v30  ;;  %v868_v21 = vld [vmem:[%s1113_s16 + $0x20] sm:$0xf] }
  0xd9   : > { %857 = vst [vmem:[%s1113_s16 + $0x8] sm:$0xf] %v652_v44  ;;  %v563_v48 = vpack.c.bf16 %v555_v39, %v555_v39  ;;  %v565_v49 = vpack.c.bf16 %v557_v40, %v557_v40  ;;  %v552_v50 = vsel %vm536_vm2, %v528_v25, %v544_v41  ;;  %vm538_vm3 = vcmp.ge.f32.partialorder %v530_v31, 0.0  ;;  %v870_v25 = vld [vmem:[%s1113_s16 + $0x24] sm:$0x1] }
  0xda   : > { %859 = vst [vmem:[%s1113_s16 + $0xc] sm:$0x1] %v658_v45  ;;  %v560_v51 = vpack.c.bf16 %v552_v50, %v552_v50  ;;  %v546_v52 = vmul.f32 0.01, %v530_v31  ;;  %v520_v53 = vmul.f32 %v1184_v59, %v503_v42  ;;  %v522_v54 = vmul.f32 %v1184_v59, %v508_v43  ;;  %v880_v59 = vld [vmem:[%s1113_s16 + $0x38] sm:$0xf] }
  0xdb   : > { %865 = vst [vmem:[%s1113_s16 + $0x18] sm:$0xf] %v667_v46  ;;  %v600_v55 = vshrl.u32 %v563_v48, 16  ;;  %v603_v56 = vshll.u32 %v563_v48, 16  ;;  %v616_v57 = vshrl.u32 %v565_v49, 16  ;;  %v619_v61 = vshll.u32 %v565_v49, 16 }
  0xdc   : > { %867 = vst [vmem:[%s1113_s16 + $0x1c] sm:$0x1] %v670_v47  ;;  %v576_v62 = vshrl.u32 %v560_v51, 16  ;;  %v554_v63 = vsel %vm538_vm3, %v530_v31, %v546_v52  ;;  %v532_v0 = vadd.f32 %v1189_v60, %v520_v53  ;;  %v579_v4 = vshll.u32 %v560_v51, 16  ;;  %v876_v42 = vld [vmem:[%s1113_s16 + $0x30] sm:$0xf] }
  0xdd   : > { %v602_v1 = vrot.slane %v600_v55, 7  ;;  %v618_v3 = vrot.slane %v616_v57, 7  ;;  %v562_v5 = vpack.c.bf16 %v554_v63, %v554_v63  ;;  %v534_v8 = vadd.f32 %v1189_v60, %v522_v54  ;;  %v878_v43 = vld [vmem:[%s1113_s16 + $0x34] sm:$0x1]  ;;  %v884_v51 = vld [vmem:[%s1113_s16 + $0x40] sm:$0xf] }
  0xde   : > { %v578_v6 = vrot.slane %v576_v62, 7  ;;  %vm540_vm4 = vcmp.ge.f32.partialorder %v532_v0, 0.0  ;;  %v548_v7 = vmul.f32 0.01, %v532_v0  ;;  %v886_v52 = vld [vmem:[%s1113_s16 + $0x44] sm:$0x1] }
  0xdf   : > { %v605_v9 = vor.u32 %v603_v56, %v602_v1  ;;  %v606_v10 = vrot.slane %v602_v1, 4  ;;  %v621_v11 = vor.u32 %v619_v61, %v618_v3  ;;  %v622_v12 = vrot.slane %v618_v3, 4 }
  0xe0   : > { %v581_v14 = vor.u32 %v579_v4, %v578_v6  ;;  %v582_v15 = vrot.slane %v578_v6, 4  ;;  %v592_v17 = vshrl.u32 %v562_v5, 16  ;;  %v595_v24 = vshll.u32 %v562_v5, 16 }
  0xe1   : > { %v679_v18 = vsel %vm1206_vm14, %v605_v9, %v872_v58  ;;  %v682_v19 = vsel %vm1215_vm15, %v606_v10, %v874_v2  ;;  %v691_v60 = vsel %vm1206_vm14, %v621_v11, %v880_v59  ;;  %v694_v22 = vsel %vm1215_vm15, %v622_v12, %v882_v13 }
  0xe2   : > { %873 = vst [vmem:[%s1113_s16 + $0x28] sm:$0xf] %v679_v18  ;;  %v594_v23 = vrot.slane %v592_v17, 7  ;;  %v556_v26 = vsel %vm540_vm4, %v532_v0, %v548_v7  ;;  %v661_v28 = vsel %vm1206_vm14, %v581_v14, %v860_v16  ;;  %vm542_vm5 = vcmp.ge.f32.partialorder %v534_v8, 0.0 }
  0xe3   : > { %875 = vst [vmem:[%s1113_s16 + $0x2c] sm:$0x1] %v682_v19  ;;  %v564_v29 = vpack.c.bf16 %v556_v26, %v556_v26  ;;  %v550_v30 = vmul.f32 0.01, %v534_v8  ;;  %v664_v31 = vsel %vm1215_vm15, %v582_v15, %v862_v20 }
  0xe4   : > { %881 = vst [vmem:[%s1113_s16 + $0x38] sm:$0xf] %v691_v60  ;;  %v597_v33 = vor.u32 %v595_v24, %v594_v23  ;;  %v598_v34 = vrot.slane %v594_v23, 4 }
  0xe5   : > { %883 = vst [vmem:[%s1113_s16 + $0x3c] sm:$0x1] %v694_v22  ;;  %v608_v35 = vshrl.u32 %v564_v29, 16  ;;  %v558_v36 = vsel %vm542_vm5, %v534_v8, %v550_v30  ;;  %v611_v41 = vshll.u32 %v564_v29, 16 }
  0xe6   : > { %861 = vst [vmem:[%s1113_s16 + $0x10] sm:$0xf] %v661_v28  ;;  %v673_v37 = vsel %vm1206_vm14, %v597_v33, %v868_v21  ;;  %v676_v38 = vsel %vm1215_vm15, %v598_v34, %v870_v25  ;;  %v566_v39 = vpack.c.bf16 %v558_v36, %v558_v36 }
  0xe7   : > { %863 = vst [vmem:[%s1113_s16 + $0x14] sm:$0x1] %v664_v31  ;;  %v610_v40 = vrot.slane %v608_v35, 7 }
  0xe8   : > { %869 = vst [vmem:[%s1113_s16 + $0x20] sm:$0xf] %v673_v37  ;;  %v624_v44 = vshrl.u32 %v566_v39, 16  ;;  %v627_v48 = vshll.u32 %v566_v39, 16 }
  0xe9   : > { %871 = vst [vmem:[%s1113_s16 + $0x24] sm:$0x1] %v676_v38  ;;  %v613_v45 = vor.u32 %v611_v41, %v610_v40  ;;  %v614_v46 = vrot.slane %v610_v40, 4 }
  0xea   : > { %v626_v47 = vrot.slane %v624_v44, 7 }
  0xeb   : > { %v685_v49 = vsel %vm1206_vm14, %v613_v45, %v876_v42  ;;  %v688_v50 = vsel %vm1215_vm15, %v614_v46, %v878_v43 }
  0xec   : > { %877 = vst [vmem:[%s1113_s16 + $0x30] sm:$0xf] %v685_v49  ;;  %v629_v53 = vor.u32 %v627_v48, %v626_v47  ;;  %v630_v54 = vrot.slane %v626_v47, 4 }
  0xed   : > { %879 = vst [vmem:[%s1113_s16 + $0x34] sm:$0x1] %v688_v50 }
  0xee   : > { %v697_v55 = vsel %vm1206_vm14, %v629_v53, %v884_v51  ;;  %v700_v56 = vsel %vm1215_vm15, %v630_v54, %v886_v52 }
  0xef   : > { %885 = vst [vmem:[%s1113_s16 + $0x40] sm:$0xf] %v697_v55 }
  0xf0   : > { %887 = vst [vmem:[%s1113_s16 + $0x44] sm:$0x1] %v700_v56 }
  0xf1 PF: > { %s16_s25 = sadd.s32 1, %s1032_s25   ;;  %s1311_s21 = smov %s1024_s23 }
  0xf2   : > { %p13_p12 = scmp.ge.s32.totalorder %s16_s25, 22   ;;  %s1312_s22 = smov %s1028_s24 }
  0xf3   : > { %s1313_s23 = smov %s1316_s26  ;;  %s1314_s24 = smov %s1320_s27 }
  0xf4   :  { %15 = sbr.rel (!%p13_p12) target bundleno = 3 (0x3), region = 79 }

// kernel: residual_module_3d.3
= control target key start
LH: loop header
LB: loop body
LE: loop exit
PB: predicated region body
PF: predicated region fallthrough
CT: control target
= control target key end

     0   :  { %s8234_s17 = smov 0   ;;  %s8236_s18 = smov 0   ;;  %s10531_s0 = inlined_call_operand.vmem [shape: bf16[2,10,10,10,128], index: 0, kind: input, shape index: {}, may-alias: {0,1,2}]   ;;  %s10532_s1 = inlined_call_operand.vmem [shape: bf16[2,10,10,10,128], index: 1, kind: input, shape index: {}, may-alias: {0,1,2}]   ;;  %s10533_s2 = inlined_call_operand.vmem [shape: bf16[2,10,10,10,128], index: 2, kind: input, shape index: {}, may-alias: {0,1,2}]   ;;  %s10534_s3 = inlined_call_operand.vmem [shape: bf16[27,128,128], index: 3, kind: input, shape index: {}]   ;;  %s10535_s4 = inlined_call_operand.vmem [shape: f32[1,128], index: 4, kind: input, shape index: {}]   ;;  %s10536_s5 = inlined_call_operand.vmem [shape: f32[1,128], index: 5, kind: input, shape index: {}]   ;;  %s10537_s6 = inlined_call_operand.vmem [shape: bf16[128,128], index: 6, kind: input, shape index: {}]   ;;  %s10538_s7 = inlined_call_operand.vmem [shape: bf16[2,8,8,8,128], index: 7, kind: input, shape index: {}]   ;;  %s10539_s8 = inlined_call_operand.vmem [shape: f32[1,128], index: 8, kind: input, shape index: {}]   ;;  %s10540_s9 = inlined_call_operand.vmem [shape: f32[1,128], index: 9, kind: input, shape index: {}]   ;;  %s10541_s10 = inlined_call_operand.vmem [shape: bf16[128,128], index: 10, kind: input, shape index: {}]   ;;  %s10542_s11 = inlined_call_operand.vmem [shape: bf16[2,8,64,128], index: 11, kind: output, shape index: {}]  }
   0x1   :  { %s8238_s19 = smov 0   ;;  %s8240_s20 = smov 0  }
   0x2   :  { %s8242_s21 = smov 0  }
   0x3 LB: > { %s30_s22 = sadd.s32 1, %s8164_s19  ;;  %s33_s23 = sadd.s32 1, %s8168_s20  ;;  %s8172_s21 = sphi %s8242_s21, %s21_s21   ;;  %s8168_s20 = sphi %s8240_s20, %s10554_s20   ;;  %s8164_s19 = sphi %s8238_s19, %s10553_s19   ;;  %s8160_s18 = sphi %s8236_s18, %s10552_s18   ;;  %s8156_s17 = sphi %s8234_s17, %s10551_s17  }
   0x4   : > { %p31_p0 = scmp.ge.s32.totalorder %s30_s22, 8  ;;  %p5996_p1 = scmp.ge.s32.totalorder %s8172_s21, 1 }
   0x5   : > { %p413_p2 = scmp.lt.s32.totalorder %s8172_s21, 17 }
   0x6   : > { %s10556_s22 = smov (%p31_p0, %s30_s22), 0  ;;  %s10558_s23 = smov (!%p31_p0, %s33_s23), %s8168_s20 }
   0x7   : > { %p414_p3 = pnand %p5996_p1, %p413_p2  ;;  %p35_p4 = scmp.ge.s32.totalorder %s10558_s23, 2 }
   0x8   : > { %p490_p5 = scmp.lt.s32.totalorder (!%p414_p3), %s8160_s18, 1  ;;  %p492_p6 = scmp.lt.s32.totalorder (!%p414_p3), %s8156_s17, 9 }
   0x9   : > { %s10560_s23 = smov (%p35_p4, %s10558_s23), 0  ;;  %417 = sbr.rel (%p414_p3) target bundleno = 802 (0x322), region = 64 }
   0xa   : > { %10543 = sst [smem:[#allocation2_spill]] %s10560_s23  ;;  %s499_s30 = sadd.s32 (!%p414_p3), 1, %s8156_s17 }
   0xb   : > { %p8771_p7 = scmp.lt.s32.totalorder (!%p414_p3), %s499_s30, 9  ;;  %p523_p9 = scmp.lt.s32.totalorder (!%p414_p3), %s8156_s17, 7 }
   0xe   : > { %v7779_v0 = vld [vmem:[%s10534_s3 + $0x78] sm:$0xff]  ;;  %v7778_v1 = vld [vmem:[%s10534_s3 + $0x70] sm:$0xff]  ;;  %s10562_s18 = smov (!%p490_p5, %s8160_s18), 1  ;;  %v7777_v6 = vld [vmem:[%s10534_s3 + $0x68] sm:$0xff]  ;;  %vm571_vm0 = vsmask.f32 3328 }
   0xf   : > { %8070 = vmatpush.bf16.msra.mxu1 %v7779_v0  ;;  %767 = vmatpush.bf16.msra.mxu0 %v7779_v0  ;;  %v7787_v2 = vld [vmem:[%s10534_s3 + $0xb8] sm:$0xff]  ;;  %s493_s13 = scalar_select %p492_p6, %s8156_s17, 9  ;;  %v7786_v4 = vld [vmem:[%s10534_s3 + $0xb0] sm:$0xff]  ;;  %vm572_vm1 = vsmask.f32 7440  ;;  %v7776_v7 = vld [vmem:[%s10534_s3 + $0x60] sm:$0xff] }
  0x10   : > { %v7799_v3 = vld [vmem:[%s10534_s3 + $0xf8] sm:$0xff]  ;;  %1037 = vmatpush.bf16.msra.mxu2 %v7787_v2  ;;  %s8286_s16 = smul.u32 200, %s10562_s18  ;;  %v7798_v5 = vld [vmem:[%s10534_s3 + $0xf0] sm:$0xff]  ;;  %v7785_v8 = vld [vmem:[%s10534_s3 + $0xa8] sm:$0xff]  ;;  %vm921_vm3 = vcmask 1042432   ;;  %vm922_vm4 = vcmask 1046532  }
  0x11   : > { %1172 = vmatpush.bf16.msra.mxu3 %v7799_v3  ;;  %s8086_s24 = smul.u32 20, %s493_s13  ;;  %v7797_v9 = vld [vmem:[%s10534_s3 + $0xe8] sm:$0xff]  ;;  %v7784_v13 = vld [vmem:[%s10534_s3 + $0xa0] sm:$0xff]  ;;  %v7775_v19 = vld [vmem:[%s10534_s3 + $0x58] sm:$0xff]  ;;  %s10564_s30 = smov (!%p8771_p7, %s499_s30), 9 }
  0x12   : > { %v7796_v23 = vld [vmem:[%s10534_s3 + $0xe0] sm:$0xff]  ;;  %v7783_v39 = vld [vmem:[%s10534_s3 + $0x98] sm:$0xff]  ;;  %vm8344_vm2 = vmor %vm571_vm0, %vm572_vm1 }
  0x13   : > { %8071 = vmatpush.bf16.msra.mxu1 %v7778_v1  ;;  %768 = vmatpush.bf16.msra.mxu0 %v7778_v1  ;;  %s496_s29 = sadd.s32 %s8286_s16, %s8086_s24  ;;  %v7795_v49 = vld [vmem:[%s10534_s3 + $0xd8] sm:$0xff]  ;;  %v7774_v50 = vld [vmem:[%s10534_s3 + $0x50] sm:$0xff]  ;;  %vm8408_vm5 = vmor %vm921_vm3, %vm922_vm4 }
  0x14   : > { %1038 = vmatpush.bf16.msra.mxu2 %v7786_v4  ;;  %s5997_s15 = sshll.u32 %s496_s29, 2  ;;  %v7782_v62 = vld [vmem:[%s10534_s3 + $0x90] sm:$0xff]  ;;  %v7773_v4 = vld [vmem:[%s10534_s3 + $0x48] sm:$0xff]  ;;  %s8088_s29 = smul.u32 20, %s10564_s30 }
  0x15   : > { %s8304_s23 = scalar_lea.vmem %s10531_s0, %s5997_s15  ;;  %1173 = vmatpush.bf16.msra.mxu3 %v7798_v5  ;;  %v7794_v3 = vld [vmem:[%s10534_s3 + $0xd0] sm:$0xff] }
  0x16   : > { %v543_v10 = vld [vmem:[%s8304_s23 + $0x20] sm:$0xf]  ;;  %v544_v11 = vld [vmem:[%s8304_s23 + $0x28] sm:$0xf]  ;;  %v8312_v12 = vld [vmem:[%s8304_s23 + $0x24] sm:$0x1]  ;;  %s8818_s14 = sadd.s32 %s8088_s29, %s8286_s16 }
  0x17   : > { %8072 = vmatpush.bf16.msra.mxu1 %v7777_v6  ;;  %769 = vmatpush.bf16.msra.mxu0 %v7777_v6  ;;  %v8318_v14 = vld [vmem:[%s8304_s23 + $0x2c] sm:$0x1]  ;;  %v631_v15 = vshrl.u32 %v543_v10, 16  ;;  %v634_v16 = vshll.u32 %v543_v10, 16  ;;  %v640_v17 = vshll.u32 %v8312_v12, 16  ;;  %v645_v18 = vshrl.u32 %v544_v11, 16 }
  0x18   : > { %1039 = vmatpush.bf16.msra.mxu2 %v7785_v8  ;;  %v648_v20 = vshll.u32 %v544_v11, 16  ;;  %v539_v21 = vld [vmem:[%s8304_s23] sm:$0xf]  ;;  %v540_v22 = vld [vmem:[%s8304_s23 + $0x8] sm:$0xf]  ;;  %v654_v27 = vshll.u32 %v8318_v14, 16 }
  0x19   : > { %v633_v24 = vrot.slane %v631_v15, 4  ;;  %v636_v25 = vrot.slane %v634_v16, 5  ;;  %v647_v26 = vrot.slane %v645_v18, 4  ;;  %v8331_v28 = vld [vmem:[%s8304_s23 + $0x4] sm:$0x1]  ;;  %1174 = vmatpush.bf16.msra.mxu3 %v7797_v9  ;;  %v642_v29 = vrot.slane %v640_v17, 5 }
  0x1a   : > { %v650_v30 = vrot.slane %v648_v20, 5  ;;  %v8334_v31 = vld [vmem:[%s8304_s23 + $0xc] sm:$0x1]  ;;  %v575_v32 = vshrl.u32 %v539_v21, 16  ;;  %v578_v33 = vshll.u32 %v539_v21, 16  ;;  %v584_v35 = vshll.u32 %v8331_v28, 16 }
  0x1b   : > { %8073 = vmatpush.bf16.msra.mxu1 %v7776_v7  ;;  %770 = vmatpush.bf16.msra.mxu0 %v7776_v7  ;;  %v637_v34 = vor.u32 %v636_v25, %v633_v24  ;;  %v589_v36 = vshrl.u32 %v540_v22, 16  ;;  %v592_v37 = vshll.u32 %v540_v22, 16  ;;  %v598_v42 = vshll.u32 %v8334_v31, 16  ;;  %v545_v43 = vld [vmem:[%s8304_s23 + $0x30] sm:$0xf]  ;;  %v7772_v22 = vld [vmem:[%s10534_s3 + $0x40] sm:$0xff] }
  0x1c   : > { %v651_v38 = vor.u32 %v650_v30, %v647_v26  ;;  %1040 = vmatpush.bf16.msra.mxu2 %v7784_v13  ;;  %v577_v40 = vrot.slane %v575_v32, 4  ;;  %v580_v41 = vrot.slane %v578_v33, 5  ;;  %v656_v46 = vrot.slane %v654_v27, 5  ;;  %v8355_v54 = vld [vmem:[%s8304_s23 + $0x34] sm:$0x1]  ;;  %v7781_v13 = vld [vmem:[%s10534_s3 + $0x88] sm:$0xff] }
  0x1d   : > { %v638_v45 = vrot.slane %v637_v34, 4  ;;  %v591_v47 = vrot.slane %v589_v36, 4  ;;  %v594_v48 = vrot.slane %v592_v37, 5  ;;  %1175 = vmatpush.bf16.msra.mxu3 %v7796_v23  ;;  %v586_v53 = vrot.slane %v584_v35, 5  ;;  %v546_v57 = vld [vmem:[%s8304_s23 + $0x38] sm:$0xf] }
  0x1e   : > { %v652_v51 = vrot.slane %v651_v38, 4  ;;  %v581_v52 = vor.u32 %v580_v41, %v577_v40  ;;  %v600_v56 = vrot.slane %v598_v42, 5  ;;  %v659_v58 = vshrl.u32 %v545_v43, 16  ;;  %v897_v9 = vld [vmem:[%s8304_s23] sm:$0xe]  ;;  %v7771_v23 = vld [vmem:[%s10534_s3 + $0x38] sm:$0xff] }
  0x1f   : > { %8074 = vmatpush.bf16.msra.mxu1 %v7775_v19  ;;  %771 = vmatpush.bf16.msra.mxu0 %v7775_v19  ;;  %v595_v55 = vor.u32 %v594_v48, %v591_v47  ;;  %v662_v59 = vshll.u32 %v545_v43, 16  ;;  %v643_v60 = vsel %vm8344_vm2, %v638_v45, %v642_v29  ;;  %v668_v2 = vshll.u32 %v8355_v54, 16  ;;  %v8385_v15 = vld [vmem:[%s8304_s23 + $0x3c] sm:$0x1]  ;;  %v898_v20 = vld [vmem:[%s8304_s23 + $0x8] sm:$0xe] }
  0x20   : > { %1041 = vmatpush.bf16.msra.mxu2 %v7783_v39  ;;  %v582_v61 = vrot.slane %v581_v52, 4  ;;  %v657_v63 = vsel %vm8344_vm2, %v652_v51, %v656_v46  ;;  %v8365_v1 = vrot.slane %v659_v58, 4  ;;  %v673_v7 = vshrl.u32 %v546_v57, 16  ;;  %v541_v21 = vld [vmem:[%s8304_s23 + $0x10] sm:$0xf]  ;;  %v7793_v26 = vld [vmem:[%s10534_s3 + $0xc8] sm:$0xff] }
  0x21   : > { %v596_v0 = vrot.slane %v595_v55, 4  ;;  %1176 = vmatpush.bf16.msra.mxu3 %v7795_v49  ;;  %v664_v6 = vrot.slane %v662_v59, 5  ;;  %v676_v8 = vshll.u32 %v546_v57, 16  ;;  %v8377_v10 = vunpack.c.l.b16 %v643_v60  ;;  %v7807_v27 = vld [vmem:[%s10534_s3 + $0x138] sm:$0xff]  ;;  %v8417_v38 = vld [vmem:[%s8304_s23 + $0x14] sm:$0x1] }
  0x22   : > { %v587_v5 = vsel %vm8344_vm2, %v582_v61, %v586_v53  ;;  %v8387_v16 = vunpack.c.l.b16 %v657_v63  ;;  %v675_v18 = vrot.slane %v673_v7, 4  ;;  %v6102_v25 = vrot.slane %v897_v9, 9  ;;  %v542_v34 = vld [vmem:[%s8304_s23 + $0x18] sm:$0xf]  ;;  %v7780_v42 = vld [vmem:[%s10534_s3 + $0x80] sm:$0xff]  ;;  %v7770_v58 = vld [vmem:[%s10534_s3 + $0x30] sm:$0xff] }
  0x23   : > { %8075 = vmatpush.bf16.msra.mxu1 %v7774_v50  ;;  %772 = vmatpush.bf16.msra.mxu0 %v7774_v50  ;;  %v601_v11 = vsel %vm8344_vm2, %v596_v0, %v600_v56  ;;  %v8389_v17 = vunpack.c.l.b16 %v587_v5  ;;  %v678_v19 = vrot.slane %v676_v8, 5  ;;  %v665_v29 = vor.u32 %v664_v6, %v8365_v1  ;;  %v8427_v43 = vld [vmem:[%s8304_s23 + $0x1c] sm:$0x1]  ;;  %v7792_v49 = vld [vmem:[%s10534_s3 + $0xc0] sm:$0xff]  ;;  %v6184_v50 = vld [vmem:[%s8304_s23 + $0x8] sm:$0xf] }
  0x24   : > { %1042 = vmatpush.bf16.msra.mxu2 %v7782_v62  ;;  %v704_v24 = vunpack.c.l.b16 %v601_v11  ;;  %v8406_v30 = vrot.slane %v668_v2, 5  ;;  %v926_v33 = vrot.slane %v8331_v28, 5  ;;  %v682_v35 = vshll.u32 %v8385_v15, 16  ;;  %v7827_v56 = vld [vmem:[%s10534_s3 + $0x1b8] sm:$0xff]  ;;  %v7788_v57 = vld [vmem:[%s8304_s23 + $0xc] sm:$0xf0] }
  0x25   : > { %1177 = vmatpush.bf16.msra.mxu3 %v7794_v3  ;;  %v6103_v36 = vrot.slane %v898_v20, 9  ;;  %v930_v37 = vrot.slane %v8334_v31, 5  ;;  %v603_v39 = vshrl.u32 %v541_v21, 16  ;;  %v713_v40 = vpack.c.b16 %v8387_v16, %v8377_v10  ;;  %v7806_v59 = vld [vmem:[%s10534_s3 + $0x130] sm:$0xff]  ;;  %v6230_v7 = vld [vmem:[%s8304_s23 + $0x8] sm:$0xf] }
  0x26   : > { %v679_v41 = vor.u32 %v678_v19, %v675_v18  ;;  %v927_v28 = vsel %vm8408_vm5, %v6102_v25, %v926_v33  ;;  %v606_v31 = vshll.u32 %v541_v21, 16  ;;  %v711_v45 = vpack.c.b16 %v704_v24, %v8389_v17  ;;  %v899_v6 = vld [vmem:[%s8304_s23 + $0x10] sm:$0xe]  ;;  %v900_v10 = vld [vmem:[%s8304_s23 + $0x18] sm:$0xe]  ;;  %v7805_v16 = vld [vmem:[%s10534_s3 + $0x128] sm:$0xff] }
  0x27   : > { %8076 = vmatpush.bf16.msra.mxu1 %v7773_v4  ;;  %773 = vmatpush.bf16.msra.mxu0 %v7773_v4  ;;  %v931_v46 = vsel %vm8408_vm5, %v6103_v36, %v930_v37  ;;  %v973_v47 = vunpack.c.l.b16 %v927_v28  ;;  %v605_v48 = vrot.slane %v603_v39, 4  ;;  %v612_v53 = vshll.u32 %v8417_v38, 16  ;;  %v7826_v11 = vld [vmem:[%s10534_s3 + $0x1b0] sm:$0xff]  ;;  %v7804_v36 = vld [vmem:[%s10534_s3 + $0x120] sm:$0xff]  ;;  %s5998_s28 = sshll.u32 %s8818_s14, 2  ;;  %s510_s29 = sadd.s32 2, %s8156_s17 }
  0x28   : > { %1043 = vmatpush.bf16.msra.mxu2 %v7781_v13  ;;  %v974_v51 = vunpack.c.l.b16 %v931_v46  ;;  %v608_v52 = vrot.slane %v606_v31, 5  ;;  %v617_v55 = vshrl.u32 %v542_v34, 16  ;;  %v666_v60 = vrot.slane %v665_v29, 4  ;;  %v7769_v13 = vld [vmem:[%s10534_s3 + $0x28] sm:$0xff]  ;;  %v6232_v20 = vld [vmem:[%s8304_s23 + $0x10] sm:$0xf]  ;;  %s8849_s12 = scalar_lea.vmem %s10532_s1, %s5998_s28 }
  0x29   : > { %1178 = vmatpush.bf16.msra.mxu3 %v7793_v26  ;;  %v684_v61 = vrot.slane %v682_v35, 5  ;;  %v620_v62 = vshll.u32 %v542_v34, 16  ;;  %v626_v63 = vshll.u32 %v8427_v43, 16  ;;  %v680_v0 = vrot.slane %v679_v41, 4  ;;  %v7825_v34 = vld [vmem:[%s10534_s3 + $0x1a8] sm:$0xff]  ;;  %v7768_v35 = vld [vmem:[%s10534_s3 + $0x20] sm:$0xff] }
  0x2a   : > { %v981_v1 = vpack.c.b16 %v974_v51, %v973_v47  ;;  %v609_v2 = vor.u32 %v608_v52, %v605_v48  ;;  %v619_v3 = vrot.slane %v617_v55, 4  ;;  %v6185_v5 = vor.u32 %v7788_v57, %v6184_v50  ;;  %v8486_v46 = vld [vmem:[%s8304_s23 + $0xc] sm:$0x1]  ;;  %v7803_v50 = vld [vmem:[%s10534_s3 + $0x118] sm:$0xff]  ;;  %v8495_v51 = vld [vmem:[%s8304_s23 + $0x14] sm:$0x1] }
  0x2b   : > { %8077 = vmatpush.bf16.msra.mxu1 %v7772_v22  ;;  %774 = vmatpush.bf16.msra.mxu0 %v7772_v22  ;;  %v622_v4 = vrot.slane %v620_v62, 5  ;;  %v614_v9 = vrot.slane %v612_v53, 5  ;;  %v671_v17 = vsel %vm8344_vm2, %v666_v60, %v8406_v30  ;;  %v628_v19 = vrot.slane %v626_v63, 5  ;;  %v7789_v62 = vld [vmem:[%s8304_s23 + $0x1c] sm:$0xf0]  ;;  %v7766_v63 = vld [vmem:[%s10534_s3 + $0x10] sm:$0xff] }
  0x2c   : > { %1044 = vmatpush.bf16.msra.mxu2 %v7780_v42  ;;  %v610_v8 = vrot.slane %v609_v2, 4  ;;  %v685_v21 = vsel %vm8344_vm2, %v680_v0, %v684_v61  ;;  %v6104_v22 = vrot.slane %v899_v6, 9  ;;  %v1229_v24 = vshll.u32 %v6230_v7, 16  ;;  %v6188_v61 = vld [vmem:[%s8304_s23 + $0x18] sm:$0xf]  ;;  %v7802_v0 = vld [vmem:[%s10534_s3 + $0x110] sm:$0xff] }
  0x2d   : > { %1179 = vmatpush.bf16.msra.mxu3 %v7792_v49  ;;  %v623_v18 = vor.u32 %v622_v4, %v619_v3  ;;  %v934_v26 = vrot.slane %v8417_v38, 5  ;;  %v938_v29 = vrot.slane %v8427_v43, 5  ;;  %v1240_v33 = vshrl.u32 %v6232_v20, 16  ;;  %v7767_v49 = vld [vmem:[%s10534_s3 + $0x18] sm:$0xff]  ;;  %v7824_v6 = vld [vmem:[%s10534_s3 + $0x1a0] sm:$0xff]  ;;  %p9358_p8 = scmp.lt.s32.totalorder %s510_s29, 9 }
  0x2e   : > { %785 = vmatmul.bf16.vlgmr.msra.gmra.mxu1 %v713_v40  ;;  %775 = vmatmul.bf16.vlgmr.msra.gmra.mxu0 %v711_v45  ;;  %v615_v30 = vsel %vm8344_vm2, %v610_v8, %v614_v9  ;;  %v1243_v38 = vshll.u32 %v6232_v20, 16  ;;  %v709_v39 = vunpack.c.l.b16 %v671_v17  ;;  %v710_v40 = vunpack.c.l.b16 %v685_v21  ;;  %v6234_v4 = vld [vmem:[%s8304_s23 + $0x18] sm:$0xf]  ;;  %s10568_s17 = smov (!%p523_p9, %s8156_s17), 7 }
  0x2f   : > { %868 = vmatpush.bf16.msrb.mxu1 %v7771_v23  ;;  %1418 = vmatpush.bf16.msrb.mxu0 %v7807_v27  ;;  %v1226_v23 = vshrl.u32 %v6230_v7, 16  ;;  %v624_v25 = vrot.slane %v623_v18, 4  ;;  %v6105_v27 = vrot.slane %v900_v10, 9  ;;  %v1231_v42 = vrot.slane %v1229_v24, 5  ;;  %v6236_v7 = vld [vmem:[%s8304_s23 + $0x20] sm:$0xf] }
  0x30   : > { %1727 = vmatpush.bf16.msrb.mxu2 %v7827_v56  ;;  %1180 = vmatmul.bf16.vlgmr.msra.gmra.mxu3 %v6185_v5  ;;  %v705_v28 = vunpack.c.l.b16 %v615_v30  ;;  %v935_v31 = vsel %vm8408_vm5, %v6104_v22, %v934_v26  ;;  %v1242_v47 = vrot.slane %v1240_v33, 4  ;;  %v1245_v48 = vrot.slane %v1243_v38, 5  ;;  %v901_v10 = vld [vmem:[%s8304_s23 + $0x20] sm:$0xe]  ;;  %v7835_v18 = vld [vmem:[%s10534_s3 + $0x1f8] sm:$0xff]  ;;  %s10566_s29 = smov (!%p9358_p8, %s510_s29), 9 }
  0x31   : > { %1045 = vmatmul.bf16.vlgmr.msra.gmra.mxu2 %v981_v1  ;;  %v629_v37 = vsel %vm8344_vm2, %v624_v25, %v628_v19  ;;  %v1228_v41 = vrot.slane %v1226_v23, 4  ;;  %v939_v45 = vsel %vm8408_vm5, %v6105_v27, %v938_v29  ;;  %v975_v52 = vunpack.c.l.b16 %v935_v31  ;;  %v7823_v27 = vld [vmem:[%s10534_s3 + $0x198] sm:$0xff]  ;;  %1973 = vmatpush.bf16.msrb.mxu3 %v7835_v18  ;;  %v7760_v38 = vld [vmem:[%s8304_s23 + $0x4] sm:$0xf0]  ;;  %s8089_s14 = smul.u32 20, %s10566_s29 }
  0x32   : > { %v706_v43 = vunpack.c.l.b16 %v629_v37  ;;  %v976_v53 = vunpack.c.l.b16 %v939_v45  ;;  %v1235_v56 = vshll.u32 %v8486_v46, 16  ;;  %v714_v57 = vpack.c.b16 %v710_v40, %v709_v39  ;;  %v7815_v30 = vld [vmem:[%s10534_s3 + $0x178] sm:$0xff]  ;;  %v6056_v37 = vld [vmem:[%s8304_s23] sm:$0xf]  ;;  %v7814_v45 = vld [vmem:[%s10534_s3 + $0x170] sm:$0xff] }
  0x33   : > { %869 = vmatpush.bf16.msrb.mxu1 %v7770_v58  ;;  %1419 = vmatpush.bf16.msrb.mxu0 %v7806_v59  ;;  %v1232_v55 = vor.u32 %v1231_v42, %v1228_v41  ;;  %v1246_v59 = vor.u32 %v1245_v48, %v1242_v47  ;;  %v1249_v60 = vshll.u32 %v8495_v51, 16  ;;  %v6189_v5 = vor.u32 %v7789_v62, %v6188_v61  ;;  %v6240_v61 = vld [vmem:[%s8304_s23 + $0x30] sm:$0xf]  ;;  %s9484_s30 = sadd.s32 %s8089_s14, %s8286_s16 }
  0x34   : > { %1728 = vmatpush.bf16.msrb.mxu2 %v7826_v11  ;;  %v712_v58 = vpack.c.b16 %v706_v43, %v705_v28  ;;  %v982_v1 = vpack.c.b16 %v976_v53, %v975_v52  ;;  %v1237_v3 = vrot.slane %v1235_v56, 5  ;;  %v902_v11 = vld [vmem:[%s8304_s23 + $0x28] sm:$0xe]  ;;  %v1254_v17 = vshrl.u32 %v6234_v4, 16  ;;  %v8548_v28 = vld [vmem:[%s8304_s23 + $0x1c] sm:$0x1] }
  0x35   : > { %v1233_v2 = vrot.slane %v1232_v55, 4  ;;  %v1247_v8 = vrot.slane %v1246_v59, 4  ;;  %v1251_v9 = vrot.slane %v1249_v60, 5  ;;  %v1257_v20 = vshll.u32 %v6234_v4, 16  ;;  %v8551_v43 = vld [vmem:[%s8304_s23 + $0x24] sm:$0x1] }
  0x36   : > { %v1268_v21 = vshrl.u32 %v6236_v7, 16  ;;  %v1271_v22 = vshll.u32 %v6236_v7, 16  ;;  %v6106_v23 = vrot.slane %v901_v10, 9  ;;  %v942_v24 = vrot.slane %v8312_v12, 5  ;;  %v7764_v12 = vld [vmem:[%s10534_s3] sm:$0xff]  ;;  %v7843_v7 = vld [vmem:[%s10534_s3 + $0x238] sm:$0xff] }
  0x37   : > { %870 = vmatpush.bf16.msrb.mxu1 %v7769_v13  ;;  %1420 = vmatpush.bf16.msrb.mxu0 %v7805_v16  ;;  %v7765_v13 = vld [vmem:[%s10534_s3 + $0x8] sm:$0xff]  ;;  %v1238_v19 = vsel %vm8344_vm2, %v1233_v2, %v1237_v3  ;;  %v6107_v25 = vrot.slane %v902_v11, 9  ;;  %v946_v26 = vrot.slane %v8318_v14, 5  ;;  %v1252_v29 = vsel %vm8344_vm2, %v1247_v8, %v1251_v9  ;;  %v7800_v14 = vld [vmem:[%s10534_s3 + $0x100] sm:$0xff]  ;;  %v7834_v2 = vld [vmem:[%s10534_s3 + $0x1f0] sm:$0xff]  ;;  %s5999_s16 = sshll.u32 %s9484_s30, 2 }
  0x38   : > { %1729 = vmatpush.bf16.msrb.mxu2 %v7825_v34  ;;  %v7801_v16 = vld [vmem:[%s10534_s3 + $0x108] sm:$0xff]  ;;  %v1354_v33 = vunpack.c.l.b16 %v1238_v19  ;;  %v1256_v34 = vrot.slane %v1254_v17, 4  ;;  %v1355_v39 = vunpack.c.l.b16 %v1252_v29  ;;  %v943_v40 = vsel %vm8408_vm5, %v6106_v23, %v942_v24  ;;  %v7822_v3 = vld [vmem:[%s10534_s3 + $0x190] sm:$0xff]  ;;  %1974 = vmatpush.bf16.msrb.mxu3 %v7834_v2  ;;  %v7812_v17 = vld [vmem:[%s10534_s3 + $0x160] sm:$0xff]  ;;  %s9529_s15 = scalar_lea.vmem %s10533_s2, %s5999_s16  ;;  %s6000_s16 = sshll.u32 %s10568_s17, 3 }
  0x39   : > { %v947_v41 = vsel %vm8408_vm5, %v6107_v25, %v946_v26  ;;  %v1273_v42 = vrot.slane %v1271_v22, 5  ;;  %v6057_v31 = vor.u32 %v7760_v38, %v6056_v37  ;;  %v977_v47 = vunpack.c.l.b16 %v943_v40  ;;  %v6192_v56 = vld [vmem:[%s8304_s23 + $0x28] sm:$0xf]  ;;  %v7842_v22 = vld [vmem:[%s10534_s3 + $0x230] sm:$0xff]  ;;  %v7811_v29 = vld [vmem:[%s10534_s3 + $0x158] sm:$0xff] }
  0x3a   : > { %v978_v48 = vunpack.c.l.b16 %v947_v41  ;;  %v1263_v52 = vshll.u32 %v8548_v28, 16  ;;  %v1277_v55 = vshll.u32 %v8551_v43, 16  ;;  %v6238_v60 = vld [vmem:[%s8304_s23 + $0x28] sm:$0xf]  ;;  %v1296_v10 = vshrl.u32 %v6240_v61, 16 }
  0x3b   : > { %871 = vmatpush.bf16.msrb.mxu1 %v7768_v35  ;;  %1421 = vmatpush.bf16.msrb.mxu0 %v7804_v36  ;;  %v1259_v35 = vrot.slane %v1257_v20, 5  ;;  %v1270_v36 = vrot.slane %v1268_v21, 4  ;;  %v1282_v8 = vshrl.u32 %v6238_v60, 16  ;;  %v1285_v9 = vshll.u32 %v6238_v60, 16  ;;  %v6060_v37 = vld [vmem:[%s8304_s23 + $0x10] sm:$0xf] }
  0x3c   : > { %1730 = vmatpush.bf16.msrb.mxu2 %v7824_v6  ;;  %v983_v59 = vpack.c.b16 %v978_v48, %v977_v47  ;;  %v1279_v4 = vrot.slane %v1277_v55, 5  ;;  %v904_v6 = vld [vmem:[%s8304_s23 + $0x38] sm:$0xe]  ;;  %v1299_v11 = vshll.u32 %v6240_v61, 16  ;;  %v950_v19 = vrot.slane %v8355_v54, 5  ;;  %v7810_v48 = vld [vmem:[%s10534_s3 + $0x150] sm:$0xff] }
  0x3d   : > { %v1274_v53 = vor.u32 %v1273_v42, %v1270_v36  ;;  %v6109_v20 = vrot.slane %v904_v6, 9  ;;  %v954_v21 = vrot.slane %v8385_v15, 5  ;;  %v1284_v25 = vrot.slane %v1282_v8, 4  ;;  %v7832_v15 = vld [vmem:[%s10534_s3 + $0x1e0] sm:$0xff]  ;;  %v7841_v36 = vld [vmem:[%s10534_s3 + $0x228] sm:$0xff]  ;;  %v7831_v42 = vld [vmem:[%s10534_s3 + $0x1d8] sm:$0xff] }
  0x3e   : > { %790 = vmatmul.bf16.gmra.mxu1 %v714_v57  ;;  %780 = vmatmul.bf16.gmra.mxu0 %v712_v58  ;;  %v7790_v57 = vld [vmem:[%s8304_s23 + $0x2c] sm:$0xf0]  ;;  %v7813_v58 = vld [vmem:[%s10534_s3 + $0x168] sm:$0xff]  ;;  %v1287_v26 = vrot.slane %v1285_v9, 5  ;;  %v1298_v54 = vrot.slane %v1296_v10, 4  ;;  %v7820_v61 = vld [vmem:[%s10534_s3 + $0x180] sm:$0xff] }
  0x3f   : > { %872 = vmatpush.bf16.msrb.mxu1 %v7767_v49  ;;  %1422 = vmatpush.bf16.msrb.mxu0 %v7803_v50  ;;  %v1362_v49 = vpack.c.b16 %v1355_v39, %v1354_v33  ;;  %v1260_v50 = vor.u32 %v1259_v35, %v1256_v34  ;;  %v955_v34 = vsel %vm8408_vm5, %v6109_v20, %v954_v21  ;;  %v8608_v35 = vld [vmem:[%s8304_s23 + $0x34] sm:$0x1]  ;;  %v7761_v38 = vld [vmem:[%s8304_s23 + $0x14] sm:$0xf0]  ;;  %v7791_v55 = vld [vmem:[%s8304_s23 + $0x3c] sm:$0xf0] }
  0x40   : > { %1185 = vmatmul.bf16.gmra.mxu3 %v6189_v5  ;;  %1731 = vmatpush.bf16.msrb.mxu2 %v7823_v27  ;;  %v903_v5 = vld [vmem:[%s8304_s23 + $0x30] sm:$0xe]  ;;  %v1301_v27 = vrot.slane %v1299_v11, 5  ;;  %v1288_v39 = vor.u32 %v1287_v26, %v1284_v25  ;;  %v1305_v47 = vshll.u32 %v8608_v35, 16  ;;  %v7809_v2 = vld [vmem:[%s10534_s3 + $0x148] sm:$0xff]  ;;  %v1485_v6 = vrot.slane %v8495_v51, 5 }
  0x41   : > { %1050 = vmatmul.bf16.gmra.mxu2 %v982_v1  ;;  %v1261_v62 = vrot.slane %v1260_v50, 4  ;;  %v6193_v1 = vor.u32 %v7790_v57, %v6192_v56  ;;  %v6108_v18 = vrot.slane %v903_v5, 9  ;;  %v1481_v5 = vrot.slane %v8486_v46, 5  ;;  %v7829_v9 = vld [vmem:[%s10534_s3 + $0x1c8] sm:$0xff]  ;;  %v7839_v46 = vld [vmem:[%s10534_s3 + $0x218] sm:$0xff] }
  0x42   : > { %v1302_v41 = vor.u32 %v1301_v27, %v1298_v54  ;;  %v1289_v56 = vrot.slane %v1288_v39, 4  ;;  %v1307_v60 = vrot.slane %v1305_v47, 5  ;;  %v8664_v20 = vld [vmem:[%s8304_s23 + $0x14] sm:$0x1]  ;;  %v6432_v21 = vld [vmem:[%s8304_s23 + $0x18] sm:$0xf] }
  0x43   : > { %873 = vmatpush.bf16.msrb.mxu1 %v7766_v63  ;;  %1423 = vmatpush.bf16.msrb.mxu0 %v7802_v0  ;;  %v1265_v63 = vrot.slane %v1263_v52, 5  ;;  %v1275_v0 = vrot.slane %v1274_v53, 4  ;;  %v951_v33 = vsel %vm8408_vm5, %v6108_v18, %v950_v19  ;;  %v6242_v52 = vld [vmem:[%s8304_s23 + $0x38] sm:$0xf]  ;;  %v6430_v18 = vld [vmem:[%s8304_s23 + $0x10] sm:$0xf] }
  0x44   : > { %1732 = vmatpush.bf16.msrb.mxu2 %v7822_v3  ;;  %v6196_v53 = vld [vmem:[%s8304_s23 + $0x38] sm:$0xf]  ;;  %v7830_v3 = vld [vmem:[%s10534_s3 + $0x1d0] sm:$0xff]  ;;  %v6064_v19 = vld [vmem:[%s8304_s23 + $0x20] sm:$0xf]  ;;  %v1784_v25 = vshll.u32 %v6430_v18, 16 }
  0x45   : > { %v1266_v23 = vsel %vm8344_vm2, %v1261_v62, %v1265_v63  ;;  %v1280_v24 = vsel %vm8344_vm2, %v1275_v0, %v1279_v4  ;;  %v6244_v62 = vld [vmem:[%s8304_s23 + $0x40] sm:$0xf]  ;;  %v1310_v63 = vshrl.u32 %v6242_v52, 16  ;;  %v1313_v0 = vshll.u32 %v6242_v52, 16 }
  0x46   : > { %v7840_v4 = vld [vmem:[%s10534_s3 + $0x220] sm:$0xff]  ;;  %v1327_v8 = vshll.u32 %v6244_v62, 16  ;;  %v1790_v26 = vshll.u32 %v8664_v20, 16  ;;  %v1795_v54 = vshrl.u32 %v6432_v21, 16 }
  0x47   : > { %874 = vmatpush.bf16.msrb.mxu1 %v7765_v13  ;;  %1424 = vmatpush.bf16.msrb.mxu0 %v7801_v16  ;;  %v7833_v13 = vld [vmem:[%s10534_s3 + $0x1e8] sm:$0xff]  ;;  %v8651_v11 = vrot.slane %v1310_v63, 4 }
  0x48   : > { %v7821_v16 = vld [vmem:[%s10534_s3 + $0x188] sm:$0xff]  ;;  %1975 = vmatpush.bf16.msrb.mxu3 %v7833_v13  ;;  %v8653_v13 = vrot.slane %v1313_v0, 5  ;;  %v1797_v39 = vrot.slane %v1795_v54, 4  ;;  %v1493_v54 = vrot.slane %v8551_v43, 5 }
  0x49   : > { %1733 = vmatpush.bf16.msrb.mxu2 %v7821_v16  ;;  %v7808_v16 = vld [vmem:[%s10534_s3 + $0x140] sm:$0xff] }
  0x4b   : > { %875 = vmatpush.bf16.msrb.mxu1 %v7764_v12  ;;  %1425 = vmatpush.bf16.msrb.mxu0 %v7800_v14  ;;  %v8601_v12 = vld [vmem:[%s8304_s23 + $0x2c] sm:$0x1]  ;;  %v1356_v14 = vunpack.c.l.b16 %v1266_v23  ;;  %v7762_v23 = vld [vmem:[%s8304_s23 + $0x24] sm:$0xf0] }
  0x4c   : > { %v1291_v40 = vshll.u32 %v8601_v12, 16  ;;  %1976 = vmatpush.bf16.msrb.mxu3 %v7832_v15 }
  0x4d   : > { %1734 = vmatpush.bf16.msrb.mxu2 %v7820_v61 }
  0x4e   : > { %876 = vmatmul.bf16.vlgmr.msrb.gmra.mxu1 %v6057_v31  ;;  %1426 = vmatmul.bf16.vlgmr.msrb.gmra.mxu0 %v1362_v49  ;;  %v979_v31 = vunpack.c.l.b16 %v951_v33  ;;  %v6061_v49 = vor.u32 %v7761_v38, %v6060_v37  ;;  %v1293_v57 = vrot.slane %v1291_v40, 5  ;;  %v1786_v38 = vrot.slane %v1784_v25, 5  ;;  %v6295_v40 = vld [vmem:[%s8304_s23 + $0x10] sm:$0xe]  ;;  %v6434_v25 = vld [vmem:[%s8304_s23 + $0x20] sm:$0xf] }
  0x4f   : > { %1592 = vmatpush.bf16.msra.mxu1 %v7815_v30  ;;  %2147 = vmatpush.bf16.msra.mxu0 %v7843_v7  ;;  %v1357_v30 = vunpack.c.l.b16 %v1280_v24  ;;  %v1324_v7 = vshrl.u32 %v6244_v62, 16  ;;  %v1781_v24 = vshrl.u32 %v6430_v18, 16  ;;  %v6303_v47 = vrot.slane %v6295_v40, 9  ;;  %v7836_v18 = vld [vmem:[%s10534_s3 + $0x200] sm:$0xff] }
  0x50   : > { %1190 = vmatmul.bf16.gmra.mxu3 %v6193_v1  ;;  %v6197_v1 = vor.u32 %v7791_v55, %v6196_v53  ;;  %v1294_v51 = vsel %vm8344_vm2, %v1289_v56, %v1293_v57  ;;  %v1792_v53 = vrot.slane %v1790_v26, 5  ;;  %v7837_v57 = vld [vmem:[%s10534_s3 + $0x208] sm:$0xff]  ;;  %v8721_v26 = vld [vmem:[%s8304_s23 + $0x24] sm:$0x1] }
  0x51   : > { %1055 = vmatmul.bf16.gmra.mxu2 %v983_v59  ;;  %v1363_v50 = vpack.c.b16 %v1357_v30, %v1356_v14  ;;  %1977 = vmatpush.bf16.msrb.mxu3 %v7831_v42  ;;  %v1358_v27 = vunpack.c.l.b16 %v1294_v51  ;;  %v7838_v14 = vld [vmem:[%s10534_s3 + $0x210] sm:$0xff]  ;;  %v1798_v30 = vshll.u32 %v6432_v21, 16  ;;  %v1783_v37 = vrot.slane %v1781_v24, 4 }
  0x52   : > { %v1329_v42 = vrot.slane %v1327_v8, 5  ;;  %v7862_v21 = vld [vmem:[%s10534_s3 + $0x2b0] sm:$0xff]  ;;  %v1818_v43 = vshll.u32 %v8721_v26, 16 }
  0x53   : > { %1593 = vmatpush.bf16.msra.mxu1 %v7814_v45  ;;  %2148 = vmatpush.bf16.msra.mxu0 %v7842_v22  ;;  %v980_v45 = vunpack.c.l.b16 %v955_v34  ;;  %v8668_v22 = vld [vmem:[%s8304_s23 + $0x1c] sm:$0x1]  ;;  %v6294_v34 = vld [vmem:[%s8304_s23 + $0x8] sm:$0xe]  ;;  %v1787_v52 = vor.u32 %v1786_v38, %v1783_v37  ;;  %v7854_v24 = vld [vmem:[%s10534_s3 + $0x270] sm:$0xff] }
  0x54   : > { %v1804_v33 = vshll.u32 %v8668_v22, 16  ;;  %v6296_v37 = vld [vmem:[%s8304_s23 + $0x18] sm:$0xe] }
  0x55   : > { %v984_v59 = vpack.c.b16 %v980_v45, %v979_v31  ;;  %1978 = vmatpush.bf16.msrb.mxu3 %v7830_v3  ;;  %v1800_v31 = vrot.slane %v1798_v30, 5  ;;  %v6302_v45 = vrot.slane %v6294_v34, 9  ;;  %v1788_v61 = vrot.slane %v1787_v52, 4 }
  0x56   : > { %v1806_v56 = vrot.slane %v1804_v33, 5  ;;  %v7861_v33 = vld [vmem:[%s10534_s3 + $0x2a8] sm:$0xff] }
  0x57   : > { %1594 = vmatpush.bf16.msra.mxu1 %v7813_v58  ;;  %2149 = vmatpush.bf16.msra.mxu0 %v7841_v36  ;;  %v1303_v58 = vrot.slane %v1302_v41, 4  ;;  %v1326_v36 = vrot.slane %v1324_v7, 4  ;;  %v8682_v41 = vld [vmem:[%s8304_s23 + $0x3c] sm:$0x1]  ;;  %v1801_v55 = vor.u32 %v1800_v31, %v1797_v39  ;;  %v1793_v8 = vsel %vm8344_vm2, %v1788_v61, %v1792_v53  ;;  %v6068_v61 = vld [vmem:[%s8304_s23 + $0x30] sm:$0xf] }
  0x58   : > { %v6304_v31 = vrot.slane %v6296_v37, 9 }
  0x59   : > { %v1308_v10 = vsel %vm8344_vm2, %v1303_v58, %v1307_v60  ;;  %1979 = vmatpush.bf16.msrb.mxu3 %v7829_v9  ;;  %v1482_v58 = vsel %vm8408_vm5, %v6302_v45, %v1481_v5  ;;  %v1319_v60 = vshll.u32 %v8682_v41, 16  ;;  %v1330_v3 = vor.u32 %v1329_v42, %v1326_v36  ;;  %v6297_v42 = vld [vmem:[%s8304_s23 + $0x20] sm:$0xe] }
  0x5a   : > { %v1359_v15 = vunpack.c.l.b16 %v1308_v10  ;;  %v1528_v62 = vunpack.c.l.b16 %v1482_v58  ;;  %v1802_v7 = vrot.slane %v1801_v55, 4  ;;  %v1820_v55 = vrot.slane %v1818_v43, 5  ;;  %v8786_v43 = vld [vmem:[%s8304_s23 + $0x3c] sm:$0x1] }
  0x5b   : > { %1595 = vmatpush.bf16.msra.mxu1 %v7812_v17  ;;  %2150 = vmatpush.bf16.msra.mxu0 %v7840_v4  ;;  %v7863_v17 = vld [vmem:[%s10534_s3 + $0x2b8] sm:$0xff]  ;;  %v1321_v10 = vrot.slane %v1319_v60, 5 }
  0x5c   : > { %2527 = vmatpush.bf16.msra.mxu2 %v7863_v17  ;;  %v1364_v0 = vpack.c.b16 %v1359_v15, %v1358_v27  ;;  %v1807_v5 = vsel %vm8344_vm2, %v1802_v7, %v1806_v56  ;;  %v7855_v17 = vld [vmem:[%s10534_s3 + $0x278] sm:$0xff]  ;;  %v6436_v15 = vld [vmem:[%s8304_s23 + $0x28] sm:$0xf] }
  0x5d   : > { %v1823_v34 = vshrl.u32 %v6436_v15, 16  ;;  %v1826_v36 = vshll.u32 %v6436_v15, 16 }
  0x5e   : > { %881 = vmatmul.bf16.gmra.mxu1 %v6061_v49  ;;  %1431 = vmatmul.bf16.gmra.mxu0 %v1363_v50  ;;  %v8685_v49 = vld [vmem:[%s8304_s23 + $0x44] sm:$0x1]  ;;  %v1316_v50 = vor.u32 %v8653_v13, %v8651_v11  ;;  %v1910_v11 = vunpack.c.l.b16 %v1807_v5  ;;  %v1331_v13 = vrot.slane %v1330_v3, 4  ;;  %v7817_v5 = vld [vmem:[%s8304_s23 + $0x24] sm:$0xf0] }
  0x5f   : > { %1596 = vmatpush.bf16.msra.mxu1 %v7811_v29  ;;  %2151 = vmatpush.bf16.msra.mxu0 %v7839_v46  ;;  %v7828_v29 = vld [vmem:[%s10534_s3 + $0x1c0] sm:$0xff]  ;;  %v1333_v4 = vshll.u32 %v8685_v49, 16 }
  0x60   : > { %1195 = vmatmul.bf16.gmra.mxu3 %v6197_v1  ;;  %v6384_v1 = vld [vmem:[%s8304_s23 + $0x10] sm:$0xf]  ;;  %v1317_v51 = vrot.slane %v1316_v50, 4  ;;  %2528 = vmatpush.bf16.msra.mxu2 %v7862_v21  ;;  %v6305_v50 = vrot.slane %v6297_v42, 9  ;;  %v1860_v42 = vshll.u32 %v8786_v43, 16 }
  0x61   : > { %1060 = vmatmul.bf16.gmra.mxu2 %v984_v59  ;;  %1980 = vmatpush.bf16.msrb.mxu3 %v7828_v29  ;;  %v1486_v59 = vsel %vm8408_vm5, %v6303_v47, %v1485_v6  ;;  %v1909_v6 = vunpack.c.l.b16 %v1793_v8  ;;  %v8728_v29 = vld [vmem:[%s8304_s23 + $0x2c] sm:$0x1]  ;;  %v1825_v47 = vrot.slane %v1823_v34, 4  ;;  %v6388_v8 = vld [vmem:[%s8304_s23 + $0x20] sm:$0xf] }
  0x62   : > { %v1529_v63 = vunpack.c.l.b16 %v1486_v59  ;;  %v1322_v27 = vsel %vm8344_vm2, %v1317_v51, %v1321_v10  ;;  %v1832_v40 = vshll.u32 %v8728_v29, 16  ;;  %v1494_v59 = vsel %vm8408_vm5, %v6305_v50, %v1493_v54  ;;  %v6494_v51 = vld [vmem:[%s8304_s23 + $0x10] sm:$0xe]  ;;  %v6495_v10 = vld [vmem:[%s8304_s23 + $0x18] sm:$0xe] }
  0x63   : > { %1597 = vmatpush.bf16.msra.mxu1 %v7810_v48  ;;  %v6065_v48 = vor.u32 %v7762_v23, %v6064_v19  ;;  %2152 = vmatpush.bf16.msra.mxu0 %v7838_v14  ;;  %v1917_v19 = vpack.c.b16 %v1910_v11, %v1909_v6  ;;  %v1489_v23 = vrot.slane %v8548_v28, 5  ;;  %v1809_v28 = vshrl.u32 %v6434_v25, 16 }
  0x64   : > { %v8702_v9 = vpack.c.b16 %v1529_v63, %v1528_v62  ;;  %v1812_v14 = vshll.u32 %v6434_v25, 16  ;;  %v1360_v45 = vunpack.c.l.b16 %v1322_v27  ;;  %2529 = vmatpush.bf16.msra.mxu2 %v7861_v33  ;;  %v1834_v58 = vrot.slane %v1832_v40, 5  ;;  %v7763_v62 = vld [vmem:[%s8304_s23 + $0x34] sm:$0xf0]  ;;  %v6438_v25 = vld [vmem:[%s8304_s23 + $0x30] sm:$0xf] }
  0x65   : > { %v1811_v38 = vrot.slane %v1809_v28, 4  ;;  %v1490_v56 = vsel %vm8408_vm5, %v6304_v31, %v1489_v23  ;;  %v7853_v23 = vld [vmem:[%s10534_s3 + $0x268] sm:$0xff]  ;;  %v1837_v54 = vshrl.u32 %v6438_v25, 16  ;;  %v1840_v27 = vshll.u32 %v6438_v25, 16  ;;  %v8783_v33 = vld [vmem:[%s8304_s23 + $0x34] sm:$0x1] }
  0x66   : > { %v1814_v39 = vrot.slane %v1812_v14, 5  ;;  %v1530_v60 = vunpack.c.l.b16 %v1490_v56 }
  0x67   : > { %1598 = vmatpush.bf16.msra.mxu1 %v7809_v2  ;;  %v7816_v2 = vld [vmem:[%s8304_s23 + $0x14] sm:$0xf0]  ;;  %2153 = vmatpush.bf16.msra.mxu0 %v7837_v57  ;;  %v1842_v37 = vrot.slane %v1840_v27, 5 }
  0x68   : > { %v6385_v46 = vor.u32 %v7816_v2, %v6384_v1  ;;  %v1815_v53 = vor.u32 %v1814_v39, %v1811_v38  ;;  %v1846_v38 = vshll.u32 %v8783_v33, 16 }
  0x6a   : > { %v1816_v63 = vrot.slane %v1815_v53, 4  ;;  %v6298_v53 = vld [vmem:[%s8304_s23 + $0x28] sm:$0xe] }
  0x6b   : > { %1599 = vmatpush.bf16.msra.mxu1 %v7808_v16  ;;  %v1335_v16 = vrot.slane %v1333_v4, 5  ;;  %2154 = vmatpush.bf16.msra.mxu0 %v7836_v18  ;;  %v6069_v4 = vor.u32 %v7763_v62, %v6068_v61  ;;  %v6502_v18 = vrot.slane %v6494_v51, 9  ;;  %v1501_v61 = vrot.slane %v8608_v35, 5 }
  0x6c   : > { %v1821_v2 = vsel %vm8344_vm2, %v1816_v63, %v1820_v55  ;;  %v6299_v55 = vld [vmem:[%s8304_s23 + $0x30] sm:$0xe]  ;;  %v6496_v63 = vld [vmem:[%s8304_s23 + $0x20] sm:$0xe] }
  0x6d   : > { %v1336_v30 = vsel %vm8344_vm2, %v1331_v13, %v1335_v16  ;;  %v2036_v13 = vrot.slane %v8664_v20, 5  ;;  %v6389_v16 = vor.u32 %v7817_v5, %v6388_v8  ;;  %v7852_v20 = vld [vmem:[%s10534_s3 + $0x260] sm:$0xff] }
  0x6e   : > { %886 = vmatmul.bf16.gmra.mxu1 %v6065_v48  ;;  %1436 = vmatmul.bf16.gmra.mxu0 %v1364_v0  ;;  %v1828_v48 = vrot.slane %v1826_v36, 5  ;;  %v1361_v52 = vunpack.c.l.b16 %v1336_v30  ;;  %v1531_v0 = vunpack.c.l.b16 %v1494_v59  ;;  %v7859_v30 = vld [vmem:[%s10534_s3 + $0x298] sm:$0xff]  ;;  %v1839_v36 = vrot.slane %v1837_v54, 4 }
  0x6f   : > { %2281 = vmatpush.bf16.msrb.mxu1 %v7855_v17  ;;  %v2040_v17 = vrot.slane %v8668_v22, 5  ;;  %v6440_v22 = vld [vmem:[%s8304_s23 + $0x38] sm:$0xf]  ;;  %v2037_v28 = vsel %vm8408_vm5, %v6502_v18, %v2036_v13  ;;  %v6307_v59 = vrot.slane %v6299_v55, 9 }
  0x70   : > { %1981 = vmatmul.bf16.vlgmr.msrb.gmra.mxu3 %v1917_v19  ;;  %v1829_v57 = vor.u32 %v1828_v48, %v1825_v47  ;;  %v8747_v3 = vpack.c.b16 %v1531_v0, %v1530_v60  ;;  %v1365_v7 = vpack.c.b16 %v1361_v52, %v1360_v45  ;;  %v6503_v19 = vrot.slane %v6495_v10, 9 }
  0x71   : > { %1735 = vmatmul.bf16.vlgmr.msrb.gmra.mxu2 %v6385_v46  ;;  %v1911_v46 = vunpack.c.l.b16 %v1821_v2  ;;  %v1851_v15 = vshrl.u32 %v6440_v22, 16  ;;  %v1854_v34 = vshll.u32 %v6440_v22, 16  ;;  %v2083_v31 = vunpack.c.l.b16 %v2037_v28  ;;  %v6392_v2 = vld [vmem:[%s8304_s23 + $0x30] sm:$0xf]  ;;  %v8844_v28 = vld [vmem:[%s8304_s23 + $0x4c] sm:$0x1] }
  0x72   : > { %v1830_v1 = vrot.slane %v1829_v57, 4  ;;  %v2041_v14 = vsel %vm8408_vm5, %v6503_v19, %v2040_v17  ;;  %v1843_v47 = vor.u32 %v1842_v37, %v1839_v36  ;;  %v1848_v48 = vrot.slane %v1846_v38, 5  ;;  %v7850_v36 = vld [vmem:[%s10534_s3 + $0x250] sm:$0xff] }
  0x73   : > { %2282 = vmatpush.bf16.msrb.mxu1 %v7854_v24  ;;  %v7860_v24 = vld [vmem:[%s10534_s3 + $0x2a0] sm:$0xff]  ;;  %v1853_v39 = vrot.slane %v1851_v15, 4  ;;  %v1856_v40 = vrot.slane %v1854_v34, 5  ;;  %v2084_v45 = vunpack.c.l.b16 %v2041_v14  ;;  %v1862_v52 = vrot.slane %v1860_v42, 5  ;;  %v7883_v34 = vld [vmem:[%s10534_s3 + $0x338] sm:$0xff] }
  0x74   : > { %v1835_v6 = vsel %vm8344_vm2, %v1830_v1, %v1834_v58  ;;  %2530 = vmatpush.bf16.msra.mxu2 %v7860_v24  ;;  %v1844_v56 = vrot.slane %v1843_v47, 4  ;;  %v6306_v57 = vrot.slane %v6298_v53, 9  ;;  %v1497_v58 = vrot.slane %v8601_v12, 5  ;;  %v6444_v24 = vld [vmem:[%s8304_s23 + $0x48] sm:$0xf]  ;;  %2836 = vmatpush.bf16.msrb.mxu0 %v7883_v34 }
  0x75   : > { %v1912_v11 = vunpack.c.l.b16 %v1835_v6  ;;  %v1857_v50 = vor.u32 %v1856_v40, %v1853_v39  ;;  %v2091_v62 = vpack.c.b16 %v2084_v45, %v2083_v31  ;;  %v1502_v35 = vsel %vm8408_vm5, %v6307_v59, %v1501_v61  ;;  %v8841_v15 = vld [vmem:[%s8304_s23 + $0x44] sm:$0x1]  ;;  %v8862_v31 = vld [vmem:[%s8304_s23 + $0x30] sm:$0xe]  ;;  %v7857_v45 = vld [vmem:[%s10534_s3 + $0x288] sm:$0xff] }
  0x76   : > { %v1849_v0 = vsel %vm8344_vm2, %v1844_v56, %v1848_v48  ;;  %v1498_v1 = vsel %vm8408_vm5, %v6306_v57, %v1497_v58  ;;  %v1533_v51 = vunpack.c.l.b16 %v1502_v35  ;;  %v6504_v10 = vrot.slane %v6496_v63, 9  ;;  %v2318_v56 = vld [vmem:[%s8849_s12] sm:$0xf]  ;;  %v6300_v59 = vld [vmem:[%s8304_s23 + $0x38] sm:$0xe] }
  0x77   : > { %v1918_v21 = vpack.c.b16 %v1912_v11, %v1911_v46  ;;  %2283 = vmatpush.bf16.msrb.mxu1 %v7853_v23  ;;  %v1858_v60 = vrot.slane %v1857_v50, 4  ;;  %v1913_v8 = vunpack.c.l.b16 %v1849_v0  ;;  %v1532_v5 = vunpack.c.l.b16 %v1498_v1  ;;  %v7871_v46 = vld [vmem:[%s10534_s3 + $0x2f8] sm:$0xff]  ;;  %v6442_v23 = vld [vmem:[%s8304_s23 + $0x40] sm:$0xf] }
  0x78   : > { %2531 = vmatpush.bf16.msra.mxu2 %v7859_v30  ;;  %v2044_v11 = vrot.slane %v8721_v26, 5  ;;  %v2048_v17 = vrot.slane %v8728_v29, 5  ;;  %2701 = vmatpush.bf16.msra.mxu3 %v7871_v46  ;;  %v7870_v26 = vld [vmem:[%s10534_s3 + $0x2f0] sm:$0xff]  ;;  %v1868_v22 = vshll.u32 %v6442_v23, 16  ;;  %v1879_v54 = vshrl.u32 %v6444_v24, 16  ;;  %v7869_v30 = vld [vmem:[%s10534_s3 + $0x2e8] sm:$0xff] }
  0x79   : > { %v1863_v12 = vsel %vm8344_vm2, %v1858_v60, %v1862_v52  ;;  %v8821_v18 = vpack.c.b16 %v1533_v51, %v1532_v5  ;;  %v7858_v29 = vld [vmem:[%s10534_s3 + $0x290] sm:$0xff]  ;;  %v1882_v27 = vshll.u32 %v6444_v24, 16  ;;  %v1874_v38 = vshll.u32 %v8841_v15, 16  ;;  %v7868_v50 = vld [vmem:[%s10534_s3 + $0x2e0] sm:$0xff] }
  0x7a   : > { %v1914_v6 = vunpack.c.l.b16 %v1863_v12  ;;  %v1870_v37 = vrot.slane %v1868_v22, 5  ;;  %v1881_v39 = vrot.slane %v1879_v54, 4  ;;  %v1888_v48 = vshll.u32 %v8844_v28, 16  ;;  %v7882_v52 = vld [vmem:[%s10534_s3 + $0x330] sm:$0xff]  ;;  %v6301_v60 = vld [vmem:[%s8304_s23 + $0x40] sm:$0xe] }
  0x7b   : > { %2284 = vmatpush.bf16.msrb.mxu1 %v7852_v20  ;;  %v1865_v20 = vshrl.u32 %v6442_v23, 16  ;;  %v1884_v47 = vrot.slane %v1882_v27, 5  ;;  %v1876_v55 = vrot.slane %v1874_v38, 5  ;;  %v2335_v61 = vshrl.u32 %v2318_v56, 16  ;;  %v6396_v35 = vld [vmem:[%s8304_s23 + $0x40] sm:$0xf]  ;;  %2837 = vmatpush.bf16.msrb.mxu0 %v7882_v52 }
  0x7c   : > { %v1919_v19 = vpack.c.b16 %v1914_v6, %v1913_v8  ;;  %2702 = vmatpush.bf16.msra.mxu3 %v7870_v26  ;;  %2532 = vmatpush.bf16.msra.mxu2 %v7858_v29  ;;  %v1890_v58 = vrot.slane %v1888_v48, 5  ;;  %v6308_v63 = vrot.slane %v6300_v59, 9  ;;  %v1505_v0 = vrot.slane %v8682_v41, 5  ;;  %v2320_v41 = vld [vmem:[%s8849_s12 + $0x8] sm:$0xf]  ;;  %v7867_v29 = vld [vmem:[%s10534_s3 + $0x2d8] sm:$0xff] }
  0x7d   : > { %v1867_v14 = vrot.slane %v1865_v20, 4  ;;  %v1885_v57 = vor.u32 %v1884_v47, %v1881_v39  ;;  %v6309_v1 = vrot.slane %v6301_v60, 9  ;;  %v1509_v8 = vrot.slane %v8685_v49, 5  ;;  %v7881_v23 = vld [vmem:[%s10534_s3 + $0x328] sm:$0xff]  ;;  %v7880_v38 = vld [vmem:[%s10534_s3 + $0x320] sm:$0xff]  ;;  %v7878_v60 = vld [vmem:[%s10534_s3 + $0x310] sm:$0xff] }
  0x7e   : > { %891 = vmatmul.bf16.gmra.mxu1 %v6069_v4  ;;  %1441 = vmatmul.bf16.gmra.mxu0 %v1365_v7  ;;  %v7818_v4 = vld [vmem:[%s8304_s23 + $0x34] sm:$0xf0]  ;;  %v6497_v7 = vld [vmem:[%s8304_s23 + $0x28] sm:$0xe]  ;;  %v1506_v6 = vsel %vm8408_vm5, %v6308_v63, %v1505_v0  ;;  %v2337_v46 = vrot.slane %v2335_v61, 4  ;;  %v2338_v51 = vshll.u32 %v2318_v56, 16 }
  0x7f   : > { %v6393_v13 = vor.u32 %v7818_v4, %v6392_v2  ;;  %v1871_v53 = vor.u32 %v1870_v37, %v1867_v14  ;;  %v6499_v4 = vld [vmem:[%s8304_s23 + $0x38] sm:$0xe]  ;;  %v1886_v12 = vrot.slane %v1885_v57, 4  ;;  %v1510_v49 = vsel %vm8408_vm5, %v6309_v1, %v1509_v8  ;;  %2838 = vmatpush.bf16.msrb.mxu0 %v7881_v23  ;;  %v7856_v14 = vld [vmem:[%s10534_s3 + $0x280] sm:$0xff]  ;;  %v7866_v37 = vld [vmem:[%s10534_s3 + $0x2d0] sm:$0xff] }
  0x80   : > { %1986 = vmatmul.bf16.gmra.mxu3 %v1918_v21  ;;  %v7851_v21 = vld [vmem:[%s10534_s3 + $0x258] sm:$0xff]  ;;  %2533 = vmatpush.bf16.msra.mxu2 %v7857_v45  ;;  %v2340_v24 = vrot.slane %v2338_v51, 5  ;;  %v6507_v20 = vrot.slane %v6499_v4, 9  ;;  %v2349_v22 = vshrl.u32 %v2320_v41, 16  ;;  %v2352_v54 = vshll.u32 %v2320_v41, 16  ;;  %v7848_v56 = vld [vmem:[%s10534_s3 + $0x240] sm:$0xff] }
  0x81   : > { %1740 = vmatmul.bf16.gmra.mxu2 %v6389_v16  ;;  %v6505_v16 = vrot.slane %v6497_v7, 9  ;;  %2285 = vmatpush.bf16.msrb.mxu1 %v7851_v21  ;;  %v6506_v7 = vrot.slane %v8862_v31, 9  ;;  %v2052_v21 = vrot.slane %v8783_v33, 5  ;;  %v7864_v59 = vld [vmem:[%s10534_s3 + $0x2c0] sm:$0xff]  ;;  %v7899_v61 = vld [vmem:[%s10534_s3 + $0x3b8] sm:$0xff] }
  0x82   : > { %2703 = vmatpush.bf16.msra.mxu3 %v7869_v30  ;;  %v2341_v39 = vor.u32 %v2340_v24, %v2337_v46  ;;  %v2565_v63 = vld [vmem:[%s8849_s12 + $0x8] sm:$0xe]  ;;  %v2322_v8 = vld [vmem:[%s8849_s12 + $0x10] sm:$0xf] }
  0x83   : > { %v2049_v25 = vsel %vm8408_vm5, %v6505_v16, %v2048_v17  ;;  %v1534_v16 = vunpack.c.l.b16 %v1506_v6  ;;  %v8893_v17 = vld [vmem:[%s8849_s12 + $0x4] sm:$0x1]  ;;  %v2053_v31 = vsel %vm8408_vm5, %v6506_v7, %v2052_v21  ;;  %2839 = vmatpush.bf16.msrb.mxu0 %v7880_v38  ;;  %v2366_v6 = vshll.u32 %v2322_v8, 16  ;;  %v7891_v38 = vld [vmem:[%s10534_s3 + $0x378] sm:$0xff] }
  0x84   : > { %v2086_v42 = vunpack.c.l.b16 %v2049_v25  ;;  %v2056_v25 = vrot.slane %v8786_v43, 5  ;;  %v2344_v30 = vshll.u32 %v8893_v17, 16  ;;  %v7849_v43 = vld [vmem:[%s10534_s3 + $0x248] sm:$0xff]  ;;  %2534 = vmatpush.bf16.msra.mxu2 %v7856_v14  ;;  %v2342_v47 = vrot.slane %v2341_v39, 4 }
  0x85   : > { %2286 = vmatpush.bf16.msrb.mxu1 %v7850_v36  ;;  %v2087_v57 = vunpack.c.l.b16 %v2053_v31  ;;  %v2590_v0 = vrot.slane %v8893_v17, 5  ;;  %v6501_v17 = vld [vmem:[%s8304_s23 + $0x48] sm:$0xe]  ;;  %v2368_v23 = vrot.slane %v2366_v6, 5  ;;  %v2060_v14 = vrot.slane %v8841_v15, 5  ;;  %v7876_v15 = vld [vmem:[%s10534_s3 + $0x300] sm:$0xff] }
  0x86   : > { %2704 = vmatpush.bf16.msra.mxu3 %v7868_v50  ;;  %v2057_v45 = vsel %vm8408_vm5, %v6507_v20, %v2056_v25  ;;  %v2346_v48 = vrot.slane %v2344_v30, 5 }
  0x88   : > { %3256 = vmatpush.bf16.msrb.mxu2 %v7899_v61 }
  0x89   : > { %2287 = vmatpush.bf16.msrb.mxu1 %v7849_v43 }
  0x8a   : > { %2705 = vmatpush.bf16.msra.mxu3 %v7867_v29 }
  0x8d   : > { %2288 = vmatpush.bf16.msrb.mxu1 %v7848_v56 }
  0x8e   : > { %1600 = vmatmul.bf16.vlgmr.msra.gmra.mxu1 %v8702_v9  ;;  %2155 = vmatmul.bf16.vlgmr.msra.gmra.mxu0 %v2091_v62  ;;  %v2045_v9 = vsel %vm8408_vm5, %v6504_v10, %v2044_v11  ;;  %v1872_v62 = vrot.slane %v1871_v53, 4  ;;  %v7819_v10 = vld [vmem:[%s8304_s23 + $0x44] sm:$0xf0]  ;;  %v1891_v11 = vsel %vm8344_vm2, %v1886_v12, %v1890_v58  ;;  %v2088_v58 = vunpack.c.l.b16 %v2057_v45 }
  0x8f   : > { %v2085_v40 = vunpack.c.l.b16 %v2045_v9  ;;  %v1916_v26 = vunpack.c.l.b16 %v1891_v11  ;;  %v1535_v9 = vunpack.c.l.b16 %v1510_v49  ;;  %v6397_v27 = vor.u32 %v7819_v10, %v6396_v35  ;;  %2706 = vmatpush.bf16.msra.mxu3 %v7866_v37  ;;  %v7865_v53 = vld [vmem:[%s10534_s3 + $0x2c8] sm:$0xff]  ;;  %v2324_v35 = vld [vmem:[%s8849_s12 + $0x18] sm:$0xf] }
  0x90   : > { %1991 = vmatmul.bf16.gmra.mxu3 %v1919_v19  ;;  %v1877_v5 = vsel %vm8344_vm2, %v1872_v62, %v1876_v55  ;;  %v8896_v19 = vld [vmem:[%s8849_s12 + $0xc] sm:$0x1]  ;;  %v7879_v55 = vld [vmem:[%s10534_s3 + $0x318] sm:$0xff]  ;;  %v2564_v62 = vld [vmem:[%s8849_s12] sm:$0xe]  ;;  %v6671_v12 = vrot.slane %v2565_v63, 9  ;;  %v2093_v46 = vpack.c.b16 %v2088_v58, %v2087_v57 }
  0x91   : > { %1745 = vmatmul.bf16.gmra.mxu2 %v6393_v13  ;;  %v2092_v2 = vpack.c.b16 %v2086_v42, %v2085_v40  ;;  %v1915_v13 = vunpack.c.l.b16 %v1877_v5  ;;  %v8906_v33 = vpack.c.b16 %v1535_v9, %v1534_v16  ;;  %v2358_v34 = vshll.u32 %v8896_v19, 16  ;;  %2840 = vmatpush.bf16.msrb.mxu0 %v7879_v55  ;;  %v6500_v16 = vld [vmem:[%s8304_s23 + $0x40] sm:$0xe]  ;;  %v7890_v57 = vld [vmem:[%s10534_s3 + $0x370] sm:$0xff] }
  0x92   : > { %v2351_v40 = vrot.slane %v2349_v22, 4  ;;  %v2354_v42 = vrot.slane %v2352_v54, 5  ;;  %v2594_v1 = vrot.slane %v8896_v19, 5  ;;  %v6670_v7 = vrot.slane %v2564_v62, 9  ;;  %v7877_v22 = vld [vmem:[%s10534_s3 + $0x308] sm:$0xff]  ;;  %3082 = vmatpush.bf16.msra.mxu1 %v7891_v38 }
  0x93   : > { %v1920_v36 = vpack.c.b16 %v1916_v26, %v1915_v13  ;;  %v2360_v52 = vrot.slane %v2358_v34, 5  ;;  %2707 = vmatpush.bf16.msra.mxu3 %v7865_v53  ;;  %v2363_v5 = vshrl.u32 %v2322_v8, 16  ;;  %v2377_v41 = vshrl.u32 %v2324_v35, 16  ;;  %v2323_v26 = vld [vmem:[%s8849_s12 + $0x14] sm:$0x1] }
  0x94   : > { %v2591_v51 = vsel %vm8408_vm5, %v6670_v7, %v2590_v0  ;;  %v2595_v10 = vsel %vm8408_vm5, %v6671_v12, %v2594_v1  ;;  %v2380_v11 = vshll.u32 %v2324_v35, 16  ;;  %v2325_v54 = vld [vmem:[%s8849_s12 + $0x1c] sm:$0x1]  ;;  %v6509_v34 = vrot.slane %v6501_v17, 9  ;;  %v2566_v58 = vld [vmem:[%s8849_s12 + $0x10] sm:$0xe] }
  0x95   : > { %v2637_v19 = vunpack.c.l.b16 %v2591_v51  ;;  %v2638_v21 = vunpack.c.l.b16 %v2595_v10  ;;  %2841 = vmatpush.bf16.msrb.mxu0 %v7878_v60  ;;  %v2365_v29 = vrot.slane %v2363_v5, 4  ;;  %v2379_v9 = vrot.slane %v2377_v41, 4  ;;  %v2326_v1 = vld [vmem:[%s8849_s12 + $0x20] sm:$0xf]  ;;  %v2328_v7 = vld [vmem:[%s8849_s12 + $0x28] sm:$0xf] }
  0x96   : > { %v2382_v24 = vrot.slane %v2380_v11, 5  ;;  %v2372_v43 = vshll.u32 %v2323_v26, 16  ;;  %v6672_v61 = vrot.slane %v2566_v58, 9  ;;  %v2598_v62 = vrot.slane %v2323_v26, 5  ;;  %3083 = vmatpush.bf16.msra.mxu1 %v7890_v57 }
  0x97   : > { %2708 = vmatpush.bf16.msra.mxu3 %v7864_v59  ;;  %v2645_v37 = vpack.c.b16 %v2638_v21, %v2637_v19  ;;  %v2369_v39 = vor.u32 %v2368_v23, %v2365_v29  ;;  %v2567_v59 = vld [vmem:[%s8849_s12 + $0x18] sm:$0xe]  ;;  %v2602_v0 = vrot.slane %v2325_v54, 5  ;;  %v2391_v12 = vshrl.u32 %v2326_v1, 16 }
  0x98   : > { %v2374_v31 = vrot.slane %v2372_v43, 5  ;;  %v6673_v63 = vrot.slane %v2567_v59, 9  ;;  %v2394_v8 = vshll.u32 %v2326_v1, 16  ;;  %v2599_v35 = vsel %vm8408_vm5, %v6672_v61, %v2598_v62  ;;  %v2330_v62 = vld [vmem:[%s8849_s12 + $0x30] sm:$0xf] }
  0x99   : > { %2842 = vmatpush.bf16.msrb.mxu0 %v7877_v22  ;;  %v2405_v6 = vshrl.u32 %v2328_v7, 16  ;;  %v2408_v41 = vshll.u32 %v2328_v7, 16  ;;  %v2639_v11 = vunpack.c.l.b16 %v2599_v35  ;;  %v2393_v17 = vrot.slane %v2391_v12, 4  ;;  %v2332_v1 = vld [vmem:[%s8849_s12 + $0x38] sm:$0xf] }
  0x9a   : > { %v2603_v5 = vsel %vm8408_vm5, %v6673_v63, %v2602_v0  ;;  %v2396_v19 = vrot.slane %v2394_v8, 5  ;;  %v2433_v8 = vshrl.u32 %v2332_v1, 16  ;;  %v2436_v35 = vshll.u32 %v2332_v1, 16 }
  0x9b   : > { %v2407_v21 = vrot.slane %v2405_v6, 4  ;;  %v2410_v26 = vrot.slane %v2408_v41, 5 }
  0x9d   : > { %2843 = vmatpush.bf16.msrb.mxu0 %v7876_v15 }
  0x9e   : > { %1605 = vmatmul.bf16.gmra.mxu1 %v8747_v3  ;;  %2160 = vmatmul.bf16.gmra.mxu0 %v2092_v2  ;;  %v2355_v3 = vor.u32 %v2354_v42, %v2351_v40  ;;  %v2347_v2 = vsel %vm8344_vm2, %v2342_v47, %v2346_v48  ;;  %v2383_v40 = vor.u32 %v2382_v24, %v2379_v9  ;;  %v2386_v42 = vshll.u32 %v2325_v54, 16  ;;  %v7898_v48 = vld [vmem:[%s10534_s3 + $0x3b0] sm:$0xff]  ;;  %v2329_v9 = vld [vmem:[%s8849_s12 + $0x2c] sm:$0x1] }
  0x9f   : > { %v2463_v13 = vunpack.c.l.b16 %v2347_v2  ;;  %3257 = vmatpush.bf16.msrb.mxu2 %v7898_v48  ;;  %v2414_v43 = vshll.u32 %v2329_v9, 16  ;;  %v2568_v48 = vld [vmem:[%s8849_s12 + $0x20] sm:$0xe]  ;;  %v2610_v61 = vrot.slane %v2329_v9, 5  ;;  %v7911_v9 = vld [vmem:[%s10534_s3 + $0x3f8] sm:$0xff] }
  0xa0   : > { %1996 = vmatmul.bf16.gmra.mxu3 %v1920_v36  ;;  %v2356_v50 = vrot.slane %v2355_v3, 4  ;;  %v2064_v36 = vrot.slane %v8844_v28, 5  ;;  %v2370_v3 = vrot.slane %v2369_v39, 4  ;;  %v2384_v45 = vrot.slane %v2383_v40, 4  ;;  %v7896_v40 = vld [vmem:[%s10534_s3 + $0x3a0] sm:$0xff] }
  0xa1   : > { %1750 = vmatmul.bf16.gmra.mxu2 %v6397_v27  ;;  %v6508_v27 = vrot.slane %v6500_v16, 9  ;;  %v2388_v47 = vrot.slane %v2386_v42, 5  ;;  %v7897_v16 = vld [vmem:[%s10534_s3 + $0x3a8] sm:$0xff]  ;;  %v2416_v39 = vrot.slane %v2414_v43, 5  ;;  %v6674_v57 = vrot.slane %v2568_v48, 9  ;;  %3391 = vmatpush.bf16.msrb.mxu3 %v7911_v9  ;;  %v7894_v48 = vld [vmem:[%s10534_s3 + $0x390] sm:$0xff] }
  0xa2   : > { %v2361_v4 = vsel %vm8344_vm2, %v2356_v50, %v2360_v52  ;;  %v2375_v2 = vsel %vm8344_vm2, %v2370_v3, %v2374_v31  ;;  %v6752_v3 = vld [vmem:[%s8849_s12 + $0x8] sm:$0xf]  ;;  %v7872_v31 = vld [vmem:[%s8849_s12 + $0xc] sm:$0xf0] }
  0xa3   : > { %v2464_v49 = vunpack.c.l.b16 %v2361_v4  ;;  %v2061_v28 = vsel %vm8408_vm5, %v6508_v27, %v2060_v14  ;;  %v2389_v4 = vsel %vm8344_vm2, %v2384_v45, %v2388_v47  ;;  %v2465_v51 = vunpack.c.l.b16 %v2375_v2  ;;  %3258 = vmatpush.bf16.msrb.mxu2 %v7897_v16  ;;  %v7888_v47 = vld [vmem:[%s10534_s3 + $0x360] sm:$0xff] }
  0xa4   : > { %v2089_v53 = vunpack.c.l.b16 %v2061_v28  ;;  %v2466_v10 = vunpack.c.l.b16 %v2389_v4  ;;  %v6576_v28 = vld [vmem:[%s8849_s12] sm:$0xf]  ;;  %v2419_v2 = vshrl.u32 %v2330_v62, 16  ;;  %v2422_v4 = vshll.u32 %v2330_v62, 16  ;;  %v7886_v62 = vld [vmem:[%s10534_s3 + $0x350] sm:$0xff] }
  0xa5   : > { %v2471_v30 = vpack.c.b16 %v2464_v49, %v2463_v13  ;;  %v2640_v13 = vunpack.c.l.b16 %v2603_v5  ;;  %v2327_v49 = vld [vmem:[%s8849_s12 + $0x24] sm:$0x1]  ;;  %v6753_v6 = vor.u32 %v7872_v31, %v6752_v3 }
  0xa6   : > { %v2472_v22 = vpack.c.b16 %v2466_v10, %v2465_v51  ;;  %v2400_v27 = vshll.u32 %v2327_v49, 16  ;;  %v2606_v58 = vrot.slane %v2327_v49, 5  ;;  %v2421_v49 = vrot.slane %v2419_v2, 4 }
  0xa7   : > { %v2646_v14 = vpack.c.b16 %v2640_v13, %v2639_v11  ;;  %3259 = vmatpush.bf16.msrb.mxu2 %v7896_v40  ;;  %v9057_v11 = vld [vmem:[%s8849_s12 + $0x34] sm:$0x1]  ;;  %v7895_v13 = vld [vmem:[%s10534_s3 + $0x398] sm:$0xff]  ;;  %v2424_v16 = vrot.slane %v2422_v4, 5 }
  0xa8   : > { %v2607_v7 = vsel %vm8408_vm5, %v6674_v57, %v2606_v58  ;;  %v2428_v43 = vshll.u32 %v9057_v11, 16  ;;  %v7910_v40 = vld [vmem:[%s10534_s3 + $0x3f0] sm:$0xff]  ;;  %v7919_v58 = vld [vmem:[%s10534_s3 + $0x438] sm:$0xff]  ;;  %v2614_v4 = vrot.slane %v9057_v11, 5 }
  0xa9   : > { %v2641_v51 = vunpack.c.l.b16 %v2607_v7  ;;  %3392 = vmatpush.bf16.msrb.mxu3 %v7910_v40  ;;  %3637 = vmatpush.bf16.msra.mxu0 %v7919_v58  ;;  %v9145_v40 = vld [vmem:[%s8849_s12 + $0x14] sm:$0x1] }
  0xaa   : > { %v3149_v58 = vrot.slane %v9145_v40, 5 }
  0xab   : > { %v8962_v20 = vpop.f32.mrf.mxu1  ;;  %v8964_v25 = vpop.f32.mrf.mxu0  ;;  %3260 = vmatpush.bf16.msrb.mxu2 %v7895_v13 }
  0xae   : > { %1610 = vmatmul.bf16.gmra.mxu1 %v8821_v18  ;;  %2165 = vmatmul.bf16.gmra.mxu0 %v2093_v46  ;;  %v2065_v18 = vsel %vm8408_vm5, %v6509_v34, %v2064_v36  ;;  %v2397_v34 = vor.u32 %v2396_v19, %v2393_v17  ;;  %v2411_v36 = vor.u32 %v2410_v26, %v2407_v21  ;;  %v2435_v17 = vrot.slane %v2433_v8, 4  ;;  %v6580_v8 = vld [vmem:[%s8849_s12 + $0x10] sm:$0xf] }
  0xaf   : > { %v2090_v55 = vunpack.c.l.b16 %v2065_v18  ;;  %v7844_v18 = vld [vmem:[%s8849_s12 + $0x4] sm:$0xf0]  ;;  %v2438_v19 = vrot.slane %v2436_v35, 5  ;;  %3261 = vmatpush.bf16.msrb.mxu2 %v7894_v48  ;;  %v7845_v35 = vld [vmem:[%s8849_s12 + $0x14] sm:$0xf0]  ;;  %v7916_v48 = vld [vmem:[%s10534_s3 + $0x420] sm:$0xff] }
  0xb0   : > { %2709 = vmatmul.bf16.vlgmr.msra.gmra.mxu3 %v2645_v37  ;;  %v2398_v37 = vrot.slane %v2397_v34, 4  ;;  %v2412_v38 = vrot.slane %v2411_v36, 4  ;;  %v6577_v5 = vor.u32 %v7844_v18, %v6576_v28  ;;  %v2430_v18 = vrot.slane %v2428_v43, 5 }
  0xb1   : > { %2535 = vmatmul.bf16.vlgmr.msra.gmra.mxu2 %v2471_v30  ;;  %v2094_v46 = vpack.c.b16 %v2090_v55, %v2089_v53  ;;  %v7889_v30 = vld [vmem:[%s10534_s3 + $0x368] sm:$0xff] }
  0xb2   : > { %3084 = vmatpush.bf16.msra.mxu1 %v7889_v30  ;;  %v2569_v53 = vld [vmem:[%s8849_s12 + $0x28] sm:$0xe]  ;;  %v2417_v0 = vsel %vm8344_vm2, %v2412_v38, %v2416_v39  ;;  %v2425_v38 = vor.u32 %v2424_v16, %v2421_v49  ;;  %v6581_v49 = vor.u32 %v7845_v35, %v6580_v8  ;;  %v7884_v8 = vld [vmem:[%s10534_s3 + $0x340] sm:$0xff] }
  0xb3   : > { %v8986_v50 = vpop.f32.mrf.mxu1  ;;  %v8988_v52 = vpop.f32.mrf.mxu0  ;;  %v6675_v59 = vrot.slane %v2569_v53, 9  ;;  %v7846_v35 = vld [vmem:[%s8849_s12 + $0x24] sm:$0xf0] }
  0xb4   : > { %v8990_v56 = vpop.f32.mrf.mxu2  ;;  %v8997_v60 = vpop.f32.mrf.mxu3  ;;  %v2426_v3 = vrot.slane %v2425_v38, 4 }
  0xb5   : > { %v2611_v12 = vsel %vm8408_vm5, %v6675_v59, %v2610_v61 }
  0xb6   : > { %3085 = vmatpush.bf16.msra.mxu1 %v7888_v47  ;;  %v2642_v10 = vunpack.c.l.b16 %v2611_v12 }
  0xb8   : > { %v2647_v36 = vpack.c.b16 %v2642_v10, %v2641_v51  ;;  %v7908_v51 = vld [vmem:[%s10534_s3 + $0x3e0] sm:$0xff]  ;;  %v7918_v10 = vld [vmem:[%s10534_s3 + $0x430] sm:$0xff] }
  0xb9   : > { %3638 = vmatpush.bf16.msra.mxu0 %v7918_v10  ;;  %v7874_v10 = vld [vmem:[%s8849_s12 + $0x2c] sm:$0xf0] }
  0xbb   : > { %v9013_v29 = vpop.f32.mrf.mxu1  ;;  %v9015_v23 = vpop.f32.mrf.mxu0 }
  0xbc   : > { %v9018_v24 = vpop.f32.mrf.mxu2  ;;  %v9020_v54 = vpop.f32.mrf.mxu3 }
  0xbe   : > { %1615 = vmatmul.bf16.gmra.mxu1 %v8906_v33  ;;  %2170 = vmatmul.bf16.gmra.mxu0 %v2094_v46  ;;  %v2402_v33 = vrot.slane %v2400_v27, 5  ;;  %v2468_v46 = vunpack.c.l.b16 %v2417_v0  ;;  %v2571_v0 = vld [vmem:[%s8849_s12 + $0x38] sm:$0xe] }
  0xbf   : > { %v6677_v7 = vrot.slane %v2571_v0, 9  ;;  %v7905_v0 = vld [vmem:[%s10534_s3 + $0x3c8] sm:$0xff] }
  0xc0   : > { %2714 = vmatmul.bf16.gmra.mxu3 %v2646_v14  ;;  %v2403_v63 = vsel %vm8344_vm2, %v2398_v37, %v2402_v33  ;;  %v7887_v33 = vld [vmem:[%s10534_s3 + $0x358] sm:$0xff] }
  0xc1   : > { %2540 = vmatmul.bf16.gmra.mxu2 %v2472_v22  ;;  %v2467_v41 = vunpack.c.l.b16 %v2403_v63  ;;  %v2333_v22 = vld [vmem:[%s8849_s12 + $0x3c] sm:$0x1]  ;;  %3086 = vmatpush.bf16.msra.mxu1 %v7887_v33  ;;  %v2570_v63 = vld [vmem:[%s8849_s12 + $0x30] sm:$0xe] }
  0xc2   : > { %v2442_v39 = vshll.u32 %v2333_v22, 16  ;;  %v6676_v2 = vrot.slane %v2570_v63, 9 }
  0xc3   : > { %v9029_v42 = vpop.f32.mrf.mxu1  ;;  %v9031_v15 = vpop.f32.mrf.mxu0  ;;  %v2473_v30 = vpack.c.b16 %v2468_v46, %v2467_v41  ;;  %v7873_v46 = vld [vmem:[%s8849_s12 + $0x1c] sm:$0xf0] }
  0xc4   : > { %v9037_v45 = vpop.f32.mrf.mxu2  ;;  %v9044_v55 = vpop.f32.mrf.mxu3  ;;  %v2444_v47 = vrot.slane %v2442_v39, 5  ;;  %v9142_v39 = vld [vmem:[%s8849_s12 + $0xc] sm:$0x1] }
  0xc5   : > { %3087 = vmatpush.bf16.msra.mxu1 %v7886_v62  ;;  %v6798_v62 = vld [vmem:[%s8849_s12 + $0x8] sm:$0xf] }
  0xcb   : > { %v877_v21 = vpop.f32.mrf.mxu1  ;;  %v1427_v26 = vpop.f32.mrf.mxu0 }
  0xcc   : > { %v878_v27 = vadd.f32 %v877_v21, %v8964_v25  ;;  %v9067_v14 = vpop.f32.mrf.mxu2  ;;  %v9069_v34 = vpop.f32.mrf.mxu3  ;;  %v2439_v25 = vor.u32 %v2438_v19, %v2435_v17  ;;  %v7893_v19 = vld [vmem:[%s10534_s3 + $0x388] sm:$0xff] }
  0xcd   : > { %3262 = vmatpush.bf16.msrb.mxu2 %v7893_v19 }
  0xce   : > { %2289 = vmatmul.bf16.vlgmr.msrb.gmra.mxu1 %v6577_v5  ;;  %v1066_v37 = vadd.f32 %v8990_v56, %v878_v27  ;;  %2844 = vmatmul.bf16.vlgmr.msrb.gmra.mxu0 %v6753_v6  ;;  %v2440_v31 = vrot.slane %v2439_v25, 4  ;;  %v6756_v5 = vld [vmem:[%s8849_s12 + $0x18] sm:$0xf]  ;;  %v2431_v6 = vsel %vm8344_vm2, %v2426_v3, %v2430_v18  ;;  %v7892_v25 = vld [vmem:[%s10534_s3 + $0x380] sm:$0xff]  ;;  %v7885_v18 = vld [vmem:[%s10534_s3 + $0x348] sm:$0xff] }
  0xcf   : > { %v2469_v16 = vunpack.c.l.b16 %v2431_v6  ;;  %v6862_v3 = vld [vmem:[%s8849_s12 + $0x8] sm:$0xe]  ;;  %3088 = vmatpush.bf16.msra.mxu1 %v7885_v18  ;;  %v7900_v18 = vld [vmem:[%s8849_s12 + $0x14] sm:$0xf0] }
  0xd0   : > { %v1201_v28 = vadd.f32 %v8997_v60, %v1066_v37  ;;  %2719 = vmatmul.bf16.gmra.mxu3 %v2647_v36  ;;  %v7909_v60 = vld [vmem:[%s10534_s3 + $0x3e8] sm:$0xff]  ;;  %v2445_v41 = vsel %vm8344_vm2, %v2440_v31, %v2444_v47  ;;  %v6863_v31 = vld [vmem:[%s8849_s12 + $0x10] sm:$0xe] }
  0xd1   : > { %2545 = vmatmul.bf16.gmra.mxu2 %v2473_v30  ;;  %3393 = vmatpush.bf16.msrb.mxu3 %v7909_v60  ;;  %v2470_v17 = vunpack.c.l.b16 %v2445_v41  ;;  %v7917_v36 = vld [vmem:[%s10534_s3 + $0x428] sm:$0xff]  ;;  %v7906_v47 = vld [vmem:[%s10534_s3 + $0x3d0] sm:$0xff]  ;;  %v6871_v60 = vrot.slane %v6863_v31, 9 }
  0xd2   : > { %v9080_v56 = vadd.f32 %v1427_v26, %v1201_v28  ;;  %v6757_v26 = vor.u32 %v7873_v46, %v6756_v5  ;;  %3639 = vmatpush.bf16.msra.mxu0 %v7917_v36  ;;  %3263 = vmatpush.bf16.msrb.mxu2 %v7892_v25  ;;  %v6760_v5 = vld [vmem:[%s8849_s12 + $0x28] sm:$0xf] }
  0xd3   : > { %v879_v53 = vpop.f32.mrf.mxu1  ;;  %v1429_v57 = vpop.f32.mrf.mxu0  ;;  %v2474_v33 = vpack.c.b16 %v2470_v17, %v2469_v16  ;;  %v3150_v46 = vsel %vm8408_vm5, %v6871_v60, %v3149_v58  ;;  %3089 = vmatpush.bf16.msra.mxu1 %v7884_v8  ;;  %v7914_v16 = vld [vmem:[%s10534_s3 + $0x410] sm:$0xff]  ;;  %v9214_v60 = vld [vmem:[%s8849_s12 + $0x1c] sm:$0x1]  ;;  %v6864_v58 = vld [vmem:[%s8849_s12 + $0x18] sm:$0xe] }
  0xd4   : > { %v880_v59 = vadd.f32 %v879_v53, %v8988_v52  ;;  %v9092_v61 = vpop.f32.mrf.mxu2  ;;  %v9099_v1 = vpop.f32.mrf.mxu3  ;;  %v2618_v52 = vrot.slane %v2333_v22, 5  ;;  %v6870_v53 = vrot.slane %v6862_v3, 9  ;;  %v7913_v3 = vld [vmem:[%s10534_s3 + $0x408] sm:$0xff] }
  0xd5   : > { %3394 = vmatpush.bf16.msrb.mxu3 %v7908_v51 }
  0xd6   : > { %v1067_v12 = vadd.f32 %v9018_v24, %v880_v59  ;;  %v2615_v24 = vsel %vm8408_vm5, %v6676_v2, %v2614_v4  ;;  %v2619_v11 = vsel %vm8408_vm5, %v6677_v7, %v2618_v52  ;;  %3640 = vmatpush.bf16.msra.mxu0 %v7916_v48  ;;  %v7915_v2 = vld [vmem:[%s10534_s3 + $0x418] sm:$0xff]  ;;  %v6800_v4 = vld [vmem:[%s8849_s12 + $0x10] sm:$0xf]  ;;  %v6584_v52 = vld [vmem:[%s8849_s12 + $0x20] sm:$0xf] }
  0xd7   : > { %v2643_v9 = vunpack.c.l.b16 %v2615_v24  ;;  %v2644_v22 = vunpack.c.l.b16 %v2619_v11  ;;  %v2893_v24 = vshll.u32 %v6798_v62, 16  ;;  %v2904_v11 = vshrl.u32 %v6800_v4, 16 }
  0xd8   : > { %v1202_v13 = vadd.f32 %v9020_v54, %v1067_v12  ;;  %v7907_v54 = vld [vmem:[%s10534_s3 + $0x3d8] sm:$0xff]  ;;  %v6585_v19 = vor.u32 %v7846_v35, %v6584_v52  ;;  %v2899_v52 = vshll.u32 %v9142_v39, 16  ;;  %v2913_v35 = vshll.u32 %v9145_v40, 16 }
  0xd9   : > { %3395 = vmatpush.bf16.msrb.mxu3 %v7907_v54  ;;  %v7939_v54 = vld [vmem:[%s10534_s3 + $0x4b8] sm:$0xff]  ;;  %v2895_v36 = vrot.slane %v2893_v24, 5 }
  0xda   : > { %v9125_v21 = vadd.f32 %v1429_v57, %v1202_v13  ;;  %v3145_v57 = vrot.slane %v9142_v39, 5  ;;  %3641 = vmatpush.bf16.msra.mxu0 %v7915_v2  ;;  %v2907_v13 = vshll.u32 %v6800_v4, 16  ;;  %3945 = vmatpush.bf16.msra.mxu2 %v7939_v54  ;;  %v7927_v2 = vld [vmem:[%s10534_s3 + $0x478] sm:$0xff]  ;;  %v9222_v4 = vld [vmem:[%s8849_s12 + $0x24] sm:$0x1] }
  0xdb   : > { %v882_v27 = vpop.f32.mrf.mxu1  ;;  %v1432_v30 = vpop.f32.mrf.mxu0  ;;  %3811 = vmatpush.bf16.msrb.mxu1 %v7927_v2  ;;  %v3157_v40 = vrot.slane %v9222_v4, 5 }
  0xdc   : > { %v883_v43 = vadd.f32 %v882_v27, %v9015_v23  ;;  %v9134_v37 = vpop.f32.mrf.mxu2  ;;  %v9136_v38 = vpop.f32.mrf.mxu3  ;;  %v2648_v23 = vpack.c.b16 %v2644_v22, %v2643_v9  ;;  %v3146_v41 = vsel %vm8408_vm5, %v6870_v53, %v3145_v57  ;;  %v3193_v22 = vunpack.c.l.b16 %v3150_v46 }
  0xdd   : > { %3396 = vmatpush.bf16.msrb.mxu3 %v7906_v47  ;;  %v3192_v9 = vunpack.c.l.b16 %v3146_v41  ;;  %v6872_v46 = vrot.slane %v6864_v58, 9  ;;  %v7875_v58 = vld [vmem:[%s8849_s12 + $0x3c] sm:$0xf0] }
  0xde   : > { %2294 = vmatmul.bf16.gmra.mxu1 %v6581_v49  ;;  %v1068_v28 = vadd.f32 %v9037_v45, %v883_v43  ;;  %2849 = vmatmul.bf16.gmra.mxu0 %v6757_v26  ;;  %v7904_v49 = vld [vmem:[%s10534_s3 + $0x3c0] sm:$0xff]  ;;  %v6761_v26 = vor.u32 %v7874_v10, %v6760_v5  ;;  %v2906_v43 = vrot.slane %v2904_v11, 4 }
  0xdf   : > { %3642 = vmatpush.bf16.msra.mxu0 %v7914_v16  ;;  %v3200_v53 = vpack.c.b16 %v3193_v22, %v3192_v9  ;;  %v9242_v16 = vld [vmem:[%s8849_s12 + $0x1c] sm:$0x1]  ;;  %v2915_v9 = vrot.slane %v2913_v35, 5 }
  0xe0   : > { %v1203_v45 = vadd.f32 %v9044_v55, %v1068_v28  ;;  %2724 = vmatmul.bf16.gmra.mxu3 %v2648_v23  ;;  %v6952_v23 = vld [vmem:[%s8849_s12 + $0x10] sm:$0xf] }
  0xe1   : > { %2550 = vmatmul.bf16.gmra.mxu2 %v2474_v33  ;;  %3397 = vmatpush.bf16.msrb.mxu3 %v7905_v0  ;;  %v7000_v33 = vld [vmem:[%s8849_s12 + $0x18] sm:$0xf] }
  0xe2   : > { %v9162_v59 = vadd.f32 %v1432_v30, %v1203_v45 }
  0xe3   : > { %v884_v63 = vpop.f32.mrf.mxu1  ;;  %v1434_v55 = vpop.f32.mrf.mxu0  ;;  %3643 = vmatpush.bf16.msra.mxu0 %v7913_v3 }
  0xe4   : > { %v885_v7 = vadd.f32 %v884_v63, %v9031_v15  ;;  %v9174_v12 = vpop.f32.mrf.mxu2  ;;  %v9181_v6 = vpop.f32.mrf.mxu3  ;;  %v2890_v15 = vshrl.u32 %v6798_v62, 16  ;;  %v3459_v62 = vshrl.u32 %v7000_v33, 16  ;;  %v3462_v63 = vshll.u32 %v7000_v33, 16  ;;  %v7926_v33 = vld [vmem:[%s10534_s3 + $0x470] sm:$0xff] }
  0xe5   : > { %3398 = vmatpush.bf16.msrb.mxu3 %v7904_v49  ;;  %3812 = vmatpush.bf16.msrb.mxu1 %v7926_v33 }
  0xe6   : > { %v1069_v51 = vadd.f32 %v9067_v14, %v885_v7  ;;  %v6998_v14 = vld [vmem:[%s8849_s12 + $0x10] sm:$0xf]  ;;  %v2892_v27 = vrot.slane %v2890_v15, 4  ;;  %v6865_v7 = vld [vmem:[%s8849_s12 + $0x20] sm:$0xe]  ;;  %v3153_v15 = vrot.slane %v9214_v60, 5 }
  0xe7   : > { %v3445_v31 = vshrl.u32 %v6998_v14, 16  ;;  %v3448_v45 = vshll.u32 %v6998_v14, 16  ;;  %v6873_v39 = vrot.slane %v6865_v7, 9  ;;  %v3461_v24 = vrot.slane %v3459_v62, 4 }
  0xe8   : > { %v1204_v17 = vadd.f32 %v9069_v34, %v1069_v51  ;;  %v2909_v34 = vrot.slane %v2907_v13, 5  ;;  %v2896_v0 = vor.u32 %v2895_v36, %v2892_v27  ;;  %v9233_v51 = vld [vmem:[%s8849_s12 + $0x14] sm:$0x1]  ;;  %v3464_v11 = vrot.slane %v3462_v63, 5  ;;  %v6802_v27 = vld [vmem:[%s8849_s12 + $0x18] sm:$0xf] }
  0xe9   : > { %v3447_v5 = vrot.slane %v3445_v31, 4  ;;  %v3450_v10 = vrot.slane %v3448_v45, 5  ;;  %v2901_v14 = vrot.slane %v2899_v52, 5  ;;  %v3454_v22 = vshll.u32 %v9233_v51, 16  ;;  %v7847_v31 = vld [vmem:[%s8849_s12 + $0x34] sm:$0xf0] }
  0xea   : > { %v9197_v30 = vadd.f32 %v1434_v55, %v1204_v17  ;;  %v2910_v8 = vor.u32 %v2909_v34, %v2906_v43  ;;  %v2897_v49 = vrot.slane %v2896_v0, 4  ;;  %v3154_v43 = vsel %vm8408_vm5, %v6872_v46, %v3153_v15  ;;  %v7937_v15 = vld [vmem:[%s10534_s3 + $0x4a8] sm:$0xff] }
  0xeb   : > { %v887_v25 = vpop.f32.mrf.mxu1  ;;  %v1437_v28 = vpop.f32.mrf.mxu0  ;;  %v3451_v34 = vor.u32 %v3450_v10, %v3447_v5  ;;  %v2918_v45 = vshrl.u32 %v6802_v27, 16  ;;  %v2921_v7 = vshll.u32 %v6802_v27, 16  ;;  %v7002_v10 = vld [vmem:[%s8849_s12 + $0x20] sm:$0xf]  ;;  %v6866_v27 = vld [vmem:[%s8849_s12 + $0x28] sm:$0xe] }
  0xec   : > { %v888_v47 = vadd.f32 %v887_v25, %v8962_v20  ;;  %v9209_v48 = vpop.f32.mrf.mxu2  ;;  %v9211_v57 = vpop.f32.mrf.mxu3  ;;  %v6953_v20 = vor.u32 %v7900_v18, %v6952_v23  ;;  %v6588_v25 = vld [vmem:[%s8849_s12 + $0x30] sm:$0xf]  ;;  %v3158_v23 = vsel %vm8408_vm5, %v6873_v39, %v3157_v40  ;;  %v3468_v18 = vshll.u32 %v9242_v16, 16 }
  0xed   : > { %v2902_v62 = vsel %vm8344_vm2, %v2897_v49, %v2901_v14  ;;  %v3195_v2 = vunpack.c.l.b16 %v3158_v23  ;;  %v7901_v49 = vld [vmem:[%s8849_s12 + $0x24] sm:$0xf0]  ;;  %v2923_v33 = vrot.slane %v2921_v7, 5  ;;  %v6808_v7 = vld [vmem:[%s8849_s12 + $0x30] sm:$0xf] }
  0xee   : > { %2299 = vmatmul.bf16.gmra.mxu1 %v6585_v19  ;;  %v1070_v55 = vadd.f32 %v9092_v61, %v888_v47  ;;  %2854 = vmatmul.bf16.gmra.mxu0 %v6761_v26  ;;  %v7912_v61 = vld [vmem:[%s10534_s3 + $0x400] sm:$0xff]  ;;  %v2911_v26 = vrot.slane %v2910_v8, 4  ;;  %v3470_v8 = vrot.slane %v3468_v18, 5  ;;  %v7004_v23 = vld [vmem:[%s8849_s12 + $0x28] sm:$0xf] }
  0xef   : > { %3644 = vmatpush.bf16.msra.mxu0 %v7912_v61  ;;  %v6804_v47 = vld [vmem:[%s8849_s12 + $0x20] sm:$0xf] }
  0xf0   : > { %v1205_v41 = vadd.f32 %v9099_v1, %v1070_v55  ;;  %3399 = vmatmul.bf16.vlgmr.msrb.gmra.mxu3 %v6953_v20  ;;  %v7938_v1 = vld [vmem:[%s10534_s3 + $0x4b0] sm:$0xff]  ;;  %v2916_v63 = vsel %vm8344_vm2, %v2911_v26, %v2915_v9  ;;  %v3194_v55 = vunpack.c.l.b16 %v3154_v43  ;;  %v3456_v20 = vrot.slane %v3454_v22, 5 }
  0xf1   : > { %3264 = vmatmul.bf16.vlgmr.msrb.gmra.mxu2 %v3200_v53  ;;  %v6764_v53 = vld [vmem:[%s8849_s12 + $0x38] sm:$0xf]  ;;  %v2932_v35 = vshrl.u32 %v6804_v47, 16  ;;  %v2935_v61 = vshll.u32 %v6804_v47, 16  ;;  %v9288_v14 = vunpack.c.l.b16 %v2916_v63  ;;  %v9293_v22 = vld [vmem:[%s8849_s12 + $0x34] sm:$0x1] }
  0xf2   : > { %v9236_v13 = vadd.f32 %v1437_v28, %v1205_v41  ;;  %3946 = vmatpush.bf16.msra.mxu2 %v7938_v1  ;;  %v6589_v41 = vor.u32 %v7847_v31, %v6588_v25  ;;  %v6765_v46 = vor.u32 %v7875_v58, %v6764_v53  ;;  %v9283_v1 = vld [vmem:[%s8849_s12 + $0x2c] sm:$0x1]  ;;  %v3201_v26 = vpack.c.b16 %v3195_v2, %v3194_v55 }
  0xf3   : > { %v889_v17 = vpop.f32.mrf.mxu1  ;;  %v1439_v19 = vpop.f32.mrf.mxu0  ;;  %v2937_v25 = vrot.slane %v2935_v61, 5  ;;  %v3473_v31 = vshrl.u32 %v7002_v10, 16  ;;  %v3476_v47 = vshll.u32 %v7002_v10, 16  ;;  %v3161_v53 = vrot.slane %v9283_v1, 5 }
  0xf4   : > { %v890_v54 = vadd.f32 %v889_v17, %v8986_v50  ;;  %v9247_v36 = vpop.f32.mrf.mxu2  ;;  %v9255_v28 = vpop.f32.mrf.mxu3  ;;  %v3465_v50 = vor.u32 %v3464_v11, %v3461_v24  ;;  %v9278_v24 = vunpack.c.l.b16 %v2902_v62  ;;  %v6956_v11 = vld [vmem:[%s8849_s12 + $0x20] sm:$0xf]  ;;  %v3165_v62 = vrot.slane %v9293_v22, 5 }
  0xf5   : > { %v6957_v18 = vor.u32 %v7901_v49, %v6956_v11  ;;  %v3478_v11 = vrot.slane %v3476_v47, 5 }
  0xf6   : > { %v1071_v3 = vadd.f32 %v9134_v37, %v890_v54  ;;  %v3452_v37 = vrot.slane %v3451_v34, 4  ;;  %v3466_v52 = vrot.slane %v3465_v50, 4  ;;  %3947 = vmatpush.bf16.msra.mxu2 %v7937_v15  ;;  %v6867_v54 = vld [vmem:[%s8849_s12 + $0x30] sm:$0xe] }
  0xf7   : > { %v6875_v58 = vrot.slane %v6867_v54, 9 }
  0xf8   : > { %v1206_v0 = vadd.f32 %v9136_v38, %v1071_v3  ;;  %v9275_v38 = vrot.slane %v2918_v45, 4  ;;  %v3457_v9 = vsel %vm8344_vm2, %v3452_v37, %v3456_v20  ;;  %v3471_v43 = vsel %vm8344_vm2, %v3466_v52, %v3470_v8  ;;  %v7925_v3 = vld [vmem:[%s10534_s3 + $0x468] sm:$0xff] }
  0xf9   : > { %v6874_v45 = vrot.slane %v6866_v27, 9  ;;  %v9309_v55 = vunpack.c.l.b16 %v3457_v9  ;;  %3813 = vmatpush.bf16.msrb.mxu1 %v7925_v3  ;;  %v3490_v20 = vshll.u32 %v7004_v23, 16  ;;  %v9312_v2 = vunpack.c.l.b16 %v3471_v43  ;;  %v7924_v9 = vld [vmem:[%s10534_s3 + $0x460] sm:$0xff] }
  0xfa   : > { %v9270_v5 = vadd.f32 %v1439_v19, %v1206_v0  ;;  %v6806_v0 = vld [vmem:[%s8849_s12 + $0x28] sm:$0xf]  ;;  %v2924_v37 = vor.u32 %v2923_v33, %v9275_v38  ;;  %v2960_v27 = vshrl.u32 %v6808_v7, 16  ;;  %v9342_v33 = vld [vmem:[%s8849_s12 + $0x2c] sm:$0x1] }
  0xfb   : > { %v892_v39 = vpop.f32.mrf.mxu1  ;;  %v1442_v40 = vpop.f32.mrf.mxu0  ;;  %v2946_v52 = vshrl.u32 %v6806_v0, 16  ;;  %v2949_v8 = vshll.u32 %v6806_v0, 16  ;;  %v3162_v38 = vsel %vm8408_vm5, %v6874_v45, %v3161_v53 }
  0xfc   : > { %v893_v17 = vadd.f32 %v892_v39, %v9013_v29  ;;  %v9286_v19 = vpop.f32.mrf.mxu2  ;;  %v9299_v34 = vpop.f32.mrf.mxu3  ;;  %v2934_v29 = vrot.slane %v2932_v35, 4  ;;  %v3166_v39 = vsel %vm8408_vm5, %v6875_v58, %v3165_v62  ;;  %v9337_v54 = vrot.slane %v2924_v37, 4 }
  0xfd   : > { %3814 = vmatpush.bf16.msrb.mxu1 %v7924_v9  ;;  %v3196_v47 = vunpack.c.l.b16 %v3162_v38  ;;  %v3197_v45 = vunpack.c.l.b16 %v3166_v39  ;;  %v2955_v37 = vshll.u32 %v9283_v1, 16 }
  0xfe   : > { %2304 = vmatmul.bf16.gmra.mxu1 %v6589_v41  ;;  %v1072_v50 = vadd.f32 %v9174_v12, %v893_v17  ;;  %2859 = vmatmul.bf16.gmra.mxu0 %v6765_v46  ;;  %v3487_v12 = vshrl.u32 %v7004_v23, 16  ;;  %v2938_v61 = vor.u32 %v2937_v25, %v2934_v29  ;;  %v2941_v41 = vshll.u32 %v9222_v4, 16  ;;  %v7936_v46 = vld [vmem:[%s10534_s3 + $0x4a0] sm:$0xff] }
  0xff   : > { %3948 = vmatpush.bf16.msra.mxu2 %v7936_v46  ;;  %v9332_v4 = vld [vmem:[%s8849_s12 + $0x24] sm:$0x1]  ;;  %v2951_v29 = vrot.slane %v2949_v8, 5  ;;  %v2963_v25 = vshll.u32 %v6808_v7, 16  ;;  %v7902_v46 = vld [vmem:[%s8849_s12 + $0x34] sm:$0xf0]  ;;  %v3202_v39 = vpack.c.b16 %v3197_v45, %v3196_v47 }
 0x100   : > { %v1207_v63 = vadd.f32 %v9181_v6, %v1072_v50  ;;  %3404 = vmatmul.bf16.gmra.mxu3 %v6957_v18  ;;  %v2927_v6 = vshll.u32 %v9214_v60, 16  ;;  %v3489_v17 = vrot.slane %v3487_v12, 4  ;;  %v9347_v18 = vrot.slane %v2938_v61, 4  ;;  %v7935_v61 = vld [vmem:[%s10534_s3 + $0x498] sm:$0xff] }
 0x101   : > { %3269 = vmatmul.bf16.gmra.mxu2 %v3201_v26  ;;  %v3492_v26 = vrot.slane %v3490_v20, 5  ;;  %v9349_v3 = vrot.slane %v2941_v41, 5  ;;  %v3482_v58 = vshll.u32 %v9332_v4, 16  ;;  %v2962_v12 = vrot.slane %v2960_v27, 4  ;;  %v7008_v20 = vld [vmem:[%s8849_s12 + $0x38] sm:$0xf] }
 0x102   : > { %v9316_v35 = vadd.f32 %v1442_v40, %v1207_v63  ;;  %v3475_v40 = vrot.slane %v3473_v31, 4  ;;  %v9345_v50 = vrot.slane %v2927_v6, 5  ;;  %v7006_v31 = vld [vmem:[%s8849_s12 + $0x30] sm:$0xf]  ;;  %v2965_v7 = vrot.slane %v2963_v25, 5 }
 0x103   : > { %v894_v15 = vpop.f32.mrf.mxu1  ;;  %v1444_v10 = vpop.f32.mrf.mxu0  ;;  %v3493_v63 = vor.u32 %v3492_v26, %v3489_v17  ;;  %v3581_v6 = vpack.c.b16 %v9312_v2, %v9309_v55  ;;  %v6960_v41 = vld [vmem:[%s8849_s12 + $0x30] sm:$0xf]  ;;  %3949 = vmatpush.bf16.msra.mxu2 %v7935_v61  ;;  %v2969_v17 = vshll.u32 %v9293_v22, 16  ;;  %v6868_v25 = vld [vmem:[%s8849_s12 + $0x38] sm:$0xe] }
 0x104   : > { %v895_v60 = vadd.f32 %v894_v15, %v9029_v42  ;;  %v9329_v49 = vpop.f32.mrf.mxu2  ;;  %v9339_v43 = vpop.f32.mrf.mxu3  ;;  %v2948_v42 = vrot.slane %v2946_v52, 4  ;;  %v3479_v53 = vor.u32 %v3478_v11, %v3475_v40  ;;  %v3501_v52 = vshrl.u32 %v7006_v31, 16 }
 0x105   : > { %v3504_v15 = vshll.u32 %v7006_v31, 16  ;;  %v9376_v40 = vrot.slane %v3482_v58, 5  ;;  %v9384_v11 = vrot.slane %v3493_v63, 4  ;;  %v6961_v9 = vor.u32 %v7902_v46, %v6960_v41  ;;  %v6869_v31 = vld [vmem:[%s8849_s12 + $0x40] sm:$0xe]  ;;  %v7946_v63 = vld [vmem:[%s10534_s3 + $0x4f0] sm:$0xff] }
 0x106   : > { %v1073_v23 = vadd.f32 %v9209_v48, %v895_v60  ;;  %v3496_v48 = vshll.u32 %v9342_v33, 16  ;;  %v2952_v0 = vor.u32 %v2951_v29, %v2948_v42  ;;  %v2966_v42 = vor.u32 %v2965_v7, %v2962_v12  ;;  %v9400_v29 = vld [vmem:[%s8849_s12 + $0x3c] sm:$0x1]  ;;  %v9427_v12 = vld [vmem:[%s8849_s12 + $0x34] sm:$0x1] }
 0x107   : > { %v3503_v47 = vrot.slane %v3501_v52, 4  ;;  %v3506_v45 = vrot.slane %v3504_v15, 5  ;;  %v2930_v58 = vsel %vm8344_vm2, %v9337_v54, %v9345_v50  ;;  %v6876_v52 = vrot.slane %v6868_v25, 9  ;;  %v7934_v41 = vld [vmem:[%s10534_s3 + $0x490] sm:$0xff] }
 0x108   : > { %v1208_v62 = vadd.f32 %v9211_v57, %v1073_v23  ;;  %v3026_v57 = vpack.c.b16 %v9288_v14, %v9278_v24  ;;  %v7947_v24 = vld [vmem:[%s10534_s3 + $0x4f8] sm:$0xff]  ;;  %v3515_v14 = vshrl.u32 %v7008_v20, 16  ;;  %v3498_v60 = vrot.slane %v3496_v48, 5  ;;  %v9424_v48 = vld [vmem:[%s8849_s12 + $0x44] sm:$0x1]  ;;  %3950 = vmatpush.bf16.msra.mxu2 %v7934_v41  ;;  %v7922_v25 = vld [vmem:[%s10534_s3 + $0x450] sm:$0xff] }
 0x109   : > { %4191 = vmatpush.bf16.msra.mxu3 %v7947_v24  ;;  %v9395_v27 = vrot.slane %v2952_v0, 4  ;;  %v7923_v23 = vld [vmem:[%s10534_s3 + $0x458] sm:$0xff]  ;;  %v2967_v7 = vrot.slane %v2966_v42, 4  ;;  %v3173_v61 = vrot.slane %v9424_v48, 5  ;;  %v3507_v46 = vor.u32 %v3506_v45, %v3503_v47  ;;  %v6812_v45 = vld [vmem:[%s8849_s12 + $0x40] sm:$0xf] }
 0x10a   : > { %v9363_v8 = vadd.f32 %v1444_v10, %v1208_v62  ;;  %v9374_v10 = vrot.slane %v3479_v53, 4  ;;  %v3518_v53 = vshll.u32 %v7008_v20, 16  ;;  %v3517_v54 = vrot.slane %v3515_v14, 4  ;;  %3815 = vmatpush.bf16.msrb.mxu1 %v7923_v23  ;;  %v9436_v20 = vld [vmem:[%s8849_s12 + $0x3c] sm:$0x1] }
 0x10b   : > { %v1601_v1 = vpop.f32.mrf.mxu1  ;;  %v2156_v38 = vpop.f32.mrf.mxu0  ;;  %v3510_v15 = vshll.u32 %v9427_v12, 16  ;;  %v7955_v24 = vld [vmem:[%s10534_s3 + $0x538] sm:$0xff] }
 0x10c   : > { %v1621_v55 = vadd.f32 %v1601_v1, %v9080_v56  ;;  %v9382_v2 = vpop.f32.mrf.mxu2  ;;  %v9393_v26 = vpop.f32.mrf.mxu3  ;;  %v9397_v56 = vrot.slane %v2955_v37, 5  ;;  %v3485_v62 = vsel %vm8344_vm2, %v9374_v10, %v9376_v40  ;;  %v3520_v0 = vrot.slane %v3518_v53, 5  ;;  %v6810_v37 = vld [vmem:[%s8849_s12 + $0x38] sm:$0xf]  ;;  %4365 = vmatpush.bf16.msrb.mxu0 %v7955_v24 }
 0x10d   : > { %4192 = vmatpush.bf16.msra.mxu3 %v7946_v63  ;;  %v3524_v40 = vshll.u32 %v9436_v20, 16  ;;  %v2974_v14 = vshrl.u32 %v6810_v37, 16  ;;  %v7944_v63 = vld [vmem:[%s10534_s3 + $0x4e0] sm:$0xff] }
 0x10e   : > { %3090 = vmatmul.bf16.vlgmr.msra.gmra.mxu1 %v3026_v57  ;;  %v1756_v22 = vadd.f32 %v9247_v36, %v1621_v55  ;;  %3645 = vmatmul.bf16.vlgmr.msra.gmra.mxu0 %v3581_v6  ;;  %v2944_v36 = vsel %vm8344_vm2, %v9347_v18, %v9349_v3  ;;  %v3499_v18 = vsel %vm8344_vm2, %v9384_v11, %v3498_v60  ;;  %v9433_v3 = vrot.slane %v2969_v17, 5 }
 0x10f   : > { %v3169_v57 = vrot.slane %v9400_v29, 5  ;;  %v6877_v6 = vrot.slane %v6869_v31, 9  ;;  %v3521_v10 = vor.u32 %v3520_v0, %v3517_v54  ;;  %v2977_v55 = vshll.u32 %v6810_v37, 16  ;;  %3816 = vmatpush.bf16.msrb.mxu1 %v7922_v25  ;;  %v7954_v54 = vld [vmem:[%s10534_s3 + $0x530] sm:$0xff] }
 0x110   : > { %v2002_v50 = vadd.f32 %v9255_v28, %v1756_v22  ;;  %3409 = vmatmul.bf16.gmra.mxu3 %v6961_v9  ;;  %v9456_v60 = vunpack.c.l.b16 %v2930_v58  ;;  %v9458_v17 = vunpack.c.l.b16 %v2944_v36  ;;  %v9460_v9 = vunpack.c.l.b16 %v3485_v62  ;;  %4366 = vmatpush.bf16.msrb.mxu0 %v7954_v54 }
 0x111   : > { %3274 = vmatmul.bf16.gmra.mxu2 %v3202_v39  ;;  %v9467_v22 = vunpack.c.l.b16 %v3499_v18  ;;  %v2972_v23 = vsel %vm8344_vm2, %v2967_v7, %v9433_v3  ;;  %v3170_v47 = vsel %vm8408_vm5, %v6876_v52, %v3169_v57  ;;  %v3512_v58 = vrot.slane %v3510_v15, 5 }
 0x112   : > { %v9441_v28 = vadd.f32 %v2156_v38, %v2002_v50  ;;  %v7945_v38 = vld [vmem:[%s10534_s3 + $0x4e8] sm:$0xff]  ;;  %v3522_v36 = vrot.slane %v3521_v10, 4  ;;  %v3526_v62 = vrot.slane %v3524_v40, 5  ;;  %v2976_v50 = vrot.slane %v2974_v14, 4 }
 0x113   : > { %v1603_v1 = vpop.f32.mrf.mxu1  ;;  %v2158_v39 = vpop.f32.mrf.mxu0  ;;  %4193 = vmatpush.bf16.msra.mxu3 %v7945_v38  ;;  %v2979_v18 = vrot.slane %v2977_v55, 5  ;;  %v2988_v3 = vshrl.u32 %v6812_v45, 16  ;;  %v2991_v0 = vshll.u32 %v6812_v45, 16  ;;  %v3027_v37 = vpack.c.b16 %v9458_v17, %v9456_v60  ;;  %v7012_v10 = vld [vmem:[%s8849_s12 + $0x48] sm:$0xf] }
 0x114   : > { %v1622_v11 = vadd.f32 %v1603_v1, %v9125_v21  ;;  %v9462_v42 = vpop.f32.mrf.mxu2  ;;  %v2958_v21 = vsel %vm8344_vm2, %v9395_v27, %v9397_v56  ;;  %v9476_v31 = vpop.f32.mrf.mxu3  ;;  %v3174_v27 = vsel %vm8408_vm5, %v6877_v6, %v3173_v61  ;;  %v3508_v56 = vrot.slane %v3507_v46, 4  ;;  %v7010_v6 = vld [vmem:[%s8849_s12 + $0x40] sm:$0xf]  ;;  %v7903_v14 = vld [vmem:[%s8849_s12 + $0x44] sm:$0xf0] }
 0x115   : > { %v3582_v7 = vpack.c.b16 %v9467_v22, %v9460_v9  ;;  %v3198_v52 = vunpack.c.l.b16 %v3170_v47  ;;  %v3199_v57 = vunpack.c.l.b16 %v3174_v27  ;;  %v9507_v41 = vunpack.c.l.b16 %v2958_v21  ;;  %v6964_v1 = vld [vmem:[%s8849_s12 + $0x40] sm:$0xf]  ;;  %v7953_v55 = vld [vmem:[%s10534_s3 + $0x528] sm:$0xff] }
 0x116   : > { %v1757_v53 = vadd.f32 %v9286_v19, %v1622_v11  ;;  %v9509_v46 = vunpack.c.l.b16 %v2972_v23  ;;  %v3513_v15 = vsel %vm8344_vm2, %v3508_v56, %v3512_v58  ;;  %v3527_v24 = vsel %vm8344_vm2, %v3522_v36, %v3526_v62  ;;  %4367 = vmatpush.bf16.msrb.mxu0 %v7953_v55  ;;  %v7921_v36 = vld [vmem:[%s10534_s3 + $0x448] sm:$0xff] }
 0x117   : > { %4194 = vmatpush.bf16.msra.mxu3 %v7944_v63  ;;  %v2980_v11 = vor.u32 %v2979_v18, %v2976_v50  ;;  %v2983_v60 = vshll.u32 %v9400_v29, 16  ;;  %v2997_v17 = vshll.u32 %v9424_v48, 16  ;;  %v2990_v22 = vrot.slane %v2988_v3, 4  ;;  %v7932_v29 = vld [vmem:[%s10534_s3 + $0x480] sm:$0xff]  ;;  %3817 = vmatpush.bf16.msrb.mxu1 %v7921_v36  ;;  %v9582_v55 = vld [vmem:[%s9529_s15 + $0xc] sm:$0x1] }
 0x118   : > { %v2003_v19 = vadd.f32 %v9299_v34, %v1757_v53  ;;  %v7933_v34 = vld [vmem:[%s10534_s3 + $0x488] sm:$0xff]  ;;  %v2993_v21 = vrot.slane %v2991_v0, 5  ;;  %v3529_v23 = vshrl.u32 %v7010_v6, 16  ;;  %v3203_v47 = vpack.c.b16 %v3199_v57, %v3198_v52  ;;  %v3982_v63 = vld [vmem:[%s9529_s15] sm:$0xf] }
 0x119   : > { %3951 = vmatpush.bf16.msra.mxu2 %v7933_v34  ;;  %v9534_v45 = vunpack.c.l.b16 %v3513_v15  ;;  %v3532_v48 = vshll.u32 %v7010_v6, 16  ;;  %v3543_v27 = vshrl.u32 %v7012_v10, 16  ;;  %v9542_v56 = vunpack.c.l.b16 %v3527_v24  ;;  %v3984_v57 = vld [vmem:[%s9529_s15 + $0x8] sm:$0xf]  ;;  %v9568_v6 = vld [vmem:[%s8849_s12 + $0x4c] sm:$0x1] }
 0x11a   : > { %v9505_v61 = vadd.f32 %v2158_v39, %v2003_v19  ;;  %v7943_v39 = vld [vmem:[%s10534_s3 + $0x4d8] sm:$0xff]  ;;  %v6965_v58 = vor.u32 %v7903_v14, %v6964_v1  ;;  %v3546_v62 = vshll.u32 %v7012_v10, 16  ;;  %v9548_v54 = vrot.slane %v2980_v11, 4  ;;  %v7952_v19 = vld [vmem:[%s10534_s3 + $0x520] sm:$0xff] }
 0x11b   : > { %v1606_v40 = vpop.f32.mrf.mxu1  ;;  %v2161_v38 = vpop.f32.mrf.mxu0  ;;  %4195 = vmatpush.bf16.msra.mxu3 %v7943_v39  ;;  %v9550_v50 = vrot.slane %v2983_v60, 5  ;;  %v9552_v18 = vrot.slane %v2997_v17, 5  ;;  %v3999_v3 = vshrl.u32 %v3982_v63, 16  ;;  %v9564_v52 = vrot.slane %v3529_v23, 4  ;;  %4368 = vmatpush.bf16.msrb.mxu0 %v7952_v19  ;;  %v9579_v39 = vld [vmem:[%s9529_s15 + $0x4] sm:$0x1] }
 0x11c   : > { %v1623_v9 = vadd.f32 %v1606_v40, %v9162_v59  ;;  %v9532_v25 = vpop.f32.mrf.mxu2  ;;  %v9536_v53 = vpop.f32.mrf.mxu3  ;;  %v4002_v34 = vshll.u32 %v3982_v63, 16  ;;  %v9570_v15 = vrot.slane %v3532_v48, 5  ;;  %v9572_v1 = vrot.slane %v3543_v27, 4 }
 0x11d   : > { %3952 = vmatpush.bf16.msra.mxu2 %v7932_v29  ;;  %v4001_v10 = vrot.slane %v3999_v3, 4  ;;  %v3028_v24 = vpack.c.b16 %v9509_v46, %v9507_v41  ;;  %v3548_v14 = vrot.slane %v3546_v62, 5  ;;  %v4016_v23 = vshll.u32 %v3984_v57, 16 }
 0x11e   : > { %3095 = vmatmul.bf16.gmra.mxu1 %v3027_v37  ;;  %v1758_v59 = vadd.f32 %v9329_v49, %v1623_v9  ;;  %3650 = vmatmul.bf16.gmra.mxu0 %v3582_v7  ;;  %v7942_v49 = vld [vmem:[%s10534_s3 + $0x4d0] sm:$0xff]  ;;  %v2994_v37 = vor.u32 %v2993_v21, %v2990_v22  ;;  %v9562_v7 = vld [vmem:[%s8849_s12 + $0x44] sm:$0x1]  ;;  %v4004_v11 = vrot.slane %v4002_v34, 5  ;;  %v7941_v9 = vld [vmem:[%s10534_s3 + $0x4c8] sm:$0xff]  ;;  %v4008_v22 = vshll.u32 %v9579_v39, 16 }
 0x11f   : > { %4196 = vmatpush.bf16.msra.mxu3 %v7942_v49  ;;  %v3583_v48 = vpack.c.b16 %v9542_v56, %v9534_v45  ;;  %v3538_v63 = vshll.u32 %v9562_v7, 16  ;;  %v4018_v45 = vrot.slane %v4016_v23, 5  ;;  %v3535_v19 = vor.u32 %v9570_v15, %v9564_v52  ;;  %v7940_v34 = vld [vmem:[%s10534_s3 + $0x4c0] sm:$0xff] }
 0x120   : > { %v2004_v0 = vadd.f32 %v9339_v43, %v1758_v59  ;;  %v4013_v43 = vshrl.u32 %v3984_v57, 16  ;;  %3414 = vmatmul.bf16.gmra.mxu3 %v6965_v58  ;;  %v9597_v59 = vrot.slane %v2994_v37, 4  ;;  %v7920_v58 = vld [vmem:[%s10534_s3 + $0x440] sm:$0xff]  ;;  %v4005_v36 = vor.u32 %v4004_v11, %v4001_v10  ;;  %v7062_v37 = vld [vmem:[%s8849_s12 + $0x10] sm:$0xe] }
 0x121   : > { %3279 = vmatmul.bf16.gmra.mxu2 %v3203_v47  ;;  %v4022_v47 = vshll.u32 %v9582_v55, 16  ;;  %v4010_v49 = vrot.slane %v4008_v22, 5  ;;  %v3549_v3 = vor.u32 %v3548_v14, %v9572_v1  ;;  %3818 = vmatpush.bf16.msrb.mxu1 %v7920_v58  ;;  %v7063_v57 = vld [vmem:[%s8849_s12 + $0x18] sm:$0xe]  ;;  %v7950_v10 = vld [vmem:[%s10534_s3 + $0x510] sm:$0xff]  ;;  %v7070_v52 = vrot.slane %v7062_v37, 9 }
 0x122   : > { %v9574_v40 = vadd.f32 %v2161_v38, %v2004_v0  ;;  %v7951_v38 = vld [vmem:[%s10534_s3 + $0x518] sm:$0xff]  ;;  %v4015_v21 = vrot.slane %v4013_v43, 4  ;;  %v4006_v0 = vrot.slane %v4005_v36, 4  ;;  %v3700_v15 = vrot.slane %v9233_v51, 5 }
 0x123   : > { %v1608_v60 = vpop.f32.mrf.mxu1  ;;  %v2163_v17 = vpop.f32.mrf.mxu0  ;;  %4197 = vmatpush.bf16.msra.mxu3 %v7941_v9  ;;  %4369 = vmatpush.bf16.msrb.mxu0 %v7951_v38  ;;  %v4024_v43 = vrot.slane %v4022_v47, 5  ;;  %v7071_v11 = vrot.slane %v7063_v57, 9  ;;  %v3540_v9 = vrot.slane %v3538_v63, 5  ;;  %v7144_v47 = vld [vmem:[%s9529_s15] sm:$0xf]  ;;  %v7975_v51 = vld [vmem:[%s10534_s3 + $0x5b8] sm:$0xff] }
 0x124   : > { %v1624_v29 = vadd.f32 %v1608_v60, %v9197_v30  ;;  %v9595_v27 = vpop.f32.mrf.mxu2  ;;  %v9602_v62 = vpop.f32.mrf.mxu3  ;;  %v3552_v30 = vshll.u32 %v9568_v6, 16  ;;  %v4011_v14 = vsel %vm8344_vm2, %v4006_v0, %v4010_v49  ;;  %v3704_v60 = vrot.slane %v9242_v16, 5  ;;  %4746 = vmatpush.bf16.msrb.mxu2 %v7975_v51 }
 0x125   : > { %v3701_v23 = vsel %vm8408_vm5, %v7070_v52, %v3700_v15  ;;  %v3550_v49 = vrot.slane %v3549_v3, 4  ;;  %v3988_v52 = vld [vmem:[%s9529_s15 + $0x18] sm:$0xf] }
 0x126   : > { %v1759_v56 = vadd.f32 %v9382_v2, %v1624_v29  ;;  %v4019_v2 = vor.u32 %v4018_v45, %v4015_v21  ;;  %v3554_v38 = vrot.slane %v3552_v30, 5  ;;  %v7928_v29 = vld [vmem:[%s9529_s15 + $0x4] sm:$0xf0]  ;;  %v3705_v16 = vsel %vm8408_vm5, %v7071_v11, %v3704_v60 }
 0x127   : > { %4198 = vmatpush.bf16.msra.mxu3 %v7940_v34  ;;  %4370 = vmatpush.bf16.msrb.mxu0 %v7950_v10  ;;  %v3747_v58 = vunpack.c.l.b16 %v3701_v23  ;;  %v3536_v30 = vrot.slane %v3535_v19, 4  ;;  %v7949_v45 = vld [vmem:[%s10534_s3 + $0x508] sm:$0xff]  ;;  %v2986_v19 = vsel %vm8344_vm2, %v9548_v54, %v9550_v50  ;;  %v7145_v3 = vor.u32 %v7928_v29, %v7144_v47  ;;  %v7967_v54 = vld [vmem:[%s10534_s3 + $0x578] sm:$0xff]  ;;  %v3986_v50 = vld [vmem:[%s9529_s15 + $0x10] sm:$0xf] }
 0x128   : > { %v2005_v1 = vadd.f32 %v9393_v26, %v1759_v56  ;;  %v4020_v22 = vrot.slane %v4019_v2, 4  ;;  %v4127_v26 = vunpack.c.l.b16 %v4011_v14  ;;  %v3748_v56 = vunpack.c.l.b16 %v3705_v16  ;;  %4500 = vmatpush.bf16.msra.mxu1 %v7967_v54  ;;  %v7065_v54 = vld [vmem:[%s8849_s12 + $0x28] sm:$0xe] }
 0x129   : > { %v3000_v2 = vsel %vm8344_vm2, %v9597_v59, %v9552_v18  ;;  %v3541_v15 = vsel %vm8344_vm2, %v3536_v30, %v3540_v9  ;;  %v3555_v41 = vsel %vm8344_vm2, %v3550_v49, %v3554_v38  ;;  %v4027_v46 = vshrl.u32 %v3986_v50, 16  ;;  %v9685_v38 = vld [vmem:[%s9529_s15 + $0x14] sm:$0x1] }
 0x12a   : > { %v9625_v21 = vadd.f32 %v2163_v17, %v2005_v1  ;;  %v4025_v17 = vsel %vm8344_vm2, %v4020_v22, %v4024_v43  ;;  %v9648_v10 = vpack.c.b16 %v3748_v56, %v3747_v58  ;;  %v4030_v1 = vshll.u32 %v3986_v50, 16  ;;  %v9688_v22 = vld [vmem:[%s9529_s15 + $0x1c] sm:$0x1]  ;;  %v4228_v56 = vld [vmem:[%s9529_s15] sm:$0xe] }
 0x12b   : > { %v1611_v36 = vpop.f32.mrf.mxu1  ;;  %v2166_v63 = vpop.f32.mrf.mxu0  ;;  %v4128_v57 = vunpack.c.l.b16 %v4025_v17  ;;  %4371 = vmatpush.bf16.msrb.mxu0 %v7949_v45  ;;  %v4029_v59 = vrot.slane %v4027_v46, 4  ;;  %v4041_v14 = vshrl.u32 %v3988_v52, 16  ;;  %v9677_v60 = vunpack.c.l.b16 %v3541_v15 }
 0x12c   : > { %v1625_v0 = vadd.f32 %v1611_v36, %v9236_v13  ;;  %v9640_v37 = vpop.f32.mrf.mxu2  ;;  %v9646_v34 = vpop.f32.mrf.mxu3  ;;  %v9679_v9 = vunpack.c.l.b16 %v3555_v41  ;;  %v4044_v23 = vshll.u32 %v3988_v52, 16  ;;  %v4032_v51 = vrot.slane %v4030_v1, 5 }
 0x12d   : > { %v4135_v43 = vpack.c.b16 %v4128_v57, %v4127_v26  ;;  %v4036_v26 = vshll.u32 %v9685_v38, 16  ;;  %v4043_v16 = vrot.slane %v4041_v14, 4  ;;  %v4050_v49 = vshll.u32 %v9688_v22, 16 }
 0x12e   : > { %3100 = vmatmul.bf16.gmra.mxu1 %v3028_v24  ;;  %v1760_v13 = vadd.f32 %v9462_v42, %v1625_v0  ;;  %3655 = vmatmul.bf16.gmra.mxu0 %v3583_v48  ;;  %v7948_v42 = vld [vmem:[%s10534_s3 + $0x500] sm:$0xff]  ;;  %v9671_v24 = vunpack.c.l.b16 %v2986_v19  ;;  %v9673_v48 = vunpack.c.l.b16 %v3000_v2  ;;  %v4046_v30 = vrot.slane %v4044_v23, 5  ;;  %v4229_v0 = vld [vmem:[%s9529_s15 + $0x8] sm:$0xe] }
 0x12f   : > { %4372 = vmatpush.bf16.msrb.mxu0 %v7948_v42  ;;  %v4038_v57 = vrot.slane %v4036_v26, 5  ;;  %v4052_v2 = vrot.slane %v4050_v49, 5  ;;  %v3708_v15 = vrot.slane %v9332_v4, 5  ;;  %v7073_v41 = vrot.slane %v7065_v54, 9  ;;  %v7929_v4 = vld [vmem:[%s9529_s15 + $0x14] sm:$0xf0] }
 0x130   : > { %v2006_v18 = vadd.f32 %v9476_v31, %v1760_v13  ;;  %4199 = vmatmul.bf16.vlgmr.msra.gmra.mxu3 %v4135_v43  ;;  %v7974_v31 = vld [vmem:[%s10534_s3 + $0x5b0] sm:$0xff]  ;;  %v3029_v17 = vpack.c.b16 %v9673_v48, %v9671_v24  ;;  %v4047_v13 = vor.u32 %v4046_v30, %v4043_v16  ;;  %v7064_v43 = vld [vmem:[%s8849_s12 + $0x20] sm:$0xe]  ;;  %v7238_v46 = vrot.slane %v4228_v56, 9 }
 0x131   : > { %3953 = vmatmul.bf16.vlgmr.msra.gmra.mxu2 %v7145_v3  ;;  %v3584_v3 = vpack.c.b16 %v9679_v9, %v9677_v60  ;;  %v7072_v52 = vrot.slane %v7064_v43, 9  ;;  %v4254_v24 = vrot.slane %v9579_v39, 5  ;;  %v7239_v48 = vrot.slane %v4229_v0, 9  ;;  %v7148_v60 = vld [vmem:[%s9529_s15 + $0x10] sm:$0xf]  ;;  %v7965_v0 = vld [vmem:[%s10534_s3 + $0x568] sm:$0xff] }
 0x132   : > { %v9675_v11 = vadd.f32 %v2166_v63, %v2006_v18  ;;  %4747 = vmatpush.bf16.msrb.mxu2 %v7974_v31  ;;  %v7966_v63 = vld [vmem:[%s10534_s3 + $0x570] sm:$0xff]  ;;  %v4048_v18 = vrot.slane %v4047_v13, 4 }
 0x133   : > { %v1613_v47 = vpop.f32.mrf.mxu1  ;;  %v2168_v29 = vpop.f32.mrf.mxu0  ;;  %4501 = vmatpush.bf16.msra.mxu1 %v7966_v63  ;;  %v3709_v1 = vsel %vm8408_vm5, %v7072_v52, %v3708_v15  ;;  %v7149_v63 = vor.u32 %v7929_v4, %v7148_v60  ;;  %v7972_v15 = vld [vmem:[%s10534_s3 + $0x5a0] sm:$0xff] }
 0x134   : > { %v1626_v58 = vadd.f32 %v1613_v47, %v9270_v5  ;;  %v9692_v36 = vpop.f32.mrf.mxu2  ;;  %v9700_v45 = vpop.f32.mrf.mxu3  ;;  %v4033_v5 = vor.u32 %v4032_v51, %v4029_v59  ;;  %v4258_v47 = vrot.slane %v9582_v55, 5  ;;  %v3749_v51 = vunpack.c.l.b16 %v3709_v1  ;;  %v7964_v4 = vld [vmem:[%s10534_s3 + $0x560] sm:$0xff] }
 0x136   : > { %v1761_v19 = vadd.f32 %v9532_v25, %v1626_v58  ;;  %v4034_v50 = vrot.slane %v4033_v5, 4  ;;  %v3712_v25 = vrot.slane %v9342_v33, 5  ;;  %v4053_v33 = vsel %vm8344_vm2, %v4048_v18, %v4052_v2 }
 0x137   : > { %v4255_v5 = vsel %vm8408_vm5, %v7238_v46, %v4254_v24  ;;  %4502 = vmatpush.bf16.msra.mxu1 %v7965_v0 }
 0x138   : > { %v2007_v42 = vadd.f32 %v9536_v53, %v1761_v19  ;;  %v4039_v59 = vsel %vm8344_vm2, %v4034_v50, %v4038_v57  ;;  %v7973_v53 = vld [vmem:[%s10534_s3 + $0x5a8] sm:$0xff]  ;;  %v3713_v39 = vsel %vm8408_vm5, %v7073_v41, %v3712_v25  ;;  %v4259_v57 = vsel %vm8408_vm5, %v7239_v48, %v4258_v47  ;;  %v9755_v41 = vld [vmem:[%s9529_s15 + $0x24] sm:$0x1] }
 0x139   : > { %v4129_v9 = vunpack.c.l.b16 %v4039_v59  ;;  %v3750_v26 = vunpack.c.l.b16 %v3713_v39  ;;  %4748 = vmatpush.bf16.msrb.mxu2 %v7973_v53  ;;  %v3992_v19 = vld [vmem:[%s9529_s15 + $0x28] sm:$0xf]  ;;  %v4301_v50 = vunpack.c.l.b16 %v4255_v5  ;;  %v4302_v52 = vunpack.c.l.b16 %v4259_v57 }
 0x13a   : > { %v9717_v14 = vadd.f32 %v2168_v29, %v2007_v42  ;;  %v4130_v29 = vunpack.c.l.b16 %v4053_v33  ;;  %v4069_v43 = vshrl.u32 %v3992_v19, 16  ;;  %v9758_v42 = vld [vmem:[%s9529_s15 + $0x2c] sm:$0x1]  ;;  %v4064_v59 = vshll.u32 %v9755_v41, 16 }
 0x13b   : > { %v1616_v31 = vpop.f32.mrf.mxu1  ;;  %v2171_v23 = vpop.f32.mrf.mxu0  ;;  %v9734_v49 = vpack.c.b16 %v3750_v26, %v3749_v51  ;;  %v4266_v51 = vrot.slane %v9688_v22, 5  ;;  %4503 = vmatpush.bf16.msra.mxu1 %v7964_v4 }
 0x13c   : > { %v1627_v16 = vadd.f32 %v1616_v31, %v9316_v35  ;;  %v9730_v58 = vpop.f32.mrf.mxu2  ;;  %v9732_v30 = vpop.f32.mrf.mxu3  ;;  %v4136_v55 = vpack.c.b16 %v4130_v29, %v4129_v9  ;;  %v3990_v35 = vld [vmem:[%s9529_s15 + $0x20] sm:$0xf]  ;;  %v4071_v53 = vrot.slane %v4069_v43, 4  ;;  %v4078_v9 = vshll.u32 %v9758_v42, 16 }
 0x13d   : > { %v4055_v13 = vshrl.u32 %v3990_v35, 16  ;;  %v4058_v2 = vshll.u32 %v3990_v35, 16  ;;  %4749 = vmatpush.bf16.msrb.mxu2 %v7972_v15  ;;  %v4262_v31 = vrot.slane %v9685_v38, 5  ;;  %v3716_v35 = vrot.slane %v9427_v12, 5  ;;  %v7930_v12 = vld [vmem:[%s9529_s15 + $0x24] sm:$0xf0] }
 0x13e   : > { %3105 = vmatmul.bf16.gmra.mxu1 %v3029_v17  ;;  %v1762_v56 = vadd.f32 %v9595_v27, %v1627_v16  ;;  %3660 = vmatmul.bf16.gmra.mxu0 %v3584_v3  ;;  %v4230_v27 = vld [vmem:[%s9529_s15 + $0x10] sm:$0xe]  ;;  %v4231_v3 = vld [vmem:[%s9529_s15 + $0x18] sm:$0xe]  ;;  %v4080_v16 = vrot.slane %v4078_v9, 5 }
 0x13f   : > { %v7240_v25 = vrot.slane %v4230_v27, 9  ;;  %v4057_v24 = vrot.slane %v4055_v13, 4  ;;  %v4060_v48 = vrot.slane %v4058_v2, 5  ;;  %v7152_v13 = vld [vmem:[%s9529_s15 + $0x20] sm:$0xf] }
 0x140   : > { %v2008_v17 = vadd.f32 %v9602_v62, %v1762_v56  ;;  %4204 = vmatmul.bf16.gmra.mxu3 %v4136_v55  ;;  %v4072_v62 = vshll.u32 %v3992_v19, 16  ;;  %v7067_v56 = vld [vmem:[%s8849_s12 + $0x38] sm:$0xe]  ;;  %v3720_v19 = vrot.slane %v9436_v20, 5 }
 0x141   : > { %3958 = vmatmul.bf16.gmra.mxu2 %v7149_v63  ;;  %v4061_v47 = vor.u32 %v4060_v48, %v4057_v24  ;;  %v7066_v63 = vld [vmem:[%s8849_s12 + $0x30] sm:$0xe]  ;;  %v7075_v5 = vrot.slane %v7067_v56, 9  ;;  %v4263_v22 = vsel %vm8408_vm5, %v7240_v25, %v4262_v31  ;;  %v7963_v31 = vld [vmem:[%s10534_s3 + $0x558] sm:$0xff] }
 0x142   : > { %v9749_v54 = vadd.f32 %v2171_v23, %v2008_v17  ;;  %v4074_v33 = vrot.slane %v4072_v62, 5  ;;  %v7241_v23 = vrot.slane %v4231_v3, 9  ;;  %v7074_v0 = vrot.slane %v7066_v63, 9  ;;  %4504 = vmatpush.bf16.msra.mxu1 %v7963_v31  ;;  %v7980_v31 = vld [vmem:[%s10534_s3 + $0x5e0] sm:$0xff] }
 0x143   : > { %v1618_v46 = vpop.f32.mrf.mxu1  ;;  %v2173_v18 = vpop.f32.mrf.mxu0  ;;  %v4062_v55 = vrot.slane %v4061_v47, 4  ;;  %v3721_v43 = vsel %vm8408_vm5, %v7075_v5, %v3720_v19  ;;  %v7982_v47 = vld [vmem:[%s10534_s3 + $0x5f0] sm:$0xff] }
 0x144   : > { %v1628_v1 = vadd.f32 %v1618_v46, %v9363_v8  ;;  %v9762_v60 = vpop.f32.mrf.mxu2  ;;  %v9768_v39 = vpop.f32.mrf.mxu3  ;;  %v4066_v8 = vrot.slane %v4064_v59, 5  ;;  %v4075_v26 = vor.u32 %v4074_v33, %v4071_v53  ;;  %v3717_v27 = vsel %vm8408_vm5, %v7074_v0, %v3716_v35  ;;  %v7983_v46 = vld [vmem:[%s10534_s3 + $0x5f8] sm:$0xff]  ;;  %v9832_v0 = vld [vmem:[%s9529_s15 + $0x34] sm:$0x1] }
 0x145   : > { %v4267_v15 = vsel %vm8408_vm5, %v7241_v23, %v4266_v51  ;;  %v3752_v25 = vunpack.c.l.b16 %v3721_v43  ;;  %v7153_v59 = vor.u32 %v7930_v12, %v7152_v13  ;;  %4920 = vmatpush.bf16.msrb.mxu3 %v7983_v46  ;;  %v4303_v33 = vunpack.c.l.b16 %v4263_v22  ;;  %v3994_v23 = vld [vmem:[%s9529_s15 + $0x30] sm:$0xf]  ;;  %v9822_v51 = vld [vmem:[%s9529_s15 + $0x28] sm:$0xe]  ;;  %v9835_v35 = vld [vmem:[%s9529_s15 + $0x3c] sm:$0x1] }
 0x146   : > { %v1763_v29 = vadd.f32 %v9640_v37, %v1628_v1  ;;  %v4076_v57 = vrot.slane %v4075_v26, 4  ;;  %v4309_v37 = vpack.c.b16 %v4302_v52, %v4301_v50  ;;  %v4067_v17 = vsel %vm8344_vm2, %v4062_v55, %v4066_v8  ;;  %v7995_v22 = vld [vmem:[%s10534_s3 + $0x638] sm:$0xff]  ;;  %v7368_v46 = vld [vmem:[%s9529_s15 + $0x10] sm:$0xf] }
 0x147   : > { %v4131_v2 = vunpack.c.l.b16 %v4067_v17  ;;  %v4304_v9 = vunpack.c.l.b16 %v4267_v15  ;;  %v4083_v8 = vshrl.u32 %v3994_v23, 16  ;;  %5055 = vmatpush.bf16.msra.mxu0 %v7995_v22 }
 0x148   : > { %v2009_v38 = vadd.f32 %v9646_v34, %v1763_v29  ;;  %v7971_v34 = vld [vmem:[%s10534_s3 + $0x598] sm:$0xff]  ;;  %v4081_v20 = vsel %vm8344_vm2, %v4076_v57, %v4080_v16  ;;  %v4086_v16 = vshll.u32 %v3994_v23, 16  ;;  %v7994_v23 = vld [vmem:[%s10534_s3 + $0x630] sm:$0xff] }
 0x149   : > { %v4132_v62 = vunpack.c.l.b16 %v4081_v20  ;;  %4750 = vmatpush.bf16.msrb.mxu2 %v7971_v34  ;;  %v3996_v29 = vld [vmem:[%s9529_s15 + $0x38] sm:$0xf]  ;;  %4921 = vmatpush.bf16.msrb.mxu3 %v7982_v47  ;;  %v4085_v26 = vrot.slane %v4083_v8, 4  ;;  %v9826_v55 = vpack.c.b16 %v4304_v9, %v4303_v33  ;;  %v4270_v20 = vrot.slane %v9755_v41, 5  ;;  %v7068_v9 = vld [vmem:[%s8849_s12 + $0x40] sm:$0xe] }
 0x14a   : > { %v9784_v3 = vadd.f32 %v2173_v18, %v2009_v38  ;;  %v3751_v18 = vunpack.c.l.b16 %v3717_v27  ;;  %v4097_v63 = vshrl.u32 %v3996_v29, 16  ;;  %v4100_v5 = vshll.u32 %v3996_v29, 16 }
 0x14b   : > { %v2290_v50 = vpop.f32.mrf.mxu1  ;;  %v2845_v52 = vpop.f32.mrf.mxu0  ;;  %v4088_v17 = vrot.slane %v4086_v16, 5  ;;  %v4092_v27 = vshll.u32 %v9832_v0, 16  ;;  %v7076_v8 = vrot.slane %v7068_v9, 9  ;;  %v3728_v16 = vrot.slane %v9568_v6, 5  ;;  %5056 = vmatpush.bf16.msra.mxu0 %v7994_v23  ;;  %v7156_v6 = vld [vmem:[%s9529_s15 + $0x30] sm:$0xf] }
 0x14c   : > { %v2310_v24 = vadd.f32 %v2290_v50, %v9441_v28  ;;  %v9801_v48 = vpop.f32.mrf.mxu2  ;;  %v9803_v1 = vpop.f32.mrf.mxu3  ;;  %v9805_v4 = vpack.c.b16 %v3752_v25, %v3751_v18  ;;  %v4137_v28 = vpack.c.b16 %v4132_v62, %v4131_v2  ;;  %v4099_v13 = vrot.slane %v4097_v63, 4  ;;  %v7962_v2 = vld [vmem:[%s10534_s3 + $0x550] sm:$0xff] }
 0x14d   : > { %v4102_v43 = vrot.slane %v4100_v5, 5  ;;  %v4106_v50 = vshll.u32 %v9835_v35, 16  ;;  %v4094_v62 = vrot.slane %v4092_v27, 5  ;;  %4505 = vmatpush.bf16.msra.mxu1 %v7962_v2  ;;  %v4568_v63 = vshrl.u32 %v7368_v46, 16  ;;  %v9889_v2 = vld [vmem:[%s9529_s15 + $0x14] sm:$0x1] }
 0x14e   : > { %3819 = vmatmul.bf16.vlgmr.msrb.gmra.mxu1 %v9648_v10  ;;  %v2556_v53 = vadd.f32 %v9692_v36, %v2310_v24  ;;  %4373 = vmatmul.bf16.vlgmr.msrb.gmra.mxu0 %v4309_v37  ;;  %v9818_v36 = vld [vmem:[%s9529_s15 + $0x20] sm:$0xe]  ;;  %v7981_v37 = vld [vmem:[%s10534_s3 + $0x5e8] sm:$0xff]  ;;  %v4274_v23 = vrot.slane %v9758_v42, 5 }
 0x14f   : > { %v7242_v19 = vrot.slane %v9818_v36, 9  ;;  %4922 = vmatpush.bf16.msrb.mxu3 %v7981_v37  ;;  %v4108_v33 = vrot.slane %v4106_v50, 5  ;;  %v4570_v9 = vrot.slane %v4568_v63, 4  ;;  %v7961_v42 = vld [vmem:[%s10534_s3 + $0x548] sm:$0xff] }
 0x150   : > { %v2730_v10 = vadd.f32 %v9700_v45, %v2556_v53  ;;  %4209 = vmatmul.bf16.gmra.mxu3 %v4137_v28  ;;  %v7970_v45 = vld [vmem:[%s10534_s3 + $0x590] sm:$0xff]  ;;  %v4103_v53 = vor.u32 %v4102_v43, %v4099_v13  ;;  %v7069_v28 = vld [vmem:[%s8849_s12 + $0x48] sm:$0xe] }
 0x151   : > { %3963 = vmatmul.bf16.gmra.mxu2 %v7153_v59  ;;  %v7243_v59 = vrot.slane %v9822_v51, 9  ;;  %4506 = vmatpush.bf16.msra.mxu1 %v7961_v42  ;;  %v7977_v36 = vld [vmem:[%s10534_s3 + $0x5c8] sm:$0xff]  ;;  %v7991_v51 = vld [vmem:[%s10534_s3 + $0x618] sm:$0xff]  ;;  %v4234_v42 = vld [vmem:[%s9529_s15 + $0x30] sm:$0xe] }
 0x152   : > { %v9824_v56 = vadd.f32 %v2845_v52, %v2730_v10  ;;  %4751 = vmatpush.bf16.msrb.mxu2 %v7970_v45  ;;  %v7366_v52 = vld [vmem:[%s9529_s15 + $0x8] sm:$0xf]  ;;  %v7077_v10 = vrot.slane %v7069_v28, 9  ;;  %v4571_v28 = vshll.u32 %v7368_v46, 16 }
 0x153   : > { %v2292_v38 = vpop.f32.mrf.mxu1  ;;  %v2847_v57 = vpop.f32.mrf.mxu0  ;;  %v4554_v18 = vshrl.u32 %v7366_v52, 16  ;;  %v4557_v25 = vshll.u32 %v7366_v52, 16  ;;  %4923 = vmatpush.bf16.msrb.mxu3 %v7980_v31  ;;  %v7969_v45 = vld [vmem:[%s10534_s3 + $0x588] sm:$0xff] }
 0x154   : > { %v2311_v12 = vadd.f32 %v2292_v38, %v9505_v61  ;;  %v9846_v34 = vpop.f32.mrf.mxu2  ;;  %v9854_v15 = vpop.f32.mrf.mxu3  ;;  %v4089_v61 = vor.u32 %v4088_v17, %v4085_v26  ;;  %v4104_v26 = vrot.slane %v4103_v53, 4  ;;  %v9878_v38 = vld [vmem:[%s9529_s15 + $0xc] sm:$0x1]  ;;  %v7931_v17 = vld [vmem:[%s9529_s15 + $0x34] sm:$0xf0] }
 0x155   : > { %v4559_v37 = vrot.slane %v4557_v25, 5  ;;  %v7157_v31 = vor.u32 %v7931_v17, %v7156_v6 }
 0x156   : > { %v2557_v24 = vadd.f32 %v9730_v58, %v2311_v12  ;;  %v4090_v47 = vrot.slane %v4089_v61, 4  ;;  %v3724_v58 = vrot.slane %v9562_v7, 5  ;;  %v4109_v27 = vsel %vm8344_vm2, %v4104_v26, %v4108_v33  ;;  %4752 = vmatpush.bf16.msrb.mxu2 %v7969_v45  ;;  %v7993_v61 = vld [vmem:[%s10534_s3 + $0x628] sm:$0xff]  ;;  %v7978_v26 = vld [vmem:[%s10534_s3 + $0x5d0] sm:$0xff] }
 0x157   : > { %v3729_v12 = vsel %vm8408_vm5, %v7077_v10, %v3728_v16  ;;  %v4134_v52 = vunpack.c.l.b16 %v4109_v27  ;;  %v4563_v33 = vshll.u32 %v9878_v38, 16  ;;  %5057 = vmatpush.bf16.msra.mxu0 %v7993_v61  ;;  %v7992_v16 = vld [vmem:[%s10534_s3 + $0x620] sm:$0xff]  ;;  %v4271_v45 = vsel %vm8408_vm5, %v7242_v19, %v4270_v20  ;;  %v7370_v61 = vld [vmem:[%s9529_s15 + $0x18] sm:$0xf] }
 0x158   : > { %v2731_v29 = vadd.f32 %v9732_v30, %v2557_v24  ;;  %v4095_v5 = vsel %vm8344_vm2, %v4090_v47, %v4094_v62  ;;  %v3725_v7 = vsel %vm8408_vm5, %v7076_v8, %v3724_v58  ;;  %v4556_v30 = vrot.slane %v4554_v18, 4  ;;  %v7968_v58 = vld [vmem:[%s10534_s3 + $0x580] sm:$0xff] }
 0x159   : > { %v4133_v13 = vunpack.c.l.b16 %v4095_v5  ;;  %v3753_v62 = vunpack.c.l.b16 %v3725_v7  ;;  %v3754_v18 = vunpack.c.l.b16 %v3729_v12  ;;  %v4275_v5 = vsel %vm8408_vm5, %v7243_v59, %v4274_v23  ;;  %v7960_v27 = vld [vmem:[%s10534_s3 + $0x540] sm:$0xff]  ;;  %v7431_v12 = vld [vmem:[%s9529_s15 + $0x10] sm:$0xe] }
 0x15a   : > { %v9880_v22 = vadd.f32 %v2847_v57, %v2731_v29  ;;  %v7979_v57 = vld [vmem:[%s10534_s3 + $0x5d8] sm:$0xff]  ;;  %v4560_v25 = vor.u32 %v4559_v37, %v4556_v30  ;;  %v4573_v29 = vrot.slane %v4571_v28, 5  ;;  %4753 = vmatpush.bf16.msrb.mxu2 %v7968_v58  ;;  %v4305_v20 = vunpack.c.l.b16 %v4271_v45  ;;  %4507 = vmatpush.bf16.msra.mxu1 %v7960_v27 }
 0x15b   : > { %v2295_v43 = vpop.f32.mrf.mxu1  ;;  %v2850_v50 = vpop.f32.mrf.mxu0  ;;  %4924 = vmatpush.bf16.msrb.mxu3 %v7979_v57  ;;  %v9904_v8 = vpack.c.b16 %v3754_v18, %v3753_v62  ;;  %v4138_v46 = vpack.c.b16 %v4134_v52, %v4133_v13  ;;  %5058 = vmatpush.bf16.msra.mxu0 %v7992_v16  ;;  %v4306_v59 = vunpack.c.l.b16 %v4275_v5  ;;  %v7430_v13 = vld [vmem:[%s9529_s15 + $0x8] sm:$0xe]  ;;  %v4809_v52 = vrot.slane %v9878_v38, 5  ;;  %v7990_v38 = vld [vmem:[%s10534_s3 + $0x610] sm:$0xff] }
 0x15c   : > { %v2312_v24 = vadd.f32 %v2295_v43, %v9574_v40  ;;  %v9898_v53 = vpop.f32.mrf.mxu2  ;;  %v9902_v47 = vpop.f32.mrf.mxu3  ;;  %v4577_v40 = vshll.u32 %v9889_v2, 16  ;;  %v4574_v63 = vor.u32 %v4573_v29, %v4570_v9  ;;  %v7439_v57 = vrot.slane %v7431_v12, 9  ;;  %v7976_v9 = vld [vmem:[%s10534_s3 + $0x5c0] sm:$0xff] }
 0x15d   : > { %v4813_v18 = vrot.slane %v9889_v2, 5  ;;  %v4311_v23 = vpack.c.b16 %v4306_v59, %v4305_v20 }
 0x15e   : > { %3824 = vmatmul.bf16.gmra.mxu1 %v9734_v49  ;;  %v2558_v10 = vadd.f32 %v9762_v60, %v2312_v24  ;;  %4378 = vmatmul.bf16.gmra.mxu0 %v9826_v55  ;;  %v4561_v60 = vrot.slane %v4560_v25, 4  ;;  %v4565_v55 = vrot.slane %v4563_v33, 5  ;;  %v4575_v30 = vrot.slane %v4574_v63, 4  ;;  %v7372_v25 = vld [vmem:[%s9529_s15 + $0x20] sm:$0xf] }
 0x15f   : > { %4925 = vmatpush.bf16.msrb.mxu3 %v7978_v26  ;;  %5059 = vmatpush.bf16.msra.mxu0 %v7991_v51  ;;  %v4582_v24 = vshrl.u32 %v7370_v61, 16  ;;  %v4585_v33 = vshll.u32 %v7370_v61, 16  ;;  %v4596_v28 = vshrl.u32 %v7372_v25, 16  ;;  %v4814_v58 = vsel %vm8408_vm5, %v7439_v57, %v4813_v18  ;;  %v9973_v26 = vld [vmem:[%s9529_s15 + $0x1c] sm:$0x1] }
 0x160   : > { %v2732_v49 = vadd.f32 %v9768_v39, %v2558_v10  ;;  %v4579_v39 = vrot.slane %v4577_v40, 5  ;;  %4214 = vmatmul.bf16.gmra.mxu3 %v4138_v46  ;;  %v4566_v17 = vsel %vm8344_vm2, %v4561_v60, %v4565_v55  ;;  %v4235_v60 = vld [vmem:[%s9529_s15 + $0x38] sm:$0xe]  ;;  %v4857_v55 = vunpack.c.l.b16 %v4814_v58 }
 0x161   : > { %3968 = vmatmul.bf16.gmra.mxu2 %v7157_v31  ;;  %v4599_v31 = vshll.u32 %v7372_v25, 16  ;;  %v4584_v40 = vrot.slane %v4582_v24, 4  ;;  %v4682_v10 = vunpack.c.l.b16 %v4566_v17  ;;  %v4587_v16 = vrot.slane %v4585_v33, 5  ;;  %v7432_v58 = vld [vmem:[%s9529_s15 + $0x18] sm:$0xe] }
 0x162   : > { %v9933_v7 = vadd.f32 %v2850_v50, %v2732_v49  ;;  %v4580_v50 = vsel %vm8344_vm2, %v4575_v30, %v4579_v39  ;;  %v4598_v63 = vrot.slane %v4596_v28, 4  ;;  %v7989_v30 = vld [vmem:[%s10534_s3 + $0x608] sm:$0xff]  ;;  %v7244_v51 = vrot.slane %v4234_v42, 9 }
 0x163   : > { %v2297_v41 = vpop.f32.mrf.mxu1  ;;  %v2852_v37 = vpop.f32.mrf.mxu0  ;;  %4926 = vmatpush.bf16.msrb.mxu3 %v7977_v36  ;;  %v4683_v46 = vunpack.c.l.b16 %v4580_v50  ;;  %5060 = vmatpush.bf16.msra.mxu0 %v7990_v38  ;;  %v4601_v45 = vrot.slane %v4599_v31, 5  ;;  %v4591_v20 = vshll.u32 %v9973_v26, 16  ;;  %v4278_v17 = vrot.slane %v9832_v0, 5  ;;  %v7988_v0 = vld [vmem:[%s10534_s3 + $0x600] sm:$0xff] }
 0x164   : > { %v2313_v19 = vadd.f32 %v2297_v41, %v9625_v21  ;;  %v9942_v6 = vpop.f32.mrf.mxu2  ;;  %v9951_v43 = vpop.f32.mrf.mxu3  ;;  %v7438_v21 = vrot.slane %v7430_v13, 9  ;;  %v7373_v41 = vld [vmem:[%s9529_s15 + $0x24] sm:$0x1]  ;;  %v7245_v27 = vrot.slane %v4235_v60, 9  ;;  %v4282_v13 = vrot.slane %v9835_v35, 5 }
 0x165   : > { %v4690_v59 = vpack.c.b16 %v4683_v46, %v4682_v10  ;;  %v4605_v57 = vshll.u32 %v7373_v41, 16  ;;  %v7440_v46 = vrot.slane %v7432_v58, 9 }
 0x166   : > { %v2559_v62 = vadd.f32 %v9801_v48, %v2313_v19  ;;  %v4810_v48 = vsel %vm8408_vm5, %v7438_v21, %v4809_v52  ;;  %v4588_v19 = vor.u32 %v4587_v16, %v4584_v40  ;;  %v8003_v21 = vld [vmem:[%s10534_s3 + $0x678] sm:$0xff]  ;;  %v4602_v52 = vor.u32 %v4601_v45, %v4598_v63  ;;  %v7433_v40 = vld [vmem:[%s9529_s15 + $0x20] sm:$0xe]  ;;  %v7374_v16 = vld [vmem:[%s9529_s15 + $0x28] sm:$0xf] }
 0x167   : > { %4927 = vmatpush.bf16.msrb.mxu3 %v7976_v9  ;;  %v4856_v29 = vunpack.c.l.b16 %v4810_v48  ;;  %5061 = vmatpush.bf16.msra.mxu0 %v7989_v30  ;;  %v4607_v24 = vrot.slane %v4605_v57, 5  ;;  %v7441_v42 = vrot.slane %v7433_v40, 9  ;;  %v4610_v63 = vshrl.u32 %v7374_v16, 16  ;;  %v7320_v40 = vld [vmem:[%s9529_s15 + $0x8] sm:$0xf] }
 0x168   : > { %v2733_v2 = vadd.f32 %v9803_v1, %v2559_v62  ;;  %v8011_v1 = vld [vmem:[%s10534_s3 + $0x6b8] sm:$0xff]  ;;  %5301 = vmatpush.bf16.msrb.mxu1 %v8003_v21  ;;  %v4589_v61 = vrot.slane %v4588_v19, 4  ;;  %v4283_v62 = vsel %vm8408_vm5, %v7245_v27, %v4282_v13  ;;  %v4603_v25 = vrot.slane %v4602_v52, 4  ;;  %v8009_v13 = vld [vmem:[%s10534_s3 + $0x6a8] sm:$0xff] }
 0x169   : > { %5475 = vmatpush.bf16.msra.mxu2 %v8011_v1  ;;  %v4308_v28 = vunpack.c.l.b16 %v4283_v62  ;;  %v4613_v45 = vshll.u32 %v7374_v16, 16 }
 0x16a   : > { %v9975_v49 = vadd.f32 %v2852_v37, %v2733_v2  ;;  %v4608_v1 = vsel %vm8344_vm2, %v4603_v25, %v4607_v24 }
 0x16b   : > { %v2300_v5 = vpop.f32.mrf.mxu1  ;;  %v2855_v39 = vpop.f32.mrf.mxu0  ;;  %5062 = vmatpush.bf16.msra.mxu0 %v7988_v0  ;;  %v4685_v19 = vunpack.c.l.b16 %v4608_v1  ;;  %v7377_v0 = vld [vmem:[%s9529_s15 + $0x34] sm:$0x1]  ;;  %v7434_v1 = vld [vmem:[%s9529_s15 + $0x28] sm:$0xe] }
 0x16c   : > { %v2314_v36 = vadd.f32 %v2300_v5, %v9675_v11  ;;  %v9986_v37 = vpop.f32.mrf.mxu2  ;;  %v9991_v12 = vpop.f32.mrf.mxu3  ;;  %v4864_v11 = vpack.c.b16 %v4857_v55, %v4856_v29  ;;  %v4821_v29 = vrot.slane %v7373_v41, 5  ;;  %v7376_v55 = vld [vmem:[%s9529_s15 + $0x30] sm:$0xf] }
 0x16d   : > { %v4627_v30 = vshll.u32 %v7376_v55, 16 }
 0x16e   : > { %3829 = vmatmul.bf16.gmra.mxu1 %v9805_v4  ;;  %v2560_v50 = vadd.f32 %v9846_v34, %v2314_v36  ;;  %4383 = vmatmul.bf16.gmra.mxu0 %v4311_v23  ;;  %v4593_v4 = vrot.slane %v4591_v20, 5  ;;  %v4279_v34 = vsel %vm8408_vm5, %v7244_v51, %v4278_v17  ;;  %v8002_v23 = vld [vmem:[%s10534_s3 + $0x670] sm:$0xff]  ;;  %v4612_v36 = vrot.slane %v4610_v63, 4 }
 0x16f   : > { %v4307_v48 = vunpack.c.l.b16 %v4279_v34  ;;  %5302 = vmatpush.bf16.msrb.mxu1 %v8002_v23  ;;  %v4615_v17 = vrot.slane %v4613_v45, 5  ;;  %v4629_v21 = vrot.slane %v4627_v30, 5  ;;  %v7442_v45 = vrot.slane %v7434_v1, 9 }
 0x170   : > { %v2734_v35 = vadd.f32 %v9854_v15, %v2560_v50  ;;  %4928 = vmatmul.bf16.vlgmr.msrb.gmra.mxu3 %v4864_v11  ;;  %v8010_v15 = vld [vmem:[%s10534_s3 + $0x6b0] sm:$0xff]  ;;  %v4594_v2 = vsel %vm8344_vm2, %v4589_v61, %v4593_v4 }
 0x171   : > { %4754 = vmatmul.bf16.vlgmr.msrb.gmra.mxu2 %v4690_v59  ;;  %v4684_v51 = vunpack.c.l.b16 %v4594_v2  ;;  %v7375_v59 = vld [vmem:[%s9529_s15 + $0x2c] sm:$0x1]  ;;  %v4616_v61 = vor.u32 %v4615_v17, %v4612_v36  ;;  %v8008_v2 = vld [vmem:[%s10534_s3 + $0x6a0] sm:$0xff] }
 0x172   : > { %v10006_v18 = vadd.f32 %v2855_v39, %v2734_v35  ;;  %5476 = vmatpush.bf16.msra.mxu2 %v8010_v15  ;;  %v4822_v39 = vsel %vm8408_vm5, %v7441_v42, %v4821_v29  ;;  %v4619_v4 = vshll.u32 %v7375_v59, 16  ;;  %v8001_v15 = vld [vmem:[%s10534_s3 + $0x668] sm:$0xff] }
 0x173   : > { %v2302_v33 = vpop.f32.mrf.mxu1  ;;  %v2857_v9 = vpop.f32.mrf.mxu0  ;;  %v4859_v50 = vunpack.c.l.b16 %v4822_v39  ;;  %v4691_v34 = vpack.c.b16 %v4685_v19, %v4684_v51  ;;  %5303 = vmatpush.bf16.msrb.mxu1 %v8001_v15 }
 0x174   : > { %v2315_v38 = vadd.f32 %v2302_v33, %v9717_v14  ;;  %v10012_v31 = vpop.f32.mrf.mxu2  ;;  %v10021_v10 = vpop.f32.mrf.mxu3  ;;  %v4817_v14 = vrot.slane %v9973_v26, 5  ;;  %v4624_v26 = vshrl.u32 %v7376_v55, 16  ;;  %v4633_v33 = vshll.u32 %v7377_v0, 16  ;;  %v7435_v55 = vld [vmem:[%s9529_s15 + $0x30] sm:$0xe] }
 0x175   : > { %v7443_v39 = vrot.slane %v7435_v55, 9 }
 0x176   : > { %v2561_v60 = vadd.f32 %v9898_v53, %v2315_v38  ;;  %v4818_v5 = vsel %vm8408_vm5, %v7440_v46, %v4817_v14  ;;  %v4312_v53 = vpack.c.b16 %v4308_v28, %v4307_v48  ;;  %v4626_v11 = vrot.slane %v4624_v26, 4  ;;  %5477 = vmatpush.bf16.msra.mxu2 %v8009_v13  ;;  %v7520_v46 = vld [vmem:[%s9529_s15 + $0x10] sm:$0xf]  ;;  %v7984_v14 = vld [vmem:[%s9529_s15 + $0x14] sm:$0xf0] }
 0x177   : > { %v4858_v20 = vunpack.c.l.b16 %v4818_v5  ;;  %v4617_v38 = vrot.slane %v4616_v61, 4  ;;  %v4621_v48 = vrot.slane %v4619_v4, 5  ;;  %v4635_v28 = vrot.slane %v4633_v33, 5  ;;  %v8007_v61 = vld [vmem:[%s10534_s3 + $0x698] sm:$0xff] }
 0x178   : > { %v2735_v41 = vadd.f32 %v9902_v47, %v2561_v60  ;;  %v8000_v60 = vld [vmem:[%s10534_s3 + $0x660] sm:$0xff]  ;;  %v4825_v5 = vrot.slane %v7375_v59, 5  ;;  %v4829_v26 = vrot.slane %v7377_v0, 5  ;;  %v7379_v4 = vld [vmem:[%s9529_s15 + $0x3c] sm:$0x1] }
 0x179   : > { %v4865_v24 = vpack.c.b16 %v4859_v50, %v4858_v20  ;;  %v4622_v16 = vsel %vm8344_vm2, %v4617_v38, %v4621_v48  ;;  %5304 = vmatpush.bf16.msrb.mxu1 %v8000_v60  ;;  %v7521_v50 = vor.u32 %v7984_v14, %v7520_v46  ;;  %v8006_v60 = vld [vmem:[%s10534_s3 + $0x690] sm:$0xff] }
 0x17a   : > { %v10035_v27 = vadd.f32 %v2857_v9, %v2735_v41  ;;  %5478 = vmatpush.bf16.msra.mxu2 %v8008_v2  ;;  %v4826_v19 = vsel %vm8408_vm5, %v7442_v45, %v4825_v5  ;;  %v4830_v20 = vsel %vm8408_vm5, %v7443_v39, %v4829_v26  ;;  %v7998_v5 = vld [vmem:[%s10534_s3 + $0x650] sm:$0xff]  ;;  %v7436_v39 = vld [vmem:[%s9529_s15 + $0x38] sm:$0xe]  ;;  %v7437_v26 = vld [vmem:[%s9529_s15 + $0x40] sm:$0xe] }
 0x17b   : > { %v2305_v52 = vpop.f32.mrf.mxu1  ;;  %v2860_v57 = vpop.f32.mrf.mxu0 }
 0x17c   : > { %v2316_v47 = vadd.f32 %v2305_v52, %v9749_v54  ;;  %v10042_v35 = vpop.f32.mrf.mxu2  ;;  %v10044_v62 = vpop.f32.mrf.mxu3  ;;  %v4630_v54 = vor.u32 %v4629_v21, %v4626_v11  ;;  %v4686_v11 = vunpack.c.l.b16 %v4622_v16  ;;  %v4860_v52 = vunpack.c.l.b16 %v4826_v19 }
 0x17e   : > { %3834 = vmatmul.bf16.gmra.mxu1 %v9904_v8  ;;  %v2562_v25 = vadd.f32 %v9942_v6, %v2316_v47  ;;  %4388 = vmatmul.bf16.gmra.mxu0 %v4312_v53  ;;  %v4631_v6 = vrot.slane %v4630_v54, 4  ;;  %v7380_v53 = vld [vmem:[%s9529_s15 + $0x40] sm:$0xf]  ;;  %v7381_v54 = vld [vmem:[%s9529_s15 + $0x44] sm:$0x1] }
 0x17f   : > { %v4652_v59 = vshrl.u32 %v7380_v53, 16  ;;  %v4655_v17 = vshll.u32 %v7380_v53, 16  ;;  %5479 = vmatpush.bf16.msra.mxu2 %v8007_v61  ;;  %v4837_v53 = vrot.slane %v7381_v54, 5 }
 0x180   : > { %v2736_v9 = vadd.f32 %v9951_v43, %v2562_v25  ;;  %4933 = vmatmul.bf16.gmra.mxu3 %v4865_v24  ;;  %v7956_v43 = vld [vmem:[%s9529_s15 + $0xc] sm:$0xf0]  ;;  %v4636_v41 = vsel %vm8344_vm2, %v4631_v6, %v4635_v28  ;;  %v4647_v6 = vshll.u32 %v7379_v4, 16 }
 0x181   : > { %4759 = vmatmul.bf16.gmra.mxu2 %v4691_v34  ;;  %v4687_v21 = vunpack.c.l.b16 %v4636_v41  ;;  %v4654_v25 = vrot.slane %v4652_v59, 4  ;;  %v4657_v24 = vrot.slane %v4655_v17, 5  ;;  %v7445_v41 = vrot.slane %v7437_v26, 9  ;;  %v7524_v59 = vld [vmem:[%s9529_s15 + $0x20] sm:$0xf] }
 0x182   : > { %v10052_v8 = vadd.f32 %v2860_v57, %v2736_v9  ;;  %v4861_v57 = vunpack.c.l.b16 %v4830_v20  ;;  %v4649_v46 = vrot.slane %v4647_v6, 5  ;;  %v7957_v20 = vld [vmem:[%s9529_s15 + $0x1c] sm:$0xf0]  ;;  %v7985_v17 = vld [vmem:[%s9529_s15 + $0x24] sm:$0xf0] }
 0x183   : > { %v2307_v23 = vpop.f32.mrf.mxu1  ;;  %v2862_v58 = vpop.f32.mrf.mxu0  ;;  %v4692_v38 = vpack.c.b16 %v4687_v21, %v4686_v11  ;;  %5480 = vmatpush.bf16.msra.mxu2 %v8006_v60  ;;  %v8005_v21 = vld [vmem:[%s10534_s3 + $0x688] sm:$0xff]  ;;  %v10147_v6 = vld [vmem:[%s9529_s15 + $0x14] sm:$0x1]  ;;  %v7996_v60 = vld [vmem:[%s10534_s3 + $0x640] sm:$0xff] }
 0x184   : > { %v2317_v42 = vadd.f32 %v2307_v23, %v9784_v3  ;;  %v10062_v29 = vpop.f32.mrf.mxu2  ;;  %v10071_v63 = vpop.f32.mrf.mxu3  ;;  %v7378_v3 = vld [vmem:[%s9529_s15 + $0x38] sm:$0xf]  ;;  %v4866_v48 = vpack.c.b16 %v4861_v57, %v4860_v52  ;;  %v7525_v57 = vor.u32 %v7985_v17, %v7524_v59  ;;  %v7958_v26 = vld [vmem:[%s9529_s15 + $0x2c] sm:$0xf0] }
 0x185   : > { %v4638_v36 = vshrl.u32 %v7378_v3, 16  ;;  %v4641_v51 = vshll.u32 %v7378_v3, 16  ;;  %v7999_v23 = vld [vmem:[%s10534_s3 + $0x658] sm:$0xff]  ;;  %v7444_v3 = vrot.slane %v7436_v39, 9 }
 0x186   : > { %v2563_v30 = vadd.f32 %v9986_v37, %v2317_v42  ;;  %v7321_v37 = vor.u32 %v7956_v43, %v7320_v40  ;;  %v4658_v40 = vor.u32 %v4657_v24, %v4654_v25  ;;  %v4661_v43 = vshll.u32 %v7381_v54, 16  ;;  %5305 = vmatpush.bf16.msrb.mxu1 %v7999_v23 }
 0x187   : > { %v4640_v0 = vrot.slane %v4638_v36, 4  ;;  %v4643_v34 = vrot.slane %v4641_v51, 5  ;;  %v7324_v51 = vld [vmem:[%s9529_s15 + $0x18] sm:$0xf]  ;;  %5481 = vmatpush.bf16.msra.mxu2 %v8005_v21  ;;  %v10189_v21 = vld [vmem:[%s9529_s15 + $0x24] sm:$0x1] }
 0x188   : > { %v2737_v13 = vadd.f32 %v9991_v12, %v2563_v30  ;;  %v4659_v42 = vrot.slane %v4658_v40, 4  ;;  %v4663_v16 = vrot.slane %v4661_v43, 5  ;;  %v4833_v30 = vrot.slane %v7379_v4, 5 }
 0x189   : > { %v7325_v52 = vor.u32 %v7957_v20, %v7324_v51  ;;  %v5364_v43 = vrot.slane %v10147_v6, 5 }
 0x18a   : > { %v10083_v47 = vadd.f32 %v2862_v58, %v2737_v13  ;;  %v4644_v58 = vor.u32 %v4643_v34, %v4640_v0  ;;  %v4664_v19 = vsel %vm8344_vm2, %v4659_v42, %v4663_v16  ;;  %5306 = vmatpush.bf16.msrb.mxu1 %v7998_v5  ;;  %v4834_v13 = vsel %vm8408_vm5, %v7444_v3, %v4833_v30  ;;  %v7986_v3 = vld [vmem:[%s9529_s15 + $0x34] sm:$0xf0] }
 0x18b   : > { %v3091_v15 = vpop.f32.mrf.mxu1  ;;  %v3646_v12 = vpop.f32.mrf.mxu0  ;;  %v4689_v11 = vunpack.c.l.b16 %v4664_v19  ;;  %v4862_v0 = vunpack.c.l.b16 %v4834_v13  ;;  %v7566_v13 = vld [vmem:[%s9529_s15 + $0x10] sm:$0xf] }
 0x18c   : > { %v3111_v33 = vadd.f32 %v3091_v15, %v9824_v56  ;;  %v10091_v9 = vpop.f32.mrf.mxu2  ;;  %v10094_v2 = vpop.f32.mrf.mxu3 }
 0x18e   : > { %4508 = vmatmul.bf16.vlgmr.msra.gmra.mxu1 %v7321_v37  ;;  %v3285_v28 = vadd.f32 %v10012_v31, %v3111_v33  ;;  %5063 = vmatmul.bf16.vlgmr.msra.gmra.mxu0 %v7521_v50  ;;  %v4645_v31 = vrot.slane %v4644_v58, 4  ;;  %v4838_v37 = vsel %vm8408_vm5, %v7445_v41, %v4837_v53 }
 0x18f   : > { %v4863_v61 = vunpack.c.l.b16 %v4838_v37 }
 0x190   : > { %v3420_v56 = vadd.f32 %v10021_v10, %v3285_v28  ;;  %4938 = vmatmul.bf16.gmra.mxu3 %v4866_v48  ;;  %v7630_v48 = vld [vmem:[%s9529_s15 + $0x10] sm:$0xe]  ;;  %v7631_v28 = vld [vmem:[%s9529_s15 + $0x18] sm:$0xe] }
 0x191   : > { %4764 = vmatmul.bf16.gmra.mxu2 %v4692_v38  ;;  %v4867_v33 = vpack.c.b16 %v4863_v61, %v4862_v0  ;;  %v7997_v38 = vld [vmem:[%s10534_s3 + $0x648] sm:$0xff]  ;;  %v7638_v58 = vrot.slane %v7630_v48, 9  ;;  %v5112_v61 = vshll.u32 %v7566_v13, 16 }
 0x192   : > { %v10100_v14 = vadd.f32 %v3646_v12, %v3420_v56  ;;  %v8004_v12 = vld [vmem:[%s10534_s3 + $0x680] sm:$0xff]  ;;  %5307 = vmatpush.bf16.msrb.mxu1 %v7997_v38  ;;  %v7639_v56 = vrot.slane %v7631_v28, 9 }
 0x193   : > { %v3093_v1 = vpop.f32.mrf.mxu1  ;;  %v10105_v55 = vpop.f32.mrf.mxu0  ;;  %5482 = vmatpush.bf16.msra.mxu2 %v8004_v12  ;;  %v5365_v5 = vsel %vm8408_vm5, %v7638_v58, %v5364_v43 }
 0x194   : > { %v3112_v10 = vadd.f32 %v3093_v1, %v9880_v22  ;;  %v10108_v45 = vpop.f32.mrf.mxu2  ;;  %v4650_v22 = vsel %vm8344_vm2, %v4645_v31, %v4649_v46  ;;  %v10130_v50 = vpop.f32.mrf.mxu3  ;;  %v5411_v30 = vunpack.c.l.b16 %v5365_v5  ;;  %v7987_v5 = vld [vmem:[%s9529_s15 + $0x44] sm:$0xf0] }
 0x196   : > { %v10116_v36 = vadd.f32 %v10042_v35, %v3112_v10  ;;  %v4688_v35 = vunpack.c.l.b16 %v4650_v22  ;;  %v7328_v10 = vld [vmem:[%s9529_s15 + $0x28] sm:$0xf]  ;;  %5308 = vmatpush.bf16.msrb.mxu1 %v7996_v60 }
 0x198   : > { %v4693_v15 = vpack.c.b16 %v4689_v11, %v4688_v35  ;;  %v7568_v35 = vld [vmem:[%s9529_s15 + $0x18] sm:$0xf]  ;;  %v7632_v11 = vld [vmem:[%s9529_s15 + $0x20] sm:$0xe] }
 0x19b   : > { %v3096_v4 = vpop.f32.mrf.mxu1  ;;  %v3651_v34 = vpop.f32.mrf.mxu0 }
 0x19c   : > { %v3113_v25 = vadd.f32 %v3096_v4, %v9933_v7  ;;  %v10136_v24 = vpop.f32.mrf.mxu2  ;;  %v10150_v7 = vld [vmem:[%s9529_s15 + $0x1c] sm:$0x1]  ;;  %v10156_v40 = vpop.f32.mrf.mxu3  ;;  %v5123_v4 = vshrl.u32 %v7568_v35, 16 }
 0x19d   : > { %v5368_v46 = vrot.slane %v10150_v7, 5 }
 0x19e   : > { %4513 = vmatmul.bf16.gmra.mxu1 %v7325_v52  ;;  %v3287_v54 = vadd.f32 %v10062_v29, %v3113_v25  ;;  %5068 = vmatmul.bf16.gmra.mxu0 %v7525_v57  ;;  %v10192_v52 = vld [vmem:[%s9529_s15 + $0x2c] sm:$0x1]  ;;  %v7633_v57 = vld [vmem:[%s9529_s15 + $0x28] sm:$0xe]  ;;  %v7640_v25 = vrot.slane %v7632_v11, 9  ;;  %v5125_v58 = vrot.slane %v5123_v4, 4 }
 0x19f   : > { %v5369_v39 = vsel %vm8408_vm5, %v7639_v56, %v5368_v46  ;;  %v7641_v12 = vrot.slane %v7633_v57, 9  ;;  %v7332_v56 = vld [vmem:[%s9529_s15 + $0x38] sm:$0xf]  ;;  %v10226_v4 = vld [vmem:[%s9529_s15 + $0x34] sm:$0x1] }
 0x1a0   : > { %v3422_v23 = vadd.f32 %v10071_v63, %v3287_v54  ;;  %4943 = vmatmul.bf16.gmra.mxu3 %v4867_v33  ;;  %v5412_v41 = vunpack.c.l.b16 %v5369_v39  ;;  %v5376_v54 = vrot.slane %v10192_v52, 5 }
 0x1a1   : > { %4769 = vmatmul.bf16.gmra.mxu2 %v4693_v15 }
 0x1a2   : > { %v10154_v29 = vadd.f32 %v3651_v34, %v3422_v23  ;;  %v5419_v17 = vpack.c.b16 %v5412_v41, %v5411_v30  ;;  %v5126_v34 = vshll.u32 %v7568_v35, 16  ;;  %v5114_v23 = vrot.slane %v5112_v61, 5  ;;  %v7572_v35 = vld [vmem:[%s9529_s15 + $0x28] sm:$0xf]  ;;  %v7634_v61 = vld [vmem:[%s9529_s15 + $0x30] sm:$0xe] }
 0x1a3   : > { %v3098_v31 = vpop.f32.mrf.mxu1  ;;  %v10160_v42 = vpop.f32.mrf.mxu0  ;;  %v5377_v60 = vsel %vm8408_vm5, %v7641_v12, %v5376_v54  ;;  %v5151_v12 = vshrl.u32 %v7572_v35, 16  ;;  %v5154_v54 = vshll.u32 %v7572_v35, 16 }
 0x1a4   : > { %v3114_v63 = vadd.f32 %v3098_v31, %v9975_v49  ;;  %v10163_v16 = vpop.f32.mrf.mxu2  ;;  %v7528_v49 = vld [vmem:[%s9529_s15 + $0x30] sm:$0xf]  ;;  %v10182_v59 = vpop.f32.mrf.mxu3  ;;  %v5128_v31 = vrot.slane %v5126_v34, 5  ;;  %v10229_v34 = vld [vmem:[%s9529_s15 + $0x3c] sm:$0x1] }
 0x1a5   : > { %v7529_v53 = vor.u32 %v7986_v3, %v7528_v49  ;;  %v5414_v3 = vunpack.c.l.b16 %v5377_v60 }
 0x1a6   : > { %v10169_v1 = vadd.f32 %v10091_v9, %v3114_v63  ;;  %v7329_v9 = vor.u32 %v7958_v26, %v7328_v10  ;;  %v7959_v10 = vld [vmem:[%s9529_s15 + $0x3c] sm:$0xf0]  ;;  %v5118_v26 = vshll.u32 %v10147_v6, 16 }
 0x1a7   : > { %v7333_v30 = vor.u32 %v7959_v10, %v7332_v56 }
 0x1a8   : > { %v3423_v32 = vadd.f32 %v10094_v2, %v10169_v1 }
 0x1ab   : > { %v3101_v51 = vpop.f32.mrf.mxu1  ;;  %v3656_v22 = vpop.f32.mrf.mxu0 }
 0x1ac   : > { %v3115_v19 = vadd.f32 %v3101_v51, %v10006_v18  ;;  %v10180_v20 = vpop.f32.mrf.mxu2  ;;  %v5109_v18 = vshrl.u32 %v7566_v13, 16  ;;  %v3417_v46 = vpop.f32.mrf.mxu3  ;;  %v5120_v13 = vrot.slane %v5118_v26, 5 }
 0x1ae   : > { %4518 = vmatmul.bf16.gmra.mxu1 %v7329_v9  ;;  %v3289_v37 = vadd.f32 %v10108_v45, %v3115_v19  ;;  %5073 = vmatmul.bf16.gmra.mxu0 %v7529_v53  ;;  %v5372_v45 = vrot.slane %v10189_v21, 5  ;;  %v5111_v28 = vrot.slane %v5109_v18, 4  ;;  %v5129_v9 = vor.u32 %v5128_v31, %v5125_v58 }
 0x1af   : > { %v5384_v58 = vrot.slane %v10229_v34, 5 }
 0x1b0   : > { %v3424_v0 = vadd.f32 %v10130_v50, %v3289_v37  ;;  %v5373_v63 = vsel %vm8408_vm5, %v7640_v25, %v5372_v45  ;;  %v5115_v39 = vor.u32 %v5114_v23, %v5111_v28  ;;  %v5130_v57 = vrot.slane %v5129_v9, 4 }
 0x1b1   : > { %5483 = vmatmul.bf16.vlgmr.msra.gmra.mxu2 %v5419_v17  ;;  %v5413_v49 = vunpack.c.l.b16 %v5373_v63  ;;  %v5380_v28 = vrot.slane %v10226_v4, 5 }
 0x1b2   : > { %v10196_v15 = vadd.f32 %v3656_v22, %v3424_v0  ;;  %v7570_v22 = vld [vmem:[%s9529_s15 + $0x20] sm:$0xf]  ;;  %v5116_v6 = vrot.slane %v5115_v39, 4  ;;  %v5156_v39 = vrot.slane %v5154_v54, 5  ;;  %v10269_v54 = vld [vmem:[%s9529_s15 + $0x4c] sm:$0x1] }
 0x1b3   : > { %v3103_v33 = vpop.f32.mrf.mxu1  ;;  %v10200_v38 = vpop.f32.mrf.mxu0  ;;  %v5137_v0 = vshrl.u32 %v7570_v22, 16  ;;  %v5140_v18 = vshll.u32 %v7570_v22, 16 }
 0x1b4   : > { %v3116_v50 = vadd.f32 %v3103_v33, %v10035_v27  ;;  %v10203_v48 = vpop.f32.mrf.mxu2  ;;  %v7532_v27 = vld [vmem:[%s9529_s15 + $0x40] sm:$0xf]  ;;  %v4200_v45 = vpop.f32.mrf.mxu3  ;;  %v5121_v33 = vsel %vm8344_vm2, %v5116_v6, %v5120_v13 }
 0x1b5   : > { %v7533_v41 = vor.u32 %v7987_v5, %v7532_v27  ;;  %v5139_v63 = vrot.slane %v5137_v0, 4  ;;  %v5142_v60 = vrot.slane %v5140_v18, 5  ;;  %v5153_v5 = vrot.slane %v5151_v12, 4  ;;  %v10266_v12 = vld [vmem:[%s9529_s15 + $0x44] sm:$0x1] }
 0x1b6   : > { %v10206_v43 = vadd.f32 %v10136_v24, %v3116_v50  ;;  %v5132_v24 = vshll.u32 %v10150_v7, 16  ;;  %v5420_v7 = vpack.c.b16 %v5414_v3, %v5413_v49  ;;  %v5237_v26 = vunpack.c.l.b16 %v5121_v33  ;;  %v7637_v33 = vld [vmem:[%s9529_s15 + $0x48] sm:$0xe] }
 0x1b8   : > { %v5134_v37 = vrot.slane %v5132_v24, 5 }
 0x1bb   : > { %v3106_v53 = vpop.f32.mrf.mxu1  ;;  %v3661_v51 = vpop.f32.mrf.mxu0 }
 0x1bc   : > { %v3117_v19 = vadd.f32 %v3106_v53, %v10052_v8  ;;  %v10220_v17 = vpop.f32.mrf.mxu2  ;;  %v7635_v8 = vld [vmem:[%s9529_s15 + $0x38] sm:$0xe]  ;;  %v5146_v53 = vshll.u32 %v10189_v21, 16  ;;  %v10253_v13 = vpop.f32.mrf.mxu3 }
 0x1bd   : > { %v7643_v23 = vrot.slane %v7635_v8, 9 }
 0x1be   : > { %4523 = vmatmul.bf16.gmra.mxu1 %v7333_v30  ;;  %v3291_v11 = vadd.f32 %v10163_v16, %v3117_v19  ;;  %5078 = vmatmul.bf16.gmra.mxu0 %v7533_v41  ;;  %v7642_v16 = vrot.slane %v7634_v61, 9  ;;  %v5143_v41 = vor.u32 %v5142_v60, %v5139_v63  ;;  %v7574_v61 = vld [vmem:[%s9529_s15 + $0x30] sm:$0xf]  ;;  %v7645_v63 = vrot.slane %v7637_v33, 9  ;;  %v7580_v33 = vld [vmem:[%s9529_s15 + $0x48] sm:$0xf] }
 0x1bf   : > { %v5385_v30 = vsel %vm8408_vm5, %v7643_v23, %v5384_v58  ;;  %v5165_v23 = vshrl.u32 %v7574_v61, 16  ;;  %v5168_v58 = vshll.u32 %v7574_v61, 16  ;;  %v5392_v60 = vrot.slane %v10269_v54, 5 }
 0x1c0   : > { %v3426_v25 = vadd.f32 %v10182_v59, %v3291_v11  ;;  %v5135_v59 = vsel %vm8344_vm2, %v5130_v57, %v5134_v37  ;;  %v5381_v3 = vsel %vm8408_vm5, %v7642_v16, %v5380_v28  ;;  %v5416_v19 = vunpack.c.l.b16 %v5385_v30 }
 0x1c1   : > { %5488 = vmatmul.bf16.gmra.mxu2 %v5420_v7  ;;  %v5238_v49 = vunpack.c.l.b16 %v5135_v59  ;;  %v5415_v22 = vunpack.c.l.b16 %v5381_v3  ;;  %v3421_v37 = vadd.f32 %v10044_v62, %v10116_v36  ;;  %v5144_v7 = vrot.slane %v5143_v41, 4  ;;  %v7636_v62 = vld [vmem:[%s9529_s15 + $0x40] sm:$0xe] }
 0x1c2   : > { %v10235_v50 = vadd.f32 %v3661_v51, %v3426_v25  ;;  %v5157_v51 = vor.u32 %v5156_v39, %v5153_v5  ;;  %v5148_v11 = vrot.slane %v5146_v53, 5  ;;  %v7576_v25 = vld [vmem:[%s9529_s15 + $0x38] sm:$0xf]  ;;  %v5167_v3 = vrot.slane %v5165_v23, 4 }
 0x1c3   : > { %v3108_v56 = vpop.f32.mrf.mxu1  ;;  %v3663_v31 = vpop.f32.mrf.mxu0  ;;  %v5421_v18 = vpack.c.b16 %v5416_v19, %v5415_v22  ;;  %v3667_v36 = vadd.f32 %v10105_v55, %v3421_v37  ;;  %v5388_v55 = vrot.slane %v10266_v12, 5  ;;  %v5170_v30 = vrot.slane %v5168_v58, 5 }
 0x1c4   : > { %v3118_v10 = vadd.f32 %v3108_v56, %v10083_v47  ;;  %v10242_v27 = vpop.f32.mrf.mxu2  ;;  %v5160_v47 = vshll.u32 %v10192_v52, 16  ;;  %v5158_v57 = vrot.slane %v5157_v51, 4  ;;  %v5149_v16 = vsel %vm8344_vm2, %v5144_v7, %v5148_v11 }
 0x1c5   : > { %v5182_v56 = vshll.u32 %v7576_v25, 16  ;;  %v5393_v51 = vsel %vm8408_vm5, %v7645_v63, %v5392_v60  ;;  %v5174_v37 = vshll.u32 %v10226_v4, 16  ;;  %v5207_v58 = vshrl.u32 %v7580_v33, 16 }
 0x1c6   : > { %v3292_v24 = vadd.f32 %v10180_v20, %v3118_v10  ;;  %v5245_v20 = vpack.c.b16 %v5238_v49, %v5237_v26  ;;  %v5162_v0 = vrot.slane %v5160_v47, 5  ;;  %v5239_v26 = vunpack.c.l.b16 %v5149_v16  ;;  %v4205_v49 = vpop.f32.mrf.mxu3 }
 0x1c7   : > { %v5171_v47 = vor.u32 %v5170_v30, %v5167_v3  ;;  %v5418_v19 = vunpack.c.l.b16 %v5393_v51 }
 0x1c8   : > { %v3427_v9 = vadd.f32 %v3417_v46, %v3292_v24  ;;  %v5163_v28 = vsel %vm8344_vm2, %v5158_v57, %v5162_v0 }
 0x1c9   : > { %v5240_v24 = vunpack.c.l.b16 %v5163_v28  ;;  %v5172_v0 = vrot.slane %v5171_v47, 4  ;;  %v5216_v47 = vshll.u32 %v10269_v54, 16 }
 0x1ca   : > { %v10251_v6 = vadd.f32 %v3663_v31, %v3427_v9  ;;  %v7644_v31 = vrot.slane %v7636_v62, 9  ;;  %v5184_v9 = vrot.slane %v5182_v56, 5 }
 0x1cb   : > { %v3820_v46 = vpop.f32.mrf.mxu1  ;;  %v4374_v21 = vpop.f32.mrf.mxu0 }
 0x1cc   : > { %v3840_v52 = vadd.f32 %v3820_v46, %v10100_v14  ;;  %v10258_v35 = vpop.f32.mrf.mxu2  ;;  %v5389_v53 = vsel %vm8408_vm5, %v7644_v31, %v5388_v55 }
 0x1cd   : > { %v5417_v22 = vunpack.c.l.b16 %v5389_v53  ;;  %v5202_v53 = vshll.u32 %v10266_v12, 16 }
 0x1ce   : > { %5309 = vmatmul.bf16.vlgmr.msrb.gmra.mxu1 %v5245_v20  ;;  %v3974_v8 = vadd.f32 %v10203_v48, %v3840_v52  ;;  %v5179_v48 = vshrl.u32 %v7576_v25, 16  ;;  %v5246_v20 = vpack.c.b16 %v5240_v24, %v5239_v26  ;;  %v10296_v62 = vpop.f32.mrf.mxu3  ;;  %v5209_v26 = vrot.slane %v5207_v58, 4 }
 0x1d0   : > { %v4220_v14 = vadd.f32 %v4200_v45, %v3974_v8  ;;  %v5181_v41 = vrot.slane %v5179_v48, 4  ;;  %v5176_v8 = vrot.slane %v5174_v37, 5  ;;  %v5210_v48 = vshll.u32 %v7580_v33, 16 }
 0x1d1   : > { %5493 = vmatmul.bf16.gmra.mxu2 %v5421_v18  ;;  %v5422_v18 = vpack.c.b16 %v5418_v19, %v5417_v22  ;;  %v3425_v19 = vadd.f32 %v10156_v40, %v10206_v43 }
 0x1d2   : > { %v10276_v59 = vadd.f32 %v4374_v21, %v4220_v14  ;;  %v5185_v46 = vor.u32 %v5184_v9, %v5181_v41  ;;  %v5188_v21 = vshll.u32 %v10229_v34, 16  ;;  %v5177_v2 = vsel %vm8344_vm2, %v5172_v0, %v5176_v8 }
 0x1d3   : > { %v3822_v45 = vpop.f32.mrf.mxu1  ;;  %v10280_v10 = vpop.f32.mrf.mxu0  ;;  %v5212_v24 = vrot.slane %v5210_v48, 5 }
 0x1d4   : > { %v10282_v5 = vadd.f32 %v3822_v45, %v3667_v36  ;;  %v10284_v39 = vpop.f32.mrf.mxu2  ;;  %v5186_v4 = vrot.slane %v5185_v46, 4  ;;  %v5190_v25 = vrot.slane %v5188_v21, 5  ;;  %v7578_v36 = vld [vmem:[%s9529_s15 + $0x40] sm:$0xf]  ;;  %v5204_v46 = vrot.slane %v5202_v53, 5  ;;  %s6001_s15 = sshll.u32 %s10562_s18, 6 }
 0x1d5   : > { %v5193_v28 = vshrl.u32 %v7578_v36, 16  ;;  %v5196_v23 = vshll.u32 %v7578_v36, 16  ;;  %v5213_v51 = vor.u32 %v5212_v24, %v5209_v26  ;;  %s10377_s26 = sadd.s32 %s6001_s15, %s6000_s16  ;;  %v8022_v53 = vld [vmem:[%s10541_s10 + $0x10] sm:$0xff] }
 0x1d6   : > { %v5191_v1 = vsel %vm8344_vm2, %v5186_v4, %v5190_v25  ;;  %s6002_s24 = sshll.u32 %s10377_s26, 2 }
 0x1d7   : > { %v5242_v63 = vunpack.c.l.b16 %v5191_v1  ;;  %v5195_v60 = vrot.slane %v5193_v28, 4  ;;  %v5198_v45 = vrot.slane %v5196_v23, 5  ;;  %v5214_v21 = vrot.slane %v5213_v51, 4  ;;  %v8026_v23 = vld [vmem:[%s10541_s10 + $0x30] sm:$0xff]  ;;  %s10393_s13 = scalar_lea.vmem %s10538_s7, %s6002_s24  ;;  %s538_s30 = scalar_lea.vmem %s10542_s11, %s6002_s24 }
 0x1d9   : > { %v5199_v9 = vor.u32 %v5198_v45, %v5195_v60  ;;  %v8019_v60 = vld [vmem:[%s10537_s6 + $0x38] sm:$0xff] }
 0x1da   : > { %5789 = vmatpush.bf16.msrb.mxu0 %v8019_v60  ;;  %8078 = vmatpush.bf16.msrb.mxu2 %v8019_v60 }
 0x1db   : > { %v3825_v7 = vpop.f32.mrf.mxu1  ;;  %v4379_v52 = vpop.f32.mrf.mxu0  ;;  %v5200_v37 = vrot.slane %v5199_v9, 4 }
 0x1dc   : > { %v3842_v11 = vadd.f32 %v3825_v7, %v10154_v29  ;;  %v3966_v57 = vpop.f32.mrf.mxu2  ;;  %v3669_v29 = vadd.f32 %v10160_v42, %v3423_v32  ;;  %v5241_v42 = vunpack.c.l.b16 %v5177_v2  ;;  %v5218_v7 = vrot.slane %v5216_v47, 5 }
 0x1de   : > { %5314 = vmatmul.bf16.gmra.mxu1 %v5246_v20  ;;  %v3976_v61 = vadd.f32 %v10242_v27, %v3842_v11  ;;  %v5247_v3 = vpack.c.b16 %v5242_v63, %v5241_v42  ;;  %v3671_v11 = vadd.f32 %v10200_v38, %v3425_v19  ;;  %v5219_v40 = vsel %vm8344_vm2, %v5214_v21, %v5218_v7  ;;  %v8029_v19 = vld [vmem:[%s10393_s13] sm:$0xff]  }
 0x1df   : > { %v5244_v8 = vunpack.c.l.b16 %v5219_v40  ;;  %v10405_v21 = vld [vmem:[%s10539_s8] ss:$0 sm:$0xff] }
 0x1e0   : > { %v4222_v34 = vadd.f32 %v4205_v49, %v3976_v61  ;;  %v4210_v49 = vpop.f32.mrf.mxu3 }
 0x1e1   : > { %5498 = vmatmul.bf16.gmra.mxu2 %v5422_v18 }
 0x1e2   : > { %v10301_v14 = vadd.f32 %v4379_v52, %v4222_v34 }
 0x1e3   : > { %v3827_v27 = vpop.f32.mrf.mxu1  ;;  %v10307_v16 = vpop.f32.mrf.mxu0 }
 0x1e4   : > { %v3843_v56 = vadd.f32 %v3827_v27, %v3669_v29  ;;  %v3969_v31 = vpop.f32.mrf.mxu2 }
 0x1e6   : > { %v10310_v55 = vadd.f32 %v10258_v35, %v3843_v56 }
 0x1e8   : > { %v10321_v54 = vpop.f32.mrf.mxu3 }
 0x1eb   : > { %v3830_v30 = vpop.f32.mrf.mxu1  ;;  %v4384_v41 = vpop.f32.mrf.mxu0 }
 0x1ec   : > { %v3844_v22 = vadd.f32 %v3830_v30, %v10196_v15  ;;  %v3971_v35 = vpop.f32.mrf.mxu2  ;;  %v5205_v15 = vsel %vm8344_vm2, %v5200_v37, %v5204_v46  ;;  %v8023_v30 = vld [vmem:[%s10541_s10 + $0x18] sm:$0xff]  ;;  %v8030_v37 = vunpack.c.l.bf16 %v8029_v19  ;;  %v8031_v46 = vunpack.c.h.bf16 %v8029_v19 }
 0x1ed   : > { %v5243_v61 = vunpack.c.l.b16 %v5205_v15  ;;  %v10420_v15 = vld [vmem:[%s10540_s9] ss:$0 sm:$0xff] }
 0x1ee   : > { %5319 = vmatmul.bf16.gmra.mxu1 %v5247_v3  ;;  %v3978_v20 = vadd.f32 %v10284_v39, %v3844_v22 }
 0x1ef   : > { %v5248_v38 = vpack.c.b16 %v5244_v8, %v5243_v61  ;;  %v8020_v8 = vld [vmem:[%s10541_s10] sm:$0xff] }
 0x1f0   : > { %v4224_v52 = vadd.f32 %v4210_v49, %v3978_v20  ;;  %v4215_v36 = vpop.f32.mrf.mxu3  ;;  %v8018_v49 = vld [vmem:[%s10537_s6 + $0x30] sm:$0xff] }
 0x1f1   : > { %5790 = vmatpush.bf16.msrb.mxu0 %v8018_v49  ;;  %8079 = vmatpush.bf16.msrb.mxu2 %v8018_v49 }
 0x1f2   : > { %v10319_v12 = vadd.f32 %v4384_v41, %v4224_v52  ;;  %v8021_v52 = vld [vmem:[%s10541_s10 + $0x8] sm:$0xff] }
 0x1f3   : > { %v3832_v32 = vpop.f32.mrf.mxu1  ;;  %v10327_v0 = vpop.f32.mrf.mxu0 }
 0x1f4   : > { %v3845_v43 = vadd.f32 %v3832_v32, %v3671_v11  ;;  %v4755_v39 = vpop.f32.mrf.mxu2  ;;  %v8015_v11 = vld [vmem:[%s10537_s6 + $0x18] sm:$0xff]  ;;  %v5601_v32 = vmul.f32 %v10405_v21, %v8031_v46 }
 0x1f6   : > { %v10329_v18 = vadd.f32 %v3966_v57, %v3845_v43  ;;  %v8027_v57 = vld [vmem:[%s10541_s10 + $0x38] sm:$0xff] }
 0x1f7   : > { %5712 = vmatpush.bf16.msra.mxu3 %v8027_v57  ;;  %v8013_v57 = vld [vmem:[%s10537_s6 + $0x8] sm:$0xff] }
 0x1f8   : > { %v10383_v9 = vpop.f32.mrf.mxu3 }
 0x1fb   : > { %v3835_v4 = vpop.f32.mrf.mxu1  ;;  %v4389_v29 = vpop.f32.mrf.mxu0  ;;  %5713 = vmatpush.bf16.msra.mxu3 %v8026_v23 }
 0x1fc   : > { %v3846_v25 = vadd.f32 %v3835_v4, %v10235_v50  ;;  %v10332_v34 = vpop.f32.mrf.mxu2 }
 0x1fe   : > { %5324 = vmatmul.bf16.gmra.mxu1 %v5248_v38  ;;  %v3980_v33 = vadd.f32 %v3969_v31, %v3846_v25  ;;  %v8014_v38 = vld [vmem:[%s10537_s6 + $0x10] sm:$0xff] }
 0x200   : > { %v4226_v44 = vadd.f32 %v4215_v36, %v3980_v33  ;;  %v4929_v61 = vpop.f32.mrf.mxu3 }
 0x202   : > { %v10334_v2 = vadd.f32 %v4389_v29, %v4226_v44 }
 0x203   : > { %v3837_v1 = vpop.f32.mrf.mxu1  ;;  %v10407_v7 = vpop.f32.mrf.mxu0 }
 0x204   : > { %v3847_v27 = vadd.f32 %v3837_v1, %v10251_v6  ;;  %v4760_v28 = vpop.f32.mrf.mxu2  ;;  %v8025_v6 = vld [vmem:[%s10541_s10 + $0x28] sm:$0xff] }
 0x205   : > { %5714 = vmatpush.bf16.msra.mxu3 %v8025_v6 }
 0x206   : > { %v10340_v50 = vadd.f32 %v3971_v35, %v3847_v27  ;;  %v8016_v35 = vld [vmem:[%s10537_s6 + $0x20] sm:$0xff] }
 0x208   : > { %v4931_v6 = vpop.f32.mrf.mxu3 }
 0x20b   : > { %v4509_v58 = vpop.f32.mrf.mxu1  ;;  %v5064_v1 = vpop.f32.mrf.mxu0 }
 0x20c   : > { %v4529_v48 = vadd.f32 %v4509_v58, %v10276_v59  ;;  %v10346_v56 = vpop.f32.mrf.mxu2  ;;  %v8024_v59 = vld [vmem:[%s10541_s10 + $0x20] sm:$0xff] }
 0x20d   : > { %5715 = vmatpush.bf16.msra.mxu3 %v8024_v59  ;;  %v8012_v58 = vld [vmem:[%s10537_s6] sm:$0xff] }
 0x20e   : > { %v10348_v31 = vadd.f32 %v4755_v39, %v4529_v48  ;;  %v5613_v39 = vadd.f32 %v10420_v15, %v5601_v32  ;;  %v8064_v48 = vld [vmem:[%s10393_s13 + $0x8] sm:$0xff]  }
 0x20f   : > { %v8034_v60 = vunpack.c.l.bf16 %v8064_v48  ;;  %v8035_v59 = vunpack.c.h.bf16 %v8064_v48 }
 0x210   : > { %vm5621_vm7 = vcmp.ge.f32.partialorder %v5613_v39, 0.0  ;;  %v5629_v36 = vmul.f32 0.01, %v5613_v39  ;;  %v4934_v46 = vpop.f32.mrf.mxu3 }
 0x211   : > { %5716 = vmatpush.bf16.msra.mxu3 %v8023_v30  ;;  %v5602_v49 = vmul.f32 %v10405_v21, %v8034_v60 }
 0x212   : > { %v5637_v29 = vsel %vm5621_vm7, %v5613_v39, %v5629_v36 }
 0x213   : > { %v10353_v42 = vpop.f32.mrf.mxu1  ;;  %v5066_v30 = vpop.f32.mrf.mxu0 }
 0x214   : > { %v4765_v63 = vpop.f32.mrf.mxu2 }
 0x215   : > { %5717 = vmatpush.bf16.msra.mxu3 %v8022_v53 }
 0x219   : > { %5718 = vmatpush.bf16.msra.mxu3 %v8021_v52 }
 0x21b   : > { %v4514_v45 = vpop.f32.mrf.mxu1  ;;  %v5069_v39 = vpop.f32.mrf.mxu0 }
 0x21c   : > { %v4531_v26 = vadd.f32 %v4514_v45, %v10301_v14  ;;  %v10369_v3 = vpop.f32.mrf.mxu2  ;;  %v8017_v14 = vld [vmem:[%s10537_s6 + $0x28] sm:$0xff] }
 0x21d   : > { %5791 = vmatpush.bf16.msrb.mxu0 %v8017_v14  ;;  %8080 = vmatpush.bf16.msrb.mxu2 %v8017_v14 }
 0x21e   : > { %v10364_v24 = vadd.f32 %v4760_v28, %v4531_v26  ;;  %5719 = vmatpush.bf16.msra.mxu3 %v8020_v8  ;;  %v3975_v28 = vadd.f32 %v10220_v17, %v10282_v5  ;;  %v5603_v17 = vmul.f32 %v10405_v21, %v8035_v59  ;;  %v5614_v5 = vadd.f32 %v10420_v15, %v5602_v49 }
 0x220   : > { %v4221_v26 = vadd.f32 %v10253_v13, %v3975_v28  ;;  %vm5622_vm8 = vcmp.ge.f32.partialorder %v5614_v5, 0.0  ;;  %v4949_v13 = vadd.f32 %v4929_v61, %v10348_v31  ;;  %v10462_v31 = vld [vmem:[%s10535_s4] ss:$0 sm:$0xff]  ;;  %v4951_v59 = vadd.f32 %v4934_v46, %v10364_v24 }
 0x221   : > { %5792 = vmatpush.bf16.msrb.mxu0 %v8016_v35  ;;  %8081 = vmatpush.bf16.msrb.mxu2 %v8016_v35 }
 0x222   : > { %v4395_v53 = vadd.f32 %v10280_v10, %v4221_v26 }
 0x223   : > { %v10375_v41 = vpop.f32.mrf.mxu1  ;;  %v5071_v26 = vpop.f32.mrf.mxu0 }
 0x224   : > { %v4770_v47 = vpop.f32.mrf.mxu2 }
 0x225   : > { %5793 = vmatpush.bf16.msrb.mxu0 %v8015_v11  ;;  %8082 = vmatpush.bf16.msrb.mxu2 %v8015_v11  ;;  %v5084_v11 = vadd.f32 %v5064_v1, %v4949_v13 }
 0x229   : > { %5794 = vmatpush.bf16.msrb.mxu0 %v8014_v38  ;;  %8083 = vmatpush.bf16.msrb.mxu2 %v8014_v38 }
 0x22b   : > { %v4519_v51 = vpop.f32.mrf.mxu1 }
 0x22c   : > { %v4533_v22 = vadd.f32 %v4519_v51, %v10319_v12  ;;  %v5600_v12 = vmul.f32 %v10405_v21, %v8030_v37  ;;  %v10432_v4 = vpop.f32.mrf.mxu2  ;;  %v5630_v51 = vmul.f32 0.01, %v5614_v5 }
 0x22d   : > { %5795 = vmatpush.bf16.msrb.mxu0 %v8013_v57  ;;  %8084 = vmatpush.bf16.msrb.mxu2 %v8013_v57 }
 0x22e   : > { %v10400_v20 = vadd.f32 %v4765_v63, %v4533_v22  ;;  %v5612_v43 = vadd.f32 %v10420_v15, %v5600_v12  ;;  %v4530_v22 = vadd.f32 %v10353_v42, %v4395_v53  ;;  %v5638_v35 = vsel %vm5622_vm8, %v5614_v5, %v5630_v51  ;;  %v8065_v42 = vld [vmem:[%s10393_s13 + $0x10] sm:$0xff]  }
 0x22f   : > { %v8038_v38 = vunpack.c.l.bf16 %v8065_v42 }
 0x230   : > { %vm5620_vm6 = vcmp.ge.f32.partialorder %v5612_v43, 0.0  ;;  %v5628_v25 = vmul.f32 0.01, %v5612_v43  ;;  %v4776_v12 = vadd.f32 %v10332_v34, %v4530_v22 }
 0x231   : > { %5796 = vmatpush.bf16.msrb.mxu0 %v8012_v58  ;;  %8085 = vmatpush.bf16.msrb.mxu2 %v8012_v58  ;;  %v5604_v36 = vmul.f32 %v10405_v21, %v8038_v38 }
 0x232   : > { %v5636_v33 = vsel %vm5620_vm6, %v5612_v43, %v5628_v25  ;;  %v4223_v43 = vadd.f32 %v10296_v62, %v10310_v55  ;;  %v4950_v61 = vadd.f32 %v4931_v6, %v4776_v12  ;;  %v8039_v25 = vunpack.c.h.bf16 %v8065_v42  ;;  %v10471_v62 = vld [vmem:[%s10536_s5] ss:$0 sm:$0xff] }
 0x233   : > { %v10422_v40 = vpop.f32.mrf.mxu1  ;;  %v5644_v44 = vpack.c.bf16 %v5637_v29, %v5636_v33  ;;  %v5616_v57 = vadd.f32 %v10420_v15, %v5604_v36 }
 0x234   : > { %v5484_v45 = vpop.f32.mrf.mxu2  ;;  %v5605_v34 = vmul.f32 %v10405_v21, %v8039_v25  ;;  %v4397_v55 = vadd.f32 %v10307_v16, %v4223_v43  ;;  %v5085_v29 = vadd.f32 %v5066_v30, %v4950_v61  ;;  %v5086_v30 = vadd.f32 %v5069_v39, %v4951_v59  ;;  %v5074_v39 = vpop.f32.mrf.mxu0 }
 0x235   : > { %5720 = vmatmul.bf16.vlgmr.msra.gmra.mxu3 %v5644_v44  ;;  %v4936_v44 = vpop.f32.mrf.mxu3  ;;  %v5632_v48 = vmul.f32 0.01, %v5616_v57  ;;  %vm5624_vm10 = vcmp.ge.f32.partialorder %v5616_v57, 0.0 }
 0x236   : > { %v5617_v1 = vadd.f32 %v10420_v15, %v5605_v34 }
 0x238   : > { %vm5625_vm11 = vcmp.ge.f32.partialorder %v5617_v1, 0.0  ;;  %v5633_v60 = vmul.f32 0.01, %v5617_v1 }
 0x23a   : > { %v5641_v49 = vsel %vm5625_vm11, %v5617_v1, %v5633_v60 }
 0x23b   : > { %v4524_v27 = vpop.f32.mrf.mxu1 }
 0x23c   : > { %v4535_v23 = vadd.f32 %v4524_v27, %v10334_v2  ;;  %v5615_v2 = vadd.f32 %v10420_v15, %v5603_v17  ;;  %v5486_v52 = vpop.f32.mrf.mxu2 }
 0x23e   : > { %v10444_v63 = vadd.f32 %v4770_v47, %v4535_v23  ;;  %v5631_v47 = vmul.f32 0.01, %v5615_v2  ;;  %vm5623_vm9 = vcmp.ge.f32.partialorder %v5615_v2, 0.0  ;;  %v4532_v23 = vadd.f32 %v10375_v41, %v4397_v55 }
 0x240   : > { %v5639_v19 = vsel %vm5623_vm9, %v5615_v2, %v5631_v47  ;;  %v4778_v2 = vadd.f32 %v10346_v56, %v4532_v23  ;;  %v4939_v47 = vpop.f32.mrf.mxu3 }
 0x241   : > { %v5645_v37 = vpack.c.bf16 %v5639_v19, %v5638_v35 }
 0x242   : > { %v4952_v22 = vadd.f32 %v4936_v44, %v4778_v2 }
 0x243   : > { %v10451_v14 = vpop.f32.mrf.mxu1 }
 0x244   : > { %v5489_v28 = vpop.f32.mrf.mxu2  ;;  %v5087_v42 = vadd.f32 %v5071_v26, %v4952_v22 }
 0x245   : > { %5725 = vmatmul.bf16.gmra.mxu3 %v5645_v37  ;;  %v8066_v37 = vld [vmem:[%s10393_s13 + $0x18] sm:$0xff]  }
 0x246   : > { %v8043_v12 = vunpack.c.h.bf16 %v8066_v37 }
 0x248   : > { %v5607_v43 = vmul.f32 %v10405_v21, %v8043_v12  ;;  %v4941_v55 = vpop.f32.mrf.mxu3 }
 0x24a   : > { %v5619_v38 = vadd.f32 %v10420_v15, %v5607_v43 }
 0x24b   : > { %v5310_v32 = vpop.f32.mrf.mxu1 }
 0x24c   : > { %v5330_v10 = vadd.f32 %v5310_v32, %v5084_v11  ;;  %v5491_v19 = vpop.f32.mrf.mxu2  ;;  %v8042_v11 = vunpack.c.l.bf16 %v8066_v37  ;;  %v4225_v32 = vadd.f32 %v10321_v54, %v10329_v18  ;;  %v4953_v54 = vadd.f32 %v4939_v47, %v10400_v20 }
 0x24d   : > { %vm5627_vm15 = vcmp.ge.f32.partialorder %v5619_v38, 0.0  ;;  %v5635_v18 = vmul.f32 0.01, %v5619_v38 }
 0x24e   : > { %v5504_v8 = vadd.f32 %v5484_v45, %v5330_v10  ;;  %v5640_v45 = vsel %vm5624_vm10, %v5616_v57, %v5632_v48  ;;  %v5606_v10 = vmul.f32 %v10405_v21, %v8042_v11  ;;  %v4399_v36 = vadd.f32 %v10327_v0, %v4225_v32  ;;  %v5076_v48 = vpop.f32.mrf.mxu0 }
 0x24f   : > { %v5646_v5 = vpack.c.bf16 %v5641_v49, %v5640_v45  ;;  %v5088_v0 = vadd.f32 %v5074_v39, %v4953_v54 }
 0x250   : > { %v5516_v33 = vmul.f32 %v10462_v31, %v5504_v8  ;;  %v5618_v8 = vadd.f32 %v10420_v15, %v5606_v10  ;;  %v4534_v21 = vadd.f32 %v10422_v40, %v4399_v36 }
 0x252   : > { %v5528_v6 = vadd.f32 %v10471_v62, %v5516_v33  ;;  %v5634_v33 = vmul.f32 0.01, %v5618_v8  ;;  %vm5626_vm14 = vcmp.ge.f32.partialorder %v5618_v8, 0.0  ;;  %v4780_v23 = vadd.f32 %v10369_v3, %v4534_v21 }
 0x253   : > { %v5312_v27 = vpop.f32.mrf.mxu1 }
 0x254   : > { %v5331_v58 = vadd.f32 %v5312_v27, %v5085_v29  ;;  %v5544_v41 = vmul.f32 0.01, %v5528_v6  ;;  %vm5536_vm12 = vcmp.ge.f32.partialorder %v5528_v6, 0.0  ;;  %v5642_v57 = vsel %vm5626_vm14, %v5618_v8, %v5634_v33  ;;  %v5494_v1 = vpop.f32.mrf.mxu2 }
 0x255   : > { %5730 = vmatmul.bf16.gmra.mxu3 %v5646_v5  ;;  %v5643_v27 = vsel %vm5627_vm15, %v5619_v38, %v5635_v18  ;;  %v4954_v59 = vadd.f32 %v4941_v55, %v4780_v23  ;;  %v4944_v5 = vpop.f32.mrf.mxu3 }
 0x256   : > { %v5505_v16 = vadd.f32 %v5486_v52, %v5331_v58  ;;  %v5552_v35 = vsel %vm5536_vm12, %v5528_v6, %v5544_v41  ;;  %v5079_v47 = vpop.f32.mrf.mxu0 }
 0x257   : > { %v5089_v2 = vadd.f32 %v5076_v48, %v4954_v59 }
 0x258   : > { %v5517_v17 = vmul.f32 %v10462_v31, %v5505_v16 }
 0x25a   : > { %v5529_v53 = vadd.f32 %v10471_v62, %v5517_v17  ;;  %v4227_v17 = vadd.f32 %v10383_v9, %v10340_v50 }
 0x25b   : > { %v5315_v51 = vpop.f32.mrf.mxu1 }
 0x25c   : > { %vm5537_vm13 = vcmp.ge.f32.partialorder %v5529_v53, 0.0  ;;  %v5545_v24 = vmul.f32 0.01, %v5529_v53  ;;  %v5332_v13 = vadd.f32 %v5315_v51, %v5086_v30  ;;  %v5496_v3 = vpop.f32.mrf.mxu2 }
 0x25d   : > { %v4946_v37 = vpop.f32.mrf.mxu3 }
 0x25e   : > { %v5553_v46 = vsel %vm5537_vm13, %v5529_v53, %v5545_v24  ;;  %v5506_v52 = vadd.f32 %v5489_v28, %v5332_v13  ;;  %v5647_v28 = vpack.c.bf16 %v5643_v27, %v5642_v57  ;;  %v4401_v53 = vadd.f32 %v10407_v7, %v4227_v17  ;;  %v5081_v43 = vpop.f32.mrf.mxu0 }
 0x25f   : > { %v5560_v56 = vpack.c.bf16 %v5553_v46, %v5552_v35  ;;  %v4955_v24 = vadd.f32 %v4944_v5, %v10444_v63 }
 0x260   : > { %v5518_v61 = vmul.f32 %v10462_v31, %v5506_v52  ;;  %v4536_v13 = vadd.f32 %v10451_v14, %v4401_v53 }
 0x261   : > { %5797 = vmatmul.bf16.vlgmr.msrb.gmra.mxu0 %v5560_v56  ;;  %v5090_v9 = vadd.f32 %v5079_v47, %v4955_v24 }
 0x262   : > { %v5530_v29 = vadd.f32 %v10471_v62, %v5518_v61 }
 0x263   : > { %v5317_v25 = vpop.f32.mrf.mxu1 }
 0x264   : > { %v5333_v34 = vadd.f32 %v5317_v25, %v5087_v42  ;;  %v5546_v58 = vmul.f32 0.01, %v5530_v29  ;;  %vm5538_vm0 = vcmp.ge.f32.partialorder %v5530_v29, 0.0  ;;  %v5499_v11 = vpop.f32.mrf.mxu2 }
 0x265   : > { %5735 = vmatmul.bf16.gmra.mxu3 %v5647_v28 }
 0x266   : > { %v5507_v44 = vadd.f32 %v5491_v19, %v5333_v34  ;;  %v5554_v45 = vsel %vm5538_vm0, %v5530_v29, %v5546_v58  ;;  %v4782_v19 = vadd.f32 %v10432_v4, %v4536_v13 }
 0x268   : > { %v5519_v15 = vmul.f32 %v10462_v31, %v5507_v44  ;;  %v4956_v56 = vadd.f32 %v4946_v37, %v4782_v19 }
 0x26a   : > { %v5531_v20 = vadd.f32 %v10471_v62, %v5519_v15  ;;  %v5091_v42 = vadd.f32 %v5081_v43, %v4956_v56 }
 0x26b   : > { %v5320_v6 = vpop.f32.mrf.mxu1 }
 0x26c   : > { %v5334_v40 = vadd.f32 %v5320_v6, %v5088_v0  ;;  %vm5539_vm1 = vcmp.ge.f32.partialorder %v5531_v20, 0.0  ;;  %v5547_v60 = vmul.f32 0.01, %v5531_v20  ;;  %v5501_v38 = vpop.f32.mrf.mxu2 }
 0x26e   : > { %v5508_v16 = vadd.f32 %v5494_v1, %v5334_v40  ;;  %v5555_v26 = vsel %vm5539_vm1, %v5531_v20, %v5547_v60 }
 0x26f   : > { %v5561_v49 = vpack.c.bf16 %v5555_v26, %v5554_v45 }
 0x270   : > { %v5520_v41 = vmul.f32 %v10462_v31, %v5508_v16 }
 0x271   : > { %5802 = vmatmul.bf16.gmra.mxu0 %v5561_v49 }
 0x272   : > { %v5532_v22 = vadd.f32 %v10471_v62, %v5520_v41 }
 0x273   : > { %v5322_v30 = vpop.f32.mrf.mxu1 }
 0x274   : > { %v5335_v51 = vadd.f32 %v5322_v30, %v5089_v2  ;;  %v5548_v52 = vmul.f32 0.01, %v5532_v22  ;;  %vm5540_vm2 = vcmp.ge.f32.partialorder %v5532_v22, 0.0 }
 0x276   : > { %v5509_v35 = vadd.f32 %v5496_v3, %v5335_v51  ;;  %v5556_v32 = vsel %vm5540_vm2, %v5532_v22, %v5548_v52 }
 0x278   : > { %v5521_v50 = vmul.f32 %v10462_v31, %v5509_v35 }
 0x27a   : > { %v5533_v46 = vadd.f32 %v10471_v62, %v5521_v50 }
 0x27b   : > { %v5325_v7 = vpop.f32.mrf.mxu1 }
 0x27c   : > { %v5336_v12 = vadd.f32 %v5325_v7, %v5090_v9  ;;  %vm5541_vm3 = vcmp.ge.f32.partialorder %v5533_v46, 0.0  ;;  %v5549_v63 = vmul.f32 0.01, %v5533_v46 }
 0x27e   : > { %v5510_v14 = vadd.f32 %v5499_v11, %v5336_v12  ;;  %v5557_v10 = vsel %vm5541_vm3, %v5533_v46, %v5549_v63 }
 0x27f   : > { %v5562_v39 = vpack.c.bf16 %v5557_v10, %v5556_v32 }
 0x280   : > { %v5522_v4 = vmul.f32 %v10462_v31, %v5510_v14 }
 0x281   : > { %5807 = vmatmul.bf16.gmra.mxu0 %v5562_v39 }
 0x282   : > { %v5534_v25 = vadd.f32 %v10471_v62, %v5522_v4 }
 0x283   : > { %v5327_v61 = vpop.f32.mrf.mxu1 }
 0x284   : > { %v5337_v8 = vadd.f32 %v5327_v61, %v5091_v42  ;;  %v5550_v33 = vmul.f32 0.01, %v5534_v25  ;;  %vm5542_vm4 = vcmp.ge.f32.partialorder %v5534_v25, 0.0 }
 0x286   : > { %v5511_v36 = vadd.f32 %v5501_v38, %v5337_v8  ;;  %v5558_v21 = vsel %vm5542_vm4, %v5534_v25, %v5550_v33 }
 0x288   : > { %v5523_v34 = vmul.f32 %v10462_v31, %v5511_v36 }
 0x28a   : > { %v5535_v54 = vadd.f32 %v10471_v62, %v5523_v34 }
 0x28c   : > { %vm5543_vm5 = vcmp.ge.f32.partialorder %v5535_v54, 0.0  ;;  %v5551_v18 = vmul.f32 0.01, %v5535_v54 }
 0x28e   : > { %v5559_v55 = vsel %vm5543_vm5, %v5535_v54, %v5551_v18 }
 0x28f   : > { %v5563_v29 = vpack.c.bf16 %v5559_v55, %v5558_v21 }
 0x291   : > { %5812 = vmatmul.bf16.vlgmr.msrb.gmra.mxu2 %v5563_v29 }
 0x2b8   : > { %v5721_v44 = vpop.f32.mrf.mxu3 }
 0x2c0   : > { %v5723_v1 = vpop.f32.mrf.mxu3 }
 0x2c8   : > { %v5726_v31 = vpop.f32.mrf.mxu3 }
 0x2d0   : > { %v5728_v23 = vpop.f32.mrf.mxu3 }
 0x2d8   : > { %v5731_v40 = vpop.f32.mrf.mxu3 }
 0x2de   : > { %v5798_v57 = vpop.f32.mrf.mxu0 }
 0x2df   : > { %v5799_v15 = vadd.f32 %v5798_v57, %v5721_v44 }
 0x2e0   : > { %v5733_v59 = vpop.f32.mrf.mxu3 }
 0x2e6   : > { %v5800_v27 = vpop.f32.mrf.mxu0 }
 0x2e7   : > { %v5801_v28 = vadd.f32 %v5800_v27, %v5723_v1 }
 0x2e8   : > { %v5736_v17 = vpop.f32.mrf.mxu3 }
 0x2e9   : > { %v8047_v62 = vpack.c.bf16 %v5801_v28, %v5799_v15 }
 0x2eb   : > { %8048 = vst [vmem:[%s538_s30] sm:$0xff] %v8047_v62  }
 0x2ee   : > { %v5803_v0 = vpop.f32.mrf.mxu0 }
 0x2ef   : > { %v5804_v58 = vadd.f32 %v5803_v0, %v5726_v31 }
 0x2f0   : > { %v5738_v3 = vpop.f32.mrf.mxu3 }
 0x2f6   : > { %v5805_v20 = vpop.f32.mrf.mxu0 }
 0x2f7   : > { %v5806_v48 = vadd.f32 %v5805_v20, %v5728_v23 }
 0x2f9   : > { %v8052_v6 = vpack.c.bf16 %v5806_v48, %v5804_v58 }
 0x2fb   : > { %8067 = vst [vmem:[%s538_s30 + $0x8] sm:$0xff] %v8052_v6  }
 0x2fe   : > { %v5808_v60 = vpop.f32.mrf.mxu0 }
 0x2ff   : > { %v5809_v45 = vadd.f32 %v5808_v60, %v5731_v40 }
 0x306   : > { %v5810_v16 = vpop.f32.mrf.mxu0 }
 0x307   : > { %v5811_v26 = vadd.f32 %v5810_v16, %v5733_v59 }
 0x309   : > { %v8057_v49 = vpack.c.bf16 %v5811_v26, %v5809_v45 }
 0x30b   : > { %8068 = vst [vmem:[%s538_s30 + $0x10] sm:$0xff] %v8057_v49  }
 0x314   : > { %v5813_v5 = vpop.f32.mrf.mxu2 }
 0x315   : > { %v5814_v41 = vadd.f32 %v5813_v5, %v5736_v17 }
 0x31c   : > { %v5815_v2 = vpop.f32.mrf.mxu2 }
 0x31d   : > { %v5816_v30 = vadd.f32 %v5815_v2, %v5738_v3 }
 0x31f   : > { %v8062_v53 = vpack.c.bf16 %v5816_v30, %v5814_v41 }
 0x321   : > { %8069 = vst [vmem:[%s538_s30 + $0x18] sm:$0xff] %v8062_v53  }
 0x322 PF: > { %s21_s21 = sadd.s32 1, %s8172_s21   ;;  %s10550_s26 = sld [smem:[#allocation2_spill]] }
 0x323   : > { %p18_p10 = scmp.ge.s32.totalorder %s21_s21, 18   ;;  %s10551_s17 = smov %s8164_s19 }
 0x324   : > { %s10552_s18 = smov %s8168_s20  ;;  %s10553_s19 = smov %s10556_s22 }
 0x325   :  { %20 = sbr.rel (!%p18_p10) target bundleno = 3 (0x3), region = 135 }
 0x328   : > { %s10554_s20 = smov %s10550_s26 }

</bundles_post_ra>
